<compile_context>
chip_gen: v6e
topology: v6e:2x2x1
jax: 0.10.0
libtpu: 0.0.40
codegen_flags: <defaults>
</compile_context>

<pallas_src>
import math

import jax
import jax.numpy as jnp
from jax.experimental import pallas as pl
from jax.experimental.pallas import tpu as pltpu


_MIB = 1024 * 1024


def _physical_vmem_bytes():
    try:
        return int(pltpu.get_tpu_info().vmem_capacity_bytes)
    except Exception:          # conservative (v7x-sized) fallback
        return 64 * _MIB


_PHYS_VMEM = _physical_vmem_bytes()
# Projections: lift v5e's 16 MiB default, stay well under physical (64 MiB on
# v7x, 128 MiB on v5e/v6e).
_PROJ_VMEM_LIMIT = min(100 * _MIB, (_PHYS_VMEM * 3) // 4)
# Recurrence: two resident bf16 W_hh^T + double-buffered time blocks.
_REC_VMEM_LIMIT = min(32 * _MIB, _PHYS_VMEM // 2)


# --------------------------------------------------------------------------
# Row-tiled projection kernels (hoisted x @ W_ih^T, concat folded via split
# weights).  Weights arrive pre-transposed in bf16; accumulation is f32.
# --------------------------------------------------------------------------
def _proj_kernel(x_ref, wt_ref, b_ref, o_ref):
    wt = wt_ref[...]
    acc = jnp.dot(x_ref[...].astype(wt.dtype), wt,
                  preferred_element_type=jnp.float32)
    o_ref[...] = (acc + b_ref[...]).astype(o_ref.dtype)


def _dual_proj_kernel(a_ref, b_ref, wat_ref, wbt_ref, bias_ref, o_ref):
    # out = [a | b] @ [[Wa]; [Wb]] + bias, without materializing the concat.
    wat = wat_ref[...]
    wbt = wbt_ref[...]
    acc = jnp.dot(a_ref[...].astype(wat.dtype), wat,
                  preferred_element_type=jnp.float32)
    acc = acc + jnp.dot(b_ref[...].astype(wbt.dtype), wbt,
                        preferred_element_type=jnp.float32)
    o_ref[...] = (acc + bias_ref[...]).astype(o_ref.dtype)


def _row_block(n, max_rows=512):
    # Full extent (always legal) for small N, else a 512-row block (multiple
    # of 8; the partial edge block is masked by Pallas).
    return n if n <= max_rows else max_rows


def linear(x2d, wt, bias, out_dtype):
    """x2d: (N, Fin) @ wt: (Fin, Dout) + bias: (1, Dout)."""
    n, fin = x2d.shape
    dout = wt.shape[1]
    bm = _row_block(n)
    flops = 2 * n * fin * dout
    bytes_acc = (n * fin * x2d.dtype.itemsize + fin * dout * wt.dtype.itemsize
                 + n * dout * jnp.dtype(out_dtype).itemsize + dout * 4)
    return pl.pallas_call(
        _proj_kernel,
        out_shape=jax.ShapeDtypeStruct((n, dout), out_dtype),
        grid=(pl.cdiv(n, bm),),
        in_specs=[
            pl.BlockSpec((bm, fin), lambda i: (i, 0)),
            pl.BlockSpec((fin, dout), lambda i: (0, 0)),
            pl.BlockSpec((1, dout), lambda i: (0, 0)),
        ],
        out_specs=pl.BlockSpec((bm, dout), lambda i: (i, 0)),
        compiler_params=pltpu.CompilerParams(
            dimension_semantics=("parallel",),
            vmem_limit_bytes=_PROJ_VMEM_LIMIT),
        cost_estimate=pl.CostEstimate(flops=flops, transcendentals=0,
                                      bytes_accessed=bytes_acc),
    )(x2d, wt, bias)


def dual_linear(a2d, b2d, wat, wbt, bias, out_dtype):
    """[a2d | b2d] @ [[wat]; [wbt]] + bias, concat folded into the matmuls."""
    n, fa = a2d.shape
    fb = b2d.shape[1]
    dout = wat.shape[1]
    bm = _row_block(n)
    flops = 2 * n * (fa + fb) * dout
    bytes_acc = (n * fa * a2d.dtype.itemsize + n * fb * b2d.dtype.itemsize
                 + (fa + fb) * dout * wat.dtype.itemsize
                 + n * dout * jnp.dtype(out_dtype).itemsize + dout * 4)
    return pl.pallas_call(
        _dual_proj_kernel,
        out_shape=jax.ShapeDtypeStruct((n, dout), out_dtype),
        grid=(pl.cdiv(n, bm),),
        in_specs=[
            pl.BlockSpec((bm, fa), lambda i: (i, 0)),
            pl.BlockSpec((bm, fb), lambda i: (i, 0)),
            pl.BlockSpec((fa, dout), lambda i: (0, 0)),
            pl.BlockSpec((fb, dout), lambda i: (0, 0)),
            pl.BlockSpec((1, dout), lambda i: (0, 0)),
        ],
        out_specs=pl.BlockSpec((bm, dout), lambda i: (i, 0)),
        compiler_params=pltpu.CompilerParams(
            dimension_semantics=("parallel",),
            vmem_limit_bytes=_PROJ_VMEM_LIMIT),
        cost_estimate=pl.CostEstimate(flops=flops, transcendentals=0,
                                      bytes_accessed=bytes_acc),
    )(a2d, b2d, wat, wbt, bias)


# --------------------------------------------------------------------------
# Fused bidirectional recurrent kernel: one grid over time blocks, both
# directions interleaved per step, both W_hh^T resident, state-masked padding.
# --------------------------------------------------------------------------
def _make_bidir_lstm_kernel(tt, d, t_real, nb):
    pad = nb * tt - t_real      # zero-padded steps at the end of the time axis

    def kernel(gxf_ref, gxb_ref, whf_ref, whb_ref,
               yf_ref, yb_ref, hn_ref, cn_ref, h_sc, c_sc):
        tb = pl.program_id(0)

        @pl.when(tb == 0)
        def _():
            h_sc[...] = jnp.zeros_like(h_sc)
            c_sc[...] = jnp.zeros_like(c_sc)

        whf = whf_ref[...]            # (D, 4D) bf16, resident (constant block)
        whb = whb_ref[...]
        h_f = h_sc[0]                 # (B, D) f32
        c_f = c_sc[0]
        h_b = h_sc[1]
        c_b = c_sc[1]

        def cell(gates, c_prev):
            # PyTorch gate order: i, f, g, o.
            i_g = jax.nn.sigmoid(gates[:, 0 * d:1 * d])
            f_g = jax.nn.sigmoid(gates[:, 1 * d:2 * d])
            g_g = jnp.tanh(gates[:, 2 * d:3 * d])
            o_g = jax.nn.sigmoid(gates[:, 3 * d:4 * d])
            c_new = f_g * c_prev + i_g * g_g
            h_new = o_g * jnp.tanh(c_new)
            return h_new, c_new

        # Fully unrolled time block; fwd walks s=0..tt-1, bwd walks s=tt-1..0.
        # The two directions are independent, so their matmuls / EUP / VPU
        # work interleave and hide each other's latency.
        for j in range(tt):
            s_f = j
            s_b = tt - 1 - j
            g_f = gxf_ref[s_f].astype(jnp.float32) + jnp.dot(
                h_f.astype(whf.dtype), whf, preferred_element_type=jnp.float32)
            g_b = gxb_ref[s_b].astype(jnp.float32) + jnp.dot(
                h_b.astype(whb.dtype), whb, preferred_element_type=jnp.float32)
            hf_new, cf_new = cell(g_f, c_f)
            hb_new, cb_new = cell(g_b, c_b)
            # Only the last `pad` in-block step positions can be padding;
            # everywhere else this masking code is not even emitted.
            if pad > 0 and s_f >= tt - pad:
                ok_f = (tb * tt + s_f) < t_real
                hf_new = jnp.where(ok_f, hf_new, h_f)
                cf_new = jnp.where(ok_f, cf_new, c_f)
            if pad > 0 and s_b >= tt - pad:
                ok_b = ((nb - 1 - tb) * tt + s_b) < t_real
                hb_new = jnp.where(ok_b, hb_new, h_b)
                cb_new = jnp.where(ok_b, cb_new, c_b)
            h_f, c_f = hf_new, cf_new
            h_b, c_b = hb_new, cb_new
            yf_ref[s_f] = h_f.astype(yf_ref.dtype)
            yb_ref[s_b] = h_b.astype(yb_ref.dtype)

        h_sc[0] = h_f
        c_sc[0] = c_f
        h_sc[1] = h_b
        c_sc[1] = c_b
        # Written every grid step (cheap) so the constant-index output block
        # is never returned uninitialized; the last write carries h_T / c_T.
        hn_ref[0] = h_f.astype(hn_ref.dtype)
        hn_ref[1] = h_b.astype(hn_ref.dtype)
        cn_ref[0] = c_f.astype(cn_ref.dtype)
        cn_ref[1] = c_b.astype(cn_ref.dtype)

    return kernel


def bidir_lstm_layer(gx, whh_t_f, whh_t_b, *, t_real, time_block,
                     out_dtype=jnp.bfloat16):
    """One bidirectional LSTM layer (fused fwd+bwd recurrence).

    gx:      (T_pad, B, 8D) bf16 — fused [fwd | bwd] gate pre-activations
             (x @ W_ih^T + b_ih + b_hh for both directions, side by side).
    whh_t_*: (D, 4D) bf16 — pre-transposed recurrent weights.
    Returns y_f (T_pad,B,D), y_b (T_pad,B,D), h_layer (2,B,D), c_layer (2,B,D).
    """
    t_pad, b, eight_d = gx.shape
    d = eight_d // 8
    tt = time_block
    assert t_pad % tt == 0, "T must be padded to a multiple of time_block"
    nb = t_pad // tt

    kernel = _make_bidir_lstm_kernel(tt, d, t_real, nb)
    flops = 2 * 2 * t_pad * b * d * (4 * d)
    transc = 2 * 5 * t_pad * b * d
    bytes_acc = (gx.size * gx.dtype.itemsize
                 + 2 * t_pad * b * d * jnp.dtype(out_dtype).itemsize
                 + 2 * d * 4 * d * whh_t_f.dtype.itemsize
                 + 4 * 2 * b * d * 4)

    y_f, y_b, h_l, c_l = pl.pallas_call(
        kernel,
        out_shape=(
            jax.ShapeDtypeStruct((t_pad, b, d), out_dtype),
            jax.ShapeDtypeStruct((t_pad, b, d), out_dtype),
            jax.ShapeDtypeStruct((2, b, d), jnp.float32),
            jax.ShapeDtypeStruct((2, b, d), jnp.float32),
        ),
        grid_spec=pltpu.PrefetchScalarGridSpec(
            num_scalar_prefetch=0,
            grid=(nb,),
            in_specs=[
                # Forward gate half: time block i, gate-dim block 0.
                pl.BlockSpec((tt, b, 4 * d), lambda i: (i, 0, 0)),
                # Backward gate half: mirrored time block, gate-dim block 1.
                pl.BlockSpec((tt, b, 4 * d), lambda i: (nb - 1 - i, 0, 1)),
                pl.BlockSpec((d, 4 * d), lambda i: (0, 0)),   # W_hh^T fwd
                pl.BlockSpec((d, 4 * d), lambda i: (0, 0)),   # W_hh^T bwd
            ],
            out_specs=[
                pl.BlockSpec((tt, b, d), lambda i: (i, 0, 0)),
                pl.BlockSpec((tt, b, d), lambda i: (nb - 1 - i, 0, 0)),
                pl.BlockSpec((2, b, d), lambda i: (0, 0, 0)),
                pl.BlockSpec((2, b, d), lambda i: (0, 0, 0)),
            ],
            scratch_shapes=[
                pltpu.VMEM((2, b, d), jnp.float32),   # h state (fwd, bwd)
                pltpu.VMEM((2, b, d), jnp.float32),   # c state (fwd, bwd)
            ],
        ),
        compiler_params=pltpu.CompilerParams(
            dimension_semantics=("arbitrary",),       # sequential recurrence
            vmem_limit_bytes=_REC_VMEM_LIMIT),
        cost_estimate=pl.CostEstimate(flops=flops, transcendentals=transc,
                                      bytes_accessed=bytes_acc),
    )(gx, gx, whh_t_f, whh_t_b)     # same slab passed twice (disjoint blocks)
    return y_f, y_b, h_l, c_l


# --------------------------------------------------------------------------
# BLSTM forward: fused projections (big MXU matmuls) + fused bidirectional
# recurrences + final Linear(2*dim -> dim).
# --------------------------------------------------------------------------
def blstm_forward(x, packed, *, time_block=8):
    """x: (T, B, D).  Returns (out (T,B,D), (h_n, c_n)) like the torch BLSTM."""
    t_real, b, d = x.shape
    out_dtype = x.dtype
    tt = time_block
    t_pad = ((t_real + tt - 1) // tt) * tt
    if t_pad != t_real:
        # Zero padding at the end; padded steps are state-masked in-kernel for
        # both directions, so they never contaminate h/c or the real outputs.
        x = jnp.pad(x, ((0, t_pad - t_real), (0, 0), (0, 0)))

    y_f = y_b = None
    h_layers, c_layers = [], []
    for li, lp in enumerate(packed["layers"]):
        if li == 0:
            gx = linear(x.reshape(t_pad * b, d), lp["wih_t"], lp["b"],
                        jnp.bfloat16)
        else:
            # Layer input is conceptually concat([y_f, y_b], -1); the concat is
            # folded into the projection via row-split (pre-packed) weights.
            gx = dual_linear(y_f.reshape(t_pad * b, d),
                             y_b.reshape(t_pad * b, d),
                             lp["wih_t_top"], lp["wih_t_bot"], lp["b"],
                             jnp.bfloat16)
        gx = gx.reshape(t_pad, b, 8 * d)
        y_f, y_b, h_l, c_l = bidir_lstm_layer(
            gx, lp["whh_t_f"], lp["whh_t_b"], t_real=t_real, time_block=tt)
        h_layers.append(h_l)
        c_layers.append(c_l)

    # Final Linear(2*dim -> dim): concat folded into split-weight dual matmul.
    out2d = dual_linear(y_f.reshape(t_pad * b, d), y_b.reshape(t_pad * b, d),
                        packed["lin_wt_top"], packed["lin_wt_bot"],
                        packed["lin_b"], out_dtype)
    out = out2d.reshape(t_pad, b, d)[:t_real]
    h_n = jnp.concatenate(h_layers, axis=0)   # (num_layers*2, B, D)
    c_n = jnp.concatenate(c_layers, axis=0)
    return out, (h_n, c_n)


# --------------------------------------------------------------------------
# Parameter init (PyTorch-like) + one-time packing: pre-transpose, bf16 cast,
# fuse the two directions' W_ih^T / biases side by side, pre-split the
# row-halves used by the dual (concat-folding) projections.
# --------------------------------------------------------------------------
def init_params(key, dim, layers=2):
    k = 1.0 / math.sqrt(dim)

    def u(kk, shape):
        return jax.random.uniform(kk, shape, jnp.float32, -k, k)

    keys = jax.random.split(key, layers * 8 + 2)
    idx = 0
    params = {"lstm": []}
    for layer in range(layers):
        in_dim = dim if layer == 0 else 2 * dim
        lp = {}
        for tag in ("f", "b"):
            lp[f"w_ih_{tag}"] = u(keys[idx], (4 * dim, in_dim)); idx += 1
            lp[f"w_hh_{tag}"] = u(keys[idx], (4 * dim, dim)); idx += 1
            b_ih = u(keys[idx], (4 * dim,)); idx += 1
            b_hh = u(keys[idx], (4 * dim,)); idx += 1
            lp[f"b_{tag}"] = b_ih + b_hh          # fused bias
        params["lstm"].append(lp)
    params["lin_w"] = u(keys[idx], (dim, 2 * dim)); idx += 1
    params["lin_b"] = u(keys[idx], (dim,)); idx += 1
    return params


def pack_params(params, compute_dtype=jnp.bfloat16):
    packed = {"layers": []}
    for li, lp in enumerate(params["lstm"]):
        d = lp["w_hh_f"].shape[1]
        # Fused input-projection weight: [fwd gates | bwd gates] side by side.
        wih_t = jnp.concatenate([lp["w_ih_f"].T, lp["w_ih_b"].T],
                                axis=1).astype(compute_dtype)     # (Fin, 8D)
        layer = {
            "whh_t_f": lp["w_hh_f"].T.astype(compute_dtype),      # (D, 4D)
            "whh_t_b": lp["w_hh_b"].T.astype(compute_dtype),
            "b": jnp.concatenate([lp["b_f"], lp["b_b"]]
                                 ).reshape(1, -1).astype(jnp.float32),
        }
        if li == 0:
            layer["wih_t"] = wih_t
        else:
            layer["wih_t_top"] = wih_t[:d]     # multiplies y_fwd
            layer["wih_t_bot"] = wih_t[d:]     # multiplies y_bwd
        packed["layers"].append(layer)
    d = params["lin_w"].shape[0]
    lin_wt = params["lin_w"].T.astype(compute_dtype)               # (2D, D)
    packed["lin_wt_top"] = lin_wt[:d]
    packed["lin_wt_bot"] = lin_wt[d:]
    packed["lin_b"] = params["lin_b"].reshape(1, -1).astype(jnp.float32)
    return packed


# --------------------------------------------------------------------------
# Pure-JAX references.  round_acts=True mirrors the kernel's mixed precision
# (bf16 matmul operands, bf16 gx / y activations, f32 accumulation & state);
# compute_dtype=f32 / round_acts=False gives PyTorch-equivalent semantics.
# --------------------------------------------------------------------------
def _lstm_dir_ref(x_in, w_ih, w_hh, b, compute_dtype, round_acts):
    t_len, bsz, _ = x_in.shape
    d = w_hh.shape[1]
    wih_t = w_ih.T.astype(compute_dtype)
    whh_t = w_hh.T.astype(compute_dtype)
    gx = (jnp.dot(x_in.reshape(t_len * bsz, -1).astype(compute_dtype), wih_t,
                  preferred_element_type=jnp.float32)
          .reshape(t_len, bsz, 4 * d) + b.astype(jnp.float32))
    if round_acts:
        gx = gx.astype(jnp.bfloat16).astype(jnp.float32)

    def step(carry, gx_t):
        h, c = carry
        g = gx_t + jnp.dot(h.astype(compute_dtype), whh_t,
                           preferred_element_type=jnp.float32)
        i = jax.nn.sigmoid(g[:, :d])
        f = jax.nn.sigmoid(g[:, d:2 * d])
        gg = jnp.tanh(g[:, 2 * d:3 * d])
        o = jax.nn.sigmoid(g[:, 3 * d:])
        c = f * c + i * gg
        h = o * jnp.tanh(c)
        return (h, c), h

    init = (jnp.zeros((bsz, d), jnp.float32), jnp.zeros((bsz, d), jnp.float32))
    (h, c), ys = jax.lax.scan(step, init, gx)
    return ys, h, c


def _blstm_ref(x, params, compute_dtype=jnp.float32, round_acts=False):
    t_len, bsz, d = x.shape
    layer_in = x
    h_fin, c_fin = [], []
    for lp in params["lstm"]:
        y_f, h_f, c_f = _lstm_dir_ref(layer_in, lp["w_ih_f"], lp["w_hh_f"],
                                      lp["b_f"], compute_dtype, round_acts)
        y_br, h_b, c_b = _lstm_dir_ref(layer_in[::-1], lp["w_ih_b"],
                                       lp["w_hh_b"], lp["b_b"], compute_dtype,
                                       round_acts)
        y_b = y_br[::-1]
        if round_acts:
            y_f = y_f.astype(jnp.bfloat16).astype(jnp.float32)
            y_b = y_b.astype(jnp.bfloat16).astype(jnp.float32)
        layer_in = jnp.concatenate([y_f, y_b], axis=-1)
        h_fin += [h_f, h_b]
        c_fin += [c_f, c_b]
    lin_wt = params["lin_w"].T.astype(compute_dtype)
    out = (jnp.dot(layer_in.reshape(t_len * bsz, 2 * d).astype(compute_dtype),
                   lin_wt, preferred_element_type=jnp.float32)
           .reshape(t_len, bsz, d) + params["lin_b"])
    return out, (jnp.stack(h_fin), jnp.stack(c_fin))


if __name__ == "__main__":
    # Small test shapes; seq=11 deliberately non-multiple of the time block so
    # the padding/state-masking path is exercised.
    dim, seq, batch, layers = 32, 11, 2, 2
    key = jax.random.PRNGKey(0)
    pkey, xkey = jax.random.split(key)
    params = init_params(pkey, dim, layers=layers)
    packed = pack_params(params, compute_dtype=jnp.bfloat16)
    x = jax.random.normal(xkey, (seq, batch, dim), jnp.float32)

    fwd = jax.jit(blstm_forward)
    out, (h_n, c_n) = fwd(x, packed)
    jax.block_until_ready((out, h_n, c_n))

    assert out.shape == (seq, batch, dim)
    assert h_n.shape == (2 * layers, batch, dim)
    assert c_n.shape == (2 * layers, batch, dim)

    # Tight check vs. a reference that mirrors the kernel's mixed precision
    # (bf16 matmul operands + bf16 gx/y activations, f32 accumulation/state).
    ref_out, (ref_h, ref_c) = _blstm_ref(x, params, jnp.bfloat16,
                                         round_acts=True)
    assert jnp.allclose(out, ref_out, atol=2e-2, rtol=2e-2)
    assert jnp.allclose(h_n, ref_h, atol=2e-2, rtol=2e-2)
    assert jnp.allclose(c_n, ref_c, atol=2e-2, rtol=2e-2)

    # Loose sanity check vs. full-f32 (PyTorch-equivalent) semantics — slack
    # accounts only for the intentional bf16 weight/activation casts.
    f32_out, (f32_h, f32_c) = _blstm_ref(x, params, jnp.float32)
    assert jnp.allclose(out, f32_out, atol=1e-1, rtol=1e-1)
    assert jnp.allclose(h_n, f32_h, atol=1e-1, rtol=1e-1)
    assert jnp.allclose(c_n, f32_c, atol=1e-1, rtol=1e-1)

    print("KERNEL_OK")
</pallas_src>

<mosaic_0001>
module attributes {stable_mosaic.version = 11 : i64} {
  func.func @_proj_kernel(%arg0: i32, %arg1: memref<32x32xf32, #tpu.memory_space<vmem>>, %arg2: memref<32x256xbf16, #tpu.memory_space<vmem>>, %arg3: memref<1x256xf32, #tpu.memory_space<vmem>>, %arg4: memref<32x256xbf16, #tpu.memory_space<vmem>>) attributes {dimension_semantics = [#tpu.dimension_semantics<parallel>], iteration_bounds = array<i64: 1>, scalar_prefetch = 0 : i64, scratch_operands = 0 : i64, tpu.core_type = #tpu.core_type<tc>, window_params = [{transform_indices = @transform_0, window_bounds = array<i64: 32, 32>}, {pipeline_mode = #tpu.pipeline_mode<synchronous>, transform_indices = @transform_1, window_bounds = array<i64: 32, 256>}, {pipeline_mode = #tpu.pipeline_mode<synchronous>, transform_indices = @transform_2, window_bounds = array<i64: 1, 256>}, {transform_indices = @transform_3, window_bounds = array<i64: 32, 256>}]} {
    %c0 = arith.constant 0 : index
    %c0_0 = arith.constant 0 : index
    %0 = vector.load %arg2[%c0, %c0_0] : memref<32x256xbf16, #tpu.memory_space<vmem>>, vector<32x256xbf16>
    %c0_1 = arith.constant 0 : index
    %c0_2 = arith.constant 0 : index
    %1 = vector.load %arg1[%c0_1, %c0_2] : memref<32x32xf32, #tpu.memory_space<vmem>>, vector<32x32xf32>
    %2 = arith.truncf %1 : vector<32x32xf32> to vector<32x32xbf16>
    %cst = arith.constant dense<0.000000e+00> : vector<32x256xf32>
    %3 = tpu.matmul %2, %0, %cst {dimension_numbers = #tpu.dot_dimension_numbers<[1], [0], [0], [1], [0, 0, 1, 1], [], []>} : vector<32x32xbf16>, vector<32x256xbf16>, vector<32x256xf32> -> vector<32x256xf32>
    %c0_3 = arith.constant 0 : index
    %c0_4 = arith.constant 0 : index
    %4 = vector.load %arg3[%c0_3, %c0_4] : memref<1x256xf32, #tpu.memory_space<vmem>>, vector<1x256xf32>
    %5 = vector.broadcast %4 : vector<1x256xf32> to vector<32x256xf32>
    %6 = arith.addf %3, %5 : vector<32x256xf32>
    %7 = arith.truncf %6 : vector<32x256xf32> to vector<32x256xbf16>
    %c0_5 = arith.constant 0 : index
    %c0_6 = arith.constant 0 : index
    %8 = vector.load %arg4[%c0_5, %c0_6] : memref<32x256xbf16, #tpu.memory_space<vmem>>, vector<32x256xbf16>
    tpu.vector_store %arg4[%c0_5, %c0_6], %7 {strides = array<i32>} : memref<32x256xbf16, #tpu.memory_space<vmem>>, vector<32x256xbf16>,
    return
  }
  func.func @transform_0(%arg0: i32) -> (i32, i32) {
    %c0_i32 = arith.constant 0 : i32
    %c0_i32_0 = arith.constant 0 : i32
    return %arg0, %c0_i32 : i32, i32
  }
  func.func @transform_1(%arg0: i32) -> (i32, i32) {
    %c0_i32 = arith.constant 0 : i32
    %c0_i32_0 = arith.constant 0 : i32
    %c0_i32_1 = arith.constant 0 : i32
    return %c0_i32, %c0_i32_0 : i32, i32
  }
  func.func @transform_2(%arg0: i32) -> (i32, i32) {
    %c0_i32 = arith.constant 0 : i32
    %c0_i32_0 = arith.constant 0 : i32
    %c0_i32_1 = arith.constant 0 : i32
    return %c0_i32, %c0_i32_0 : i32, i32
  }
  func.func @transform_3(%arg0: i32) -> (i32, i32) {
    %c0_i32 = arith.constant 0 : i32
    %c0_i32_0 = arith.constant 0 : i32
    return %arg0, %c0_i32 : i32, i32
  }
}

module attributes {stable_mosaic.version = 11 : i64} {
  func.func @kernel(%arg0: i32, %arg1: memref<8x2x128xbf16, #tpu.memory_space<vmem>>, %arg2: memref<8x2x128xbf16, #tpu.memory_space<vmem>>, %arg3: memref<32x128xbf16, #tpu.memory_space<vmem>>, %arg4: memref<32x128xbf16, #tpu.memory_space<vmem>>, %arg5: memref<8x2x32xbf16, #tpu.memory_space<vmem>>, %arg6: memref<8x2x32xbf16, #tpu.memory_space<vmem>>, %arg7: memref<2x2x32xf32, #tpu.memory_space<vmem>>, %arg8: memref<2x2x32xf32, #tpu.memory_space<vmem>>, %arg9: memref<2x2x32xf32, #tpu.memory_space<vmem>>, %arg10: memref<2x2x32xf32, #tpu.memory_space<vmem>>) attributes {dimension_semantics = [#tpu.dimension_semantics<arbitrary>], iteration_bounds = array<i64: 2>, scalar_prefetch = 0 : i64, scratch_operands = 2 : i64, tpu.core_type = #tpu.core_type<tc>, window_params = [{transform_indices = @transform_0, window_bounds = array<i64: 8, 2, 128>}, {transform_indices = @transform_1, window_bounds = array<i64: 8, 2, 128>}, {pipeline_mode = #tpu.pipeline_mode<synchronous>, transform_indices = @transform_2, window_bounds = array<i64: 32, 128>}, {pipeline_mode = #tpu.pipeline_mode<synchronous>, transform_indices = @transform_3, window_bounds = array<i64: 32, 128>}, {transform_indices = @transform_4, window_bounds = array<i64: 8, 2, 32>}, {transform_indices = @transform_5, window_bounds = array<i64: 8, 2, 32>}, {pipeline_mode = #tpu.pipeline_mode<synchronous>, transform_indices = @transform_6, window_bounds = array<i64: 2, 2, 32>}, {pipeline_mode = #tpu.pipeline_mode<synchronous>, transform_indices = @transform_7, window_bounds = array<i64: 2, 2, 32>}]} {
    %c0_i32 = arith.constant 0 : i32
    %0 = arith.cmpi eq, %arg0, %c0_i32 : i32
    %1 = arith.extui %0 : i1 to i32
    %c0_i32_0 = arith.constant 0 : i32
    %2 = arith.cmpi ne, %1, %c0_i32_0 : i32
    scf.if %2 {
      %cst_219 = arith.constant 0.000000e+00 : f32
      %652 = vector.broadcast %cst_219 : f32 to vector<2x2x32xf32>
      %c0_220 = arith.constant 0 : index
      %c0_221 = arith.constant 0 : index
      %c0_222 = arith.constant 0 : index
      %653 = vector.load %arg9[%c0_220, %c0_221, %c0_222] : memref<2x2x32xf32, #tpu.memory_space<vmem>>, vector<2x2x32xf32>
      tpu.vector_store %arg9[%c0_220, %c0_221, %c0_222], %652 {strides = array<i32>} : memref<2x2x32xf32, #tpu.memory_space<vmem>>, vector<2x2x32xf32>,
      %cst_223 = arith.constant 0.000000e+00 : f32
      %654 = vector.broadcast %cst_223 : f32 to vector<2x2x32xf32>
      %c0_224 = arith.constant 0 : index
      %c0_225 = arith.constant 0 : index
      %c0_226 = arith.constant 0 : index
      %655 = vector.load %arg10[%c0_224, %c0_225, %c0_226] : memref<2x2x32xf32, #tpu.memory_space<vmem>>, vector<2x2x32xf32>
      tpu.vector_store %arg10[%c0_224, %c0_225, %c0_226], %654 {strides = array<i32>} : memref<2x2x32xf32, #tpu.memory_space<vmem>>, vector<2x2x32xf32>,
    } else {
    }
    %c0 = arith.constant 0 : index
    %c0_1 = arith.constant 0 : index
    %3 = vector.load %arg3[%c0, %c0_1] : memref<32x128xbf16, #tpu.memory_space<vmem>>, vector<32x128xbf16>
    %c0_2 = arith.constant 0 : index
    %c0_3 = arith.constant 0 : index
    %4 = vector.load %arg4[%c0_2, %c0_3] : memref<32x128xbf16, #tpu.memory_space<vmem>>, vector<32x128xbf16>
    %c0_4 = arith.constant 0 : index
    %c0_5 = arith.constant 0 : index
    %c0_6 = arith.constant 0 : index
    %5 = vector.load %arg9[%c0_4, %c0_5, %c0_6] : memref<2x2x32xf32, #tpu.memory_space<vmem>>, vector<1x2x32xf32>
    %6 = vector.shape_cast %5 : vector<1x2x32xf32> to vector<2x32xf32>
    %c0_7 = arith.constant 0 : index
    %c0_8 = arith.constant 0 : index
    %c0_9 = arith.constant 0 : index
    %7 = vector.load %arg10[%c0_7, %c0_8, %c0_9] : memref<2x2x32xf32, #tpu.memory_space<vmem>>, vector<1x2x32xf32>
    %8 = vector.shape_cast %7 : vector<1x2x32xf32> to vector<2x32xf32>
    %c1 = arith.constant 1 : index
    %c0_10 = arith.constant 0 : index
    %c0_11 = arith.constant 0 : index
    %9 = vector.load %arg9[%c1, %c0_10, %c0_11] : memref<2x2x32xf32, #tpu.memory_space<vmem>>, vector<1x2x32xf32>
    %10 = vector.shape_cast %9 : vector<1x2x32xf32> to vector<2x32xf32>
    %c1_12 = arith.constant 1 : index
    %c0_13 = arith.constant 0 : index
    %c0_14 = arith.constant 0 : index
    %11 = vector.load %arg10[%c1_12, %c0_13, %c0_14] : memref<2x2x32xf32, #tpu.memory_space<vmem>>, vector<1x2x32xf32>
    %12 = vector.shape_cast %11 : vector<1x2x32xf32> to vector<2x32xf32>
    %c0_15 = arith.constant 0 : index
    %c0_16 = arith.constant 0 : index
    %c0_17 = arith.constant 0 : index
    %13 = vector.load %arg1[%c0_15, %c0_16, %c0_17] : memref<8x2x128xbf16, #tpu.memory_space<vmem>>, vector<1x2x128xbf16>
    %14 = vector.shape_cast %13 : vector<1x2x128xbf16> to vector<2x128xbf16>
    %15 = arith.extf %14 : vector<2x128xbf16> to vector<2x128xf32>
    %16 = arith.truncf %6 : vector<2x32xf32> to vector<2x32xbf16>
    %cst = arith.constant dense<0.000000e+00> : vector<2x128xf32>
    %17 = tpu.matmul %16, %3, %cst {dimension_numbers = #tpu.dot_dimension_numbers<[1], [0], [0], [1], [0, 0, 1, 1], [], []>} : vector<2x32xbf16>, vector<32x128xbf16>, vector<2x128xf32> -> vector<2x128xf32>
    %18 = arith.addf %15, %17 : vector<2x128xf32>
    %c7 = arith.constant 7 : index
    %c0_18 = arith.constant 0 : index
    %c0_19 = arith.constant 0 : index
    %19 = vector.load %arg2[%c7, %c0_18, %c0_19] : memref<8x2x128xbf16, #tpu.memory_space<vmem>>, vector<1x2x128xbf16>
    %20 = vector.shape_cast %19 : vector<1x2x128xbf16> to vector<2x128xbf16>
    %21 = arith.extf %20 : vector<2x128xbf16> to vector<2x128xf32>
    %22 = arith.truncf %10 : vector<2x32xf32> to vector<2x32xbf16>
    %cst_20 = arith.constant dense<0.000000e+00> : vector<2x128xf32>
    %23 = tpu.matmul %22, %4, %cst_20 {dimension_numbers = #tpu.dot_dimension_numbers<[1], [0], [0], [1], [0, 0, 1, 1], [], []>} : vector<2x32xbf16>, vector<32x128xbf16>, vector<2x128xf32> -> vector<2x128xf32>
    %24 = arith.addf %21, %23 : vector<2x128xf32>
    %25 = vector.extract_strided_slice %18 {offsets = [0, 0], sizes = [2, 32], strides = [1, 1]} : vector<2x128xf32> to vector<2x32xf32>
    %26 = arith.negf %25 : vector<2x32xf32>
    %27 = math.exp %26 : vector<2x32xf32>
    %cst_21 = arith.constant 1.000000e+00 : f32
    %28 = vector.broadcast %cst_21 : f32 to vector<2x32xf32>
    %29 = arith.addf %28, %27 : vector<2x32xf32>
    %30 = arith.divf %28, %29 : vector<2x32xf32>
    %31 = vector.extract_strided_slice %18 {offsets = [0, 32], sizes = [2, 32], strides = [1, 1]} : vector<2x128xf32> to vector<2x32xf32>
    %32 = arith.negf %31 : vector<2x32xf32>
    %33 = math.exp %32 : vector<2x32xf32>
    %cst_22 = arith.constant 1.000000e+00 : f32
    %34 = vector.broadcast %cst_22 : f32 to vector<2x32xf32>
    %35 = arith.addf %34, %33 : vector<2x32xf32>
    %36 = arith.divf %34, %35 : vector<2x32xf32>
    %37 = vector.extract_strided_slice %18 {offsets = [0, 64], sizes = [2, 32], strides = [1, 1]} : vector<2x128xf32> to vector<2x32xf32>
    %38 = math.tanh %37 : vector<2x32xf32>
    %39 = vector.extract_strided_slice %18 {offsets = [0, 96], sizes = [2, 32], strides = [1, 1]} : vector<2x128xf32> to vector<2x32xf32>
    %40 = arith.negf %39 : vector<2x32xf32>
    %41 = math.exp %40 : vector<2x32xf32>
    %cst_23 = arith.constant 1.000000e+00 : f32
    %42 = vector.broadcast %cst_23 : f32 to vector<2x32xf32>
    %43 = arith.addf %42, %41 : vector<2x32xf32>
    %44 = arith.divf %42, %43 : vector<2x32xf32>
    %45 = arith.mulf %36, %8 : vector<2x32xf32>
    %46 = arith.mulf %30, %38 : vector<2x32xf32>
    %47 = arith.addf %45, %46 : vector<2x32xf32>
    %48 = math.tanh %47 : vector<2x32xf32>
    %49 = arith.mulf %44, %48 : vector<2x32xf32>
    %50 = vector.extract_strided_slice %24 {offsets = [0, 0], sizes = [2, 32], strides = [1, 1]} : vector<2x128xf32> to vector<2x32xf32>
    %51 = arith.negf %50 : vector<2x32xf32>
    %52 = math.exp %51 : vector<2x32xf32>
    %cst_24 = arith.constant 1.000000e+00 : f32
    %53 = vector.broadcast %cst_24 : f32 to vector<2x32xf32>
    %54 = arith.addf %53, %52 : vector<2x32xf32>
    %55 = arith.divf %53, %54 : vector<2x32xf32>
    %56 = vector.extract_strided_slice %24 {offsets = [0, 32], sizes = [2, 32], strides = [1, 1]} : vector<2x128xf32> to vector<2x32xf32>
    %57 = arith.negf %56 : vector<2x32xf32>
    %58 = math.exp %57 : vector<2x32xf32>
    %cst_25 = arith.constant 1.000000e+00 : f32
    %59 = vector.broadcast %cst_25 : f32 to vector<2x32xf32>
    %60 = arith.addf %59, %58 : vector<2x32xf32>
    %61 = arith.divf %59, %60 : vector<2x32xf32>
    %62 = vector.extract_strided_slice %24 {offsets = [0, 64], sizes = [2, 32], strides = [1, 1]} : vector<2x128xf32> to vector<2x32xf32>
    %63 = math.tanh %62 : vector<2x32xf32>
    %64 = vector.extract_strided_slice %24 {offsets = [0, 96], sizes = [2, 32], strides = [1, 1]} : vector<2x128xf32> to vector<2x32xf32>
    %65 = arith.negf %64 : vector<2x32xf32>
    %66 = math.exp %65 : vector<2x32xf32>
    %cst_26 = arith.constant 1.000000e+00 : f32
    %67 = vector.broadcast %cst_26 : f32 to vector<2x32xf32>
    %68 = arith.addf %67, %66 : vector<2x32xf32>
    %69 = arith.divf %67, %68 : vector<2x32xf32>
    %70 = arith.mulf %61, %12 : vector<2x32xf32>
    %71 = arith.mulf %55, %63 : vector<2x32xf32>
    %72 = arith.addf %70, %71 : vector<2x32xf32>
    %73 = math.tanh %72 : vector<2x32xf32>
    %74 = arith.mulf %69, %73 : vector<2x32xf32>
    %c1_i32 = arith.constant 1 : i32
    %75 = arith.subi %c1_i32, %arg0 : i32
    %c8_i32 = arith.constant 8 : i32
    %76 = arith.muli %75, %c8_i32 : i32
    %c7_i32 = arith.constant 7 : i32
    %77 = arith.addi %76, %c7_i32 : i32
    %c11_i32 = arith.constant 11 : i32
    %78 = arith.cmpi slt, %77, %c11_i32 : i32
    %79 = arith.select %78, %74, %10 : vector<2x32xf32>
    %80 = arith.select %78, %72, %12 : vector<2x32xf32>
    %81 = arith.truncf %49 : vector<2x32xf32> to vector<2x32xbf16>
    %c0_27 = arith.constant 0 : index
    %c0_28 = arith.constant 0 : index
    %c0_29 = arith.constant 0 : index
    %82 = vector.load %arg5[%c0_27, %c0_28, %c0_29] : memref<8x2x32xbf16, #tpu.memory_space<vmem>>, vector<1x2x32xbf16>
    %83 = vector.shape_cast %82 : vector<1x2x32xbf16> to vector<2x32xbf16>
    %84 = vector.shape_cast %81 : vector<2x32xbf16> to vector<1x2x32xbf16>
    tpu.vector_store %arg5[%c0_27, %c0_28, %c0_29], %84 {strides = array<i32>} : memref<8x2x32xbf16, #tpu.memory_space<vmem>>, vector<1x2x32xbf16>,
    %85 = arith.truncf %79 : vector<2x32xf32> to vector<2x32xbf16>
    %c7_30 = arith.constant 7 : index
    %c0_31 = arith.constant 0 : index
    %c0_32 = arith.constant 0 : index
    %86 = vector.load %arg6[%c7_30, %c0_31, %c0_32] : memref<8x2x32xbf16, #tpu.memory_space<vmem>>, vector<1x2x32xbf16>
    %87 = vector.shape_cast %86 : vector<1x2x32xbf16> to vector<2x32xbf16>
    %88 = vector.shape_cast %85 : vector<2x32xbf16> to vector<1x2x32xbf16>
    tpu.vector_store %arg6[%c7_30, %c0_31, %c0_32], %88 {strides = array<i32>} : memref<8x2x32xbf16, #tpu.memory_space<vmem>>, vector<1x2x32xbf16>,
    %c1_33 = arith.constant 1 : index
    %c0_34 = arith.constant 0 : index
    %c0_35 = arith.constant 0 : index
    %89 = vector.load %arg1[%c1_33, %c0_34, %c0_35] : memref<8x2x128xbf16, #tpu.memory_space<vmem>>, vector<1x2x128xbf16>
    %90 = vector.shape_cast %89 : vector<1x2x128xbf16> to vector<2x128xbf16>
    %91 = arith.extf %90 : vector<2x128xbf16> to vector<2x128xf32>
    %92 = arith.truncf %49 : vector<2x32xf32> to vector<2x32xbf16>
    %cst_36 = arith.constant dense<0.000000e+00> : vector<2x128xf32>
    %93 = tpu.matmul %92, %3, %cst_36 {dimension_numbers = #tpu.dot_dimension_numbers<[1], [0], [0], [1], [0, 0, 1, 1], [], []>} : vector<2x32xbf16>, vector<32x128xbf16>, vector<2x128xf32> -> vector<2x128xf32>
    %94 = arith.addf %91, %93 : vector<2x128xf32>
    %c6 = arith.constant 6 : index
    %c0_37 = arith.constant 0 : index
    %c0_38 = arith.constant 0 : index
    %95 = vector.load %arg2[%c6, %c0_37, %c0_38] : memref<8x2x128xbf16, #tpu.memory_space<vmem>>, vector<1x2x128xbf16>
    %96 = vector.shape_cast %95 : vector<1x2x128xbf16> to vector<2x128xbf16>
    %97 = arith.extf %96 : vector<2x128xbf16> to vector<2x128xf32>
    %98 = arith.truncf %79 : vector<2x32xf32> to vector<2x32xbf16>
    %cst_39 = arith.constant dense<0.000000e+00> : vector<2x128xf32>
    %99 = tpu.matmul %98, %4, %cst_39 {dimension_numbers = #tpu.dot_dimension_numbers<[1], [0], [0], [1], [0, 0, 1, 1], [], []>} : vector<2x32xbf16>, vector<32x128xbf16>, vector<2x128xf32> -> vector<2x128xf32>
    %100 = arith.addf %97, %99 : vector<2x128xf32>
    %101 = vector.extract_strided_slice %94 {offsets = [0, 0], sizes = [2, 32], strides = [1, 1]} : vector<2x128xf32> to vector<2x32xf32>
    %102 = arith.negf %101 : vector<2x32xf32>
    %103 = math.exp %102 : vector<2x32xf32>
    %cst_40 = arith.constant 1.000000e+00 : f32
    %104 = vector.broadcast %cst_40 : f32 to vector<2x32xf32>
    %105 = arith.addf %104, %103 : vector<2x32xf32>
    %106 = arith.divf %104, %105 : vector<2x32xf32>
    %107 = vector.extract_strided_slice %94 {offsets = [0, 32], sizes = [2, 32], strides = [1, 1]} : vector<2x128xf32> to vector<2x32xf32>
    %108 = arith.negf %107 : vector<2x32xf32>
    %109 = math.exp %108 : vector<2x32xf32>
    %cst_41 = arith.constant 1.000000e+00 : f32
    %110 = vector.broadcast %cst_41 : f32 to vector<2x32xf32>
    %111 = arith.addf %110, %109 : vector<2x32xf32>
    %112 = arith.divf %110, %111 : vector<2x32xf32>
    %113 = vector.extract_strided_slice %94 {offsets = [0, 64], sizes = [2, 32], strides = [1, 1]} : vector<2x128xf32> to vector<2x32xf32>
    %114 = math.tanh %113 : vector<2x32xf32>
    %115 = vector.extract_strided_slice %94 {offsets = [0, 96], sizes = [2, 32], strides = [1, 1]} : vector<2x128xf32> to vector<2x32xf32>
    %116 = arith.negf %115 : vector<2x32xf32>
    %117 = math.exp %116 : vector<2x32xf32>
    %cst_42 = arith.constant 1.000000e+00 : f32
    %118 = vector.broadcast %cst_42 : f32 to vector<2x32xf32>
    %119 = arith.addf %118, %117 : vector<2x32xf32>
    %120 = arith.divf %118, %119 : vector<2x32xf32>
    %121 = arith.mulf %112, %47 : vector<2x32xf32>
    %122 = arith.mulf %106, %114 : vector<2x32xf32>
    %123 = arith.addf %121, %122 : vector<2x32xf32>
    %124 = math.tanh %123 : vector<2x32xf32>
    %125 = arith.mulf %120, %124 : vector<2x32xf32>
    %126 = vector.extract_strided_slice %100 {offsets = [0, 0], sizes = [2, 32], strides = [1, 1]} : vector<2x128xf32> to vector<2x32xf32>
    %127 = arith.negf %126 : vector<2x32xf32>
    %128 = math.exp %127 : vector<2x32xf32>
    %cst_43 = arith.constant 1.000000e+00 : f32
    %129 = vector.broadcast %cst_43 : f32 to vector<2x32xf32>
    %130 = arith.addf %129, %128 : vector<2x32xf32>
    %131 = arith.divf %129, %130 : vector<2x32xf32>
    %132 = vector.extract_strided_slice %100 {offsets = [0, 32], sizes = [2, 32], strides = [1, 1]} : vector<2x128xf32> to vector<2x32xf32>
    %133 = arith.negf %132 : vector<2x32xf32>
    %134 = math.exp %133 : vector<2x32xf32>
    %cst_44 = arith.constant 1.000000e+00 : f32
    %135 = vector.broadcast %cst_44 : f32 to vector<2x32xf32>
    %136 = arith.addf %135, %134 : vector<2x32xf32>
    %137 = arith.divf %135, %136 : vector<2x32xf32>
    %138 = vector.extract_strided_slice %100 {offsets = [0, 64], sizes = [2, 32], strides = [1, 1]} : vector<2x128xf32> to vector<2x32xf32>
    %139 = math.tanh %138 : vector<2x32xf32>
    %140 = vector.extract_strided_slice %100 {offsets = [0, 96], sizes = [2, 32], strides = [1, 1]} : vector<2x128xf32> to vector<2x32xf32>
    %141 = arith.negf %140 : vector<2x32xf32>
    %142 = math.exp %141 : vector<2x32xf32>
    %cst_45 = arith.constant 1.000000e+00 : f32
    %143 = vector.broadcast %cst_45 : f32 to vector<2x32xf32>
    %144 = arith.addf %143, %142 : vector<2x32xf32>
    %145 = arith.divf %143, %144 : vector<2x32xf32>
    %146 = arith.mulf %137, %80 : vector<2x32xf32>
    %147 = arith.mulf %131, %139 : vector<2x32xf32>
    %148 = arith.addf %146, %147 : vector<2x32xf32>
    %149 = math.tanh %148 : vector<2x32xf32>
    %150 = arith.mulf %145, %149 : vector<2x32xf32>
    %c1_i32_46 = arith.constant 1 : i32
    %151 = arith.subi %c1_i32_46, %arg0 : i32
    %c8_i32_47 = arith.constant 8 : i32
    %152 = arith.muli %151, %c8_i32_47 : i32
    %c6_i32 = arith.constant 6 : i32
    %153 = arith.addi %152, %c6_i32 : i32
    %c11_i32_48 = arith.constant 11 : i32
    %154 = arith.cmpi slt, %153, %c11_i32_48 : i32
    %155 = arith.select %154, %150, %79 : vector<2x32xf32>
    %156 = arith.select %154, %148, %80 : vector<2x32xf32>
    %157 = arith.truncf %125 : vector<2x32xf32> to vector<2x32xbf16>
    %c1_49 = arith.constant 1 : index
    %c0_50 = arith.constant 0 : index
    %c0_51 = arith.constant 0 : index
    %158 = vector.load %arg5[%c1_49, %c0_50, %c0_51] : memref<8x2x32xbf16, #tpu.memory_space<vmem>>, vector<1x2x32xbf16>
    %159 = vector.shape_cast %158 : vector<1x2x32xbf16> to vector<2x32xbf16>
    %160 = vector.shape_cast %157 : vector<2x32xbf16> to vector<1x2x32xbf16>
    tpu.vector_store %arg5[%c1_49, %c0_50, %c0_51], %160 {strides = array<i32>} : memref<8x2x32xbf16, #tpu.memory_space<vmem>>, vector<1x2x32xbf16>,
    %161 = arith.truncf %155 : vector<2x32xf32> to vector<2x32xbf16>
    %c6_52 = arith.constant 6 : index
    %c0_53 = arith.constant 0 : index
    %c0_54 = arith.constant 0 : index
    %162 = vector.load %arg6[%c6_52, %c0_53, %c0_54] : memref<8x2x32xbf16, #tpu.memory_space<vmem>>, vector<1x2x32xbf16>
    %163 = vector.shape_cast %162 : vector<1x2x32xbf16> to vector<2x32xbf16>
    %164 = vector.shape_cast %161 : vector<2x32xbf16> to vector<1x2x32xbf16>
    tpu.vector_store %arg6[%c6_52, %c0_53, %c0_54], %164 {strides = array<i32>} : memref<8x2x32xbf16, #tpu.memory_space<vmem>>, vector<1x2x32xbf16>,
    %c2 = arith.constant 2 : index
    %c0_55 = arith.constant 0 : index
    %c0_56 = arith.constant 0 : index
    %165 = vector.load %arg1[%c2, %c0_55, %c0_56] : memref<8x2x128xbf16, #tpu.memory_space<vmem>>, vector<1x2x128xbf16>
    %166 = vector.shape_cast %165 : vector<1x2x128xbf16> to vector<2x128xbf16>
    %167 = arith.extf %166 : vector<2x128xbf16> to vector<2x128xf32>
    %168 = arith.truncf %125 : vector<2x32xf32> to vector<2x32xbf16>
    %cst_57 = arith.constant dense<0.000000e+00> : vector<2x128xf32>
    %169 = tpu.matmul %168, %3, %cst_57 {dimension_numbers = #tpu.dot_dimension_numbers<[1], [0], [0], [1], [0, 0, 1, 1], [], []>} : vector<2x32xbf16>, vector<32x128xbf16>, vector<2x128xf32> -> vector<2x128xf32>
    %170 = arith.addf %167, %169 : vector<2x128xf32>
    %c5 = arith.constant 5 : index
    %c0_58 = arith.constant 0 : index
    %c0_59 = arith.constant 0 : index
    %171 = vector.load %arg2[%c5, %c0_58, %c0_59] : memref<8x2x128xbf16, #tpu.memory_space<vmem>>, vector<1x2x128xbf16>
    %172 = vector.shape_cast %171 : vector<1x2x128xbf16> to vector<2x128xbf16>
    %173 = arith.extf %172 : vector<2x128xbf16> to vector<2x128xf32>
    %174 = arith.truncf %155 : vector<2x32xf32> to vector<2x32xbf16>
    %cst_60 = arith.constant dense<0.000000e+00> : vector<2x128xf32>
    %175 = tpu.matmul %174, %4, %cst_60 {dimension_numbers = #tpu.dot_dimension_numbers<[1], [0], [0], [1], [0, 0, 1, 1], [], []>} : vector<2x32xbf16>, vector<32x128xbf16>, vector<2x128xf32> -> vector<2x128xf32>
    %176 = arith.addf %173, %175 : vector<2x128xf32>
    %177 = vector.extract_strided_slice %170 {offsets = [0, 0], sizes = [2, 32], strides = [1, 1]} : vector<2x128xf32> to vector<2x32xf32>
    %178 = arith.negf %177 : vector<2x32xf32>
    %179 = math.exp %178 : vector<2x32xf32>
    %cst_61 = arith.constant 1.000000e+00 : f32
    %180 = vector.broadcast %cst_61 : f32 to vector<2x32xf32>
    %181 = arith.addf %180, %179 : vector<2x32xf32>
    %182 = arith.divf %180, %181 : vector<2x32xf32>
    %183 = vector.extract_strided_slice %170 {offsets = [0, 32], sizes = [2, 32], strides = [1, 1]} : vector<2x128xf32> to vector<2x32xf32>
    %184 = arith.negf %183 : vector<2x32xf32>
    %185 = math.exp %184 : vector<2x32xf32>
    %cst_62 = arith.constant 1.000000e+00 : f32
    %186 = vector.broadcast %cst_62 : f32 to vector<2x32xf32>
    %187 = arith.addf %186, %185 : vector<2x32xf32>
    %188 = arith.divf %186, %187 : vector<2x32xf32>
    %189 = vector.extract_strided_slice %170 {offsets = [0, 64], sizes = [2, 32], strides = [1, 1]} : vector<2x128xf32> to vector<2x32xf32>
    %190 = math.tanh %189 : vector<2x32xf32>
    %191 = vector.extract_strided_slice %170 {offsets = [0, 96], sizes = [2, 32], strides = [1, 1]} : vector<2x128xf32> to vector<2x32xf32>
    %192 = arith.negf %191 : vector<2x32xf32>
    %193 = math.exp %192 : vector<2x32xf32>
    %cst_63 = arith.constant 1.000000e+00 : f32
    %194 = vector.broadcast %cst_63 : f32 to vector<2x32xf32>
    %195 = arith.addf %194, %193 : vector<2x32xf32>
    %196 = arith.divf %194, %195 : vector<2x32xf32>
    %197 = arith.mulf %188, %123 : vector<2x32xf32>
    %198 = arith.mulf %182, %190 : vector<2x32xf32>
    %199 = arith.addf %197, %198 : vector<2x32xf32>
    %200 = math.tanh %199 : vector<2x32xf32>
    %201 = arith.mulf %196, %200 : vector<2x32xf32>
    %202 = vector.extract_strided_slice %176 {offsets = [0, 0], sizes = [2, 32], strides = [1, 1]} : vector<2x128xf32> to vector<2x32xf32>
    %203 = arith.negf %202 : vector<2x32xf32>
    %204 = math.exp %203 : vector<2x32xf32>
    %cst_64 = arith.constant 1.000000e+00 : f32
    %205 = vector.broadcast %cst_64 : f32 to vector<2x32xf32>
    %206 = arith.addf %205, %204 : vector<2x32xf32>
    %207 = arith.divf %205, %206 : vector<2x32xf32>
    %208 = vector.extract_strided_slice %176 {offsets = [0, 32], sizes = [2, 32], strides = [1, 1]} : vector<2x128xf32> to vector<2x32xf32>
    %209 = arith.negf %208 : vector<2x32xf32>
    %210 = math.exp %209 : vector<2x32xf32>
    %cst_65 = arith.constant 1.000000e+00 : f32
    %211 = vector.broadcast %cst_65 : f32 to vector<2x32xf32>
    %212 = arith.addf %211, %210 : vector<2x32xf32>
    %213 = arith.divf %211, %212 : vector<2x32xf32>
    %214 = vector.extract_strided_slice %176 {offsets = [0, 64], sizes = [2, 32], strides = [1, 1]} : vector<2x128xf32> to vector<2x32xf32>
    %215 = math.tanh %214 : vector<2x32xf32>
    %216 = vector.extract_strided_slice %176 {offsets = [0, 96], sizes = [2, 32], strides = [1, 1]} : vector<2x128xf32> to vector<2x32xf32>
    %217 = arith.negf %216 : vector<2x32xf32>
    %218 = math.exp %217 : vector<2x32xf32>
    %cst_66 = arith.constant 1.000000e+00 : f32
    %219 = vector.broadcast %cst_66 : f32 to vector<2x32xf32>
    %220 = arith.addf %219, %218 : vector<2x32xf32>
    %221 = arith.divf %219, %220 : vector<2x32xf32>
    %222 = arith.mulf %213, %156 : vector<2x32xf32>
    %223 = arith.mulf %207, %215 : vector<2x32xf32>
    %224 = arith.addf %222, %223 : vector<2x32xf32>
    %225 = math.tanh %224 : vector<2x32xf32>
    %226 = arith.mulf %221, %225 : vector<2x32xf32>
    %c1_i32_67 = arith.constant 1 : i32
    %227 = arith.subi %c1_i32_67, %arg0 : i32
    %c8_i32_68 = arith.constant 8 : i32
    %228 = arith.muli %227, %c8_i32_68 : i32
    %c5_i32 = arith.constant 5 : i32
    %229 = arith.addi %228, %c5_i32 : i32
    %c11_i32_69 = arith.constant 11 : i32
    %230 = arith.cmpi slt, %229, %c11_i32_69 : i32
    %231 = arith.select %230, %226, %155 : vector<2x32xf32>
    %232 = arith.select %230, %224, %156 : vector<2x32xf32>
    %233 = arith.truncf %201 : vector<2x32xf32> to vector<2x32xbf16>
    %c2_70 = arith.constant 2 : index
    %c0_71 = arith.constant 0 : index
    %c0_72 = arith.constant 0 : index
    %234 = vector.load %arg5[%c2_70, %c0_71, %c0_72] : memref<8x2x32xbf16, #tpu.memory_space<vmem>>, vector<1x2x32xbf16>
    %235 = vector.shape_cast %234 : vector<1x2x32xbf16> to vector<2x32xbf16>
    %236 = vector.shape_cast %233 : vector<2x32xbf16> to vector<1x2x32xbf16>
    tpu.vector_store %arg5[%c2_70, %c0_71, %c0_72], %236 {strides = array<i32>} : memref<8x2x32xbf16, #tpu.memory_space<vmem>>, vector<1x2x32xbf16>,
    %237 = arith.truncf %231 : vector<2x32xf32> to vector<2x32xbf16>
    %c5_73 = arith.constant 5 : index
    %c0_74 = arith.constant 0 : index
    %c0_75 = arith.constant 0 : index
    %238 = vector.load %arg6[%c5_73, %c0_74, %c0_75] : memref<8x2x32xbf16, #tpu.memory_space<vmem>>, vector<1x2x32xbf16>
    %239 = vector.shape_cast %238 : vector<1x2x32xbf16> to vector<2x32xbf16>
    %240 = vector.shape_cast %237 : vector<2x32xbf16> to vector<1x2x32xbf16>
    tpu.vector_store %arg6[%c5_73, %c0_74, %c0_75], %240 {strides = array<i32>} : memref<8x2x32xbf16, #tpu.memory_space<vmem>>, vector<1x2x32xbf16>,
    %c3 = arith.constant 3 : index
    %c0_76 = arith.constant 0 : index
    %c0_77 = arith.constant 0 : index
    %241 = vector.load %arg1[%c3, %c0_76, %c0_77] : memref<8x2x128xbf16, #tpu.memory_space<vmem>>, vector<1x2x128xbf16>
    %242 = vector.shape_cast %241 : vector<1x2x128xbf16> to vector<2x128xbf16>
    %243 = arith.extf %242 : vector<2x128xbf16> to vector<2x128xf32>
    %244 = arith.truncf %201 : vector<2x32xf32> to vector<2x32xbf16>
    %cst_78 = arith.constant dense<0.000000e+00> : vector<2x128xf32>
    %245 = tpu.matmul %244, %3, %cst_78 {dimension_numbers = #tpu.dot_dimension_numbers<[1], [0], [0], [1], [0, 0, 1, 1], [], []>} : vector<2x32xbf16>, vector<32x128xbf16>, vector<2x128xf32> -> vector<2x128xf32>
    %246 = arith.addf %243, %245 : vector<2x128xf32>
    %c4 = arith.constant 4 : index
    %c0_79 = arith.constant 0 : index
    %c0_80 = arith.constant 0 : index
    %247 = vector.load %arg2[%c4, %c0_79, %c0_80] : memref<8x2x128xbf16, #tpu.memory_space<vmem>>, vector<1x2x128xbf16>
    %248 = vector.shape_cast %247 : vector<1x2x128xbf16> to vector<2x128xbf16>
    %249 = arith.extf %248 : vector<2x128xbf16> to vector<2x128xf32>
    %250 = arith.truncf %231 : vector<2x32xf32> to vector<2x32xbf16>
    %cst_81 = arith.constant dense<0.000000e+00> : vector<2x128xf32>
    %251 = tpu.matmul %250, %4, %cst_81 {dimension_numbers = #tpu.dot_dimension_numbers<[1], [0], [0], [1], [0, 0, 1, 1], [], []>} : vector<2x32xbf16>, vector<32x128xbf16>, vector<2x128xf32> -> vector<2x128xf32>
    %252 = arith.addf %249, %251 : vector<2x128xf32>
    %253 = vector.extract_strided_slice %246 {offsets = [0, 0], sizes = [2, 32], strides = [1, 1]} : vector<2x128xf32> to vector<2x32xf32>
    %254 = arith.negf %253 : vector<2x32xf32>
    %255 = math.exp %254 : vector<2x32xf32>
    %cst_82 = arith.constant 1.000000e+00 : f32
    %256 = vector.broadcast %cst_82 : f32 to vector<2x32xf32>
    %257 = arith.addf %256, %255 : vector<2x32xf32>
    %258 = arith.divf %256, %257 : vector<2x32xf32>
    %259 = vector.extract_strided_slice %246 {offsets = [0, 32], sizes = [2, 32], strides = [1, 1]} : vector<2x128xf32> to vector<2x32xf32>
    %260 = arith.negf %259 : vector<2x32xf32>
    %261 = math.exp %260 : vector<2x32xf32>
    %cst_83 = arith.constant 1.000000e+00 : f32
    %262 = vector.broadcast %cst_83 : f32 to vector<2x32xf32>
    %263 = arith.addf %262, %261 : vector<2x32xf32>
    %264 = arith.divf %262, %263 : vector<2x32xf32>
    %265 = vector.extract_strided_slice %246 {offsets = [0, 64], sizes = [2, 32], strides = [1, 1]} : vector<2x128xf32> to vector<2x32xf32>
    %266 = math.tanh %265 : vector<2x32xf32>
    %267 = vector.extract_strided_slice %246 {offsets = [0, 96], sizes = [2, 32], strides = [1, 1]} : vector<2x128xf32> to vector<2x32xf32>
    %268 = arith.negf %267 : vector<2x32xf32>
    %269 = math.exp %268 : vector<2x32xf32>
    %cst_84 = arith.constant 1.000000e+00 : f32
    %270 = vector.broadcast %cst_84 : f32 to vector<2x32xf32>
    %271 = arith.addf %270, %269 : vector<2x32xf32>
    %272 = arith.divf %270, %271 : vector<2x32xf32>
    %273 = arith.mulf %264, %199 : vector<2x32xf32>
    %274 = arith.mulf %258, %266 : vector<2x32xf32>
    %275 = arith.addf %273, %274 : vector<2x32xf32>
    %276 = math.tanh %275 : vector<2x32xf32>
    %277 = arith.mulf %272, %276 : vector<2x32xf32>
    %278 = vector.extract_strided_slice %252 {offsets = [0, 0], sizes = [2, 32], strides = [1, 1]} : vector<2x128xf32> to vector<2x32xf32>
    %279 = arith.negf %278 : vector<2x32xf32>
    %280 = math.exp %279 : vector<2x32xf32>
    %cst_85 = arith.constant 1.000000e+00 : f32
    %281 = vector.broadcast %cst_85 : f32 to vector<2x32xf32>
    %282 = arith.addf %281, %280 : vector<2x32xf32>
    %283 = arith.divf %281, %282 : vector<2x32xf32>
    %284 = vector.extract_strided_slice %252 {offsets = [0, 32], sizes = [2, 32], strides = [1, 1]} : vector<2x128xf32> to vector<2x32xf32>
    %285 = arith.negf %284 : vector<2x32xf32>
    %286 = math.exp %285 : vector<2x32xf32>
    %cst_86 = arith.constant 1.000000e+00 : f32
    %287 = vector.broadcast %cst_86 : f32 to vector<2x32xf32>
    %288 = arith.addf %287, %286 : vector<2x32xf32>
    %289 = arith.divf %287, %288 : vector<2x32xf32>
    %290 = vector.extract_strided_slice %252 {offsets = [0, 64], sizes = [2, 32], strides = [1, 1]} : vector<2x128xf32> to vector<2x32xf32>
    %291 = math.tanh %290 : vector<2x32xf32>
    %292 = vector.extract_strided_slice %252 {offsets = [0, 96], sizes = [2, 32], strides = [1, 1]} : vector<2x128xf32> to vector<2x32xf32>
    %293 = arith.negf %292 : vector<2x32xf32>
    %294 = math.exp %293 : vector<2x32xf32>
    %cst_87 = arith.constant 1.000000e+00 : f32
    %295 = vector.broadcast %cst_87 : f32 to vector<2x32xf32>
    %296 = arith.addf %295, %294 : vector<2x32xf32>
    %297 = arith.divf %295, %296 : vector<2x32xf32>
    %298 = arith.mulf %289, %232 : vector<2x32xf32>
    %299 = arith.mulf %283, %291 : vector<2x32xf32>
    %300 = arith.addf %298, %299 : vector<2x32xf32>
    %301 = math.tanh %300 : vector<2x32xf32>
    %302 = arith.mulf %297, %301 : vector<2x32xf32>
    %c8_i32_88 = arith.constant 8 : i32
    %303 = arith.muli %arg0, %c8_i32_88 : i32
    %c3_i32 = arith.constant 3 : i32
    %304 = arith.addi %303, %c3_i32 : i32
    %c11_i32_89 = arith.constant 11 : i32
    %305 = arith.cmpi slt, %304, %c11_i32_89 : i32
    %306 = arith.select %305, %277, %201 : vector<2x32xf32>
    %307 = arith.select %305, %275, %199 : vector<2x32xf32>
    %c1_i32_90 = arith.constant 1 : i32
    %308 = arith.subi %c1_i32_90, %arg0 : i32
    %c8_i32_91 = arith.constant 8 : i32
    %309 = arith.muli %308, %c8_i32_91 : i32
    %c4_i32 = arith.constant 4 : i32
    %310 = arith.addi %309, %c4_i32 : i32
    %c11_i32_92 = arith.constant 11 : i32
    %311 = arith.cmpi slt, %310, %c11_i32_92 : i32
    %312 = arith.select %311, %302, %231 : vector<2x32xf32>
    %313 = arith.select %311, %300, %232 : vector<2x32xf32>
    %314 = arith.truncf %306 : vector<2x32xf32> to vector<2x32xbf16>
    %c3_93 = arith.constant 3 : index
    %c0_94 = arith.constant 0 : index
    %c0_95 = arith.constant 0 : index
    %315 = vector.load %arg5[%c3_93, %c0_94, %c0_95] : memref<8x2x32xbf16, #tpu.memory_space<vmem>>, vector<1x2x32xbf16>
    %316 = vector.shape_cast %315 : vector<1x2x32xbf16> to vector<2x32xbf16>
    %317 = vector.shape_cast %314 : vector<2x32xbf16> to vector<1x2x32xbf16>
    tpu.vector_store %arg5[%c3_93, %c0_94, %c0_95], %317 {strides = array<i32>} : memref<8x2x32xbf16, #tpu.memory_space<vmem>>, vector<1x2x32xbf16>,
    %318 = arith.truncf %312 : vector<2x32xf32> to vector<2x32xbf16>
    %c4_96 = arith.constant 4 : index
    %c0_97 = arith.constant 0 : index
    %c0_98 = arith.constant 0 : index
    %319 = vector.load %arg6[%c4_96, %c0_97, %c0_98] : memref<8x2x32xbf16, #tpu.memory_space<vmem>>, vector<1x2x32xbf16>
    %320 = vector.shape_cast %319 : vector<1x2x32xbf16> to vector<2x32xbf16>
    %321 = vector.shape_cast %318 : vector<2x32xbf16> to vector<1x2x32xbf16>
    tpu.vector_store %arg6[%c4_96, %c0_97, %c0_98], %321 {strides = array<i32>} : memref<8x2x32xbf16, #tpu.memory_space<vmem>>, vector<1x2x32xbf16>,
    %c4_99 = arith.constant 4 : index
    %c0_100 = arith.constant 0 : index
    %c0_101 = arith.constant 0 : index
    %322 = vector.load %arg1[%c4_99, %c0_100, %c0_101] : memref<8x2x128xbf16, #tpu.memory_space<vmem>>, vector<1x2x128xbf16>
    %323 = vector.shape_cast %322 : vector<1x2x128xbf16> to vector<2x128xbf16>
    %324 = arith.extf %323 : vector<2x128xbf16> to vector<2x128xf32>
    %325 = arith.truncf %306 : vector<2x32xf32> to vector<2x32xbf16>
    %cst_102 = arith.constant dense<0.000000e+00> : vector<2x128xf32>
    %326 = tpu.matmul %325, %3, %cst_102 {dimension_numbers = #tpu.dot_dimension_numbers<[1], [0], [0], [1], [0, 0, 1, 1], [], []>} : vector<2x32xbf16>, vector<32x128xbf16>, vector<2x128xf32> -> vector<2x128xf32>
    %327 = arith.addf %324, %326 : vector<2x128xf32>
    %c3_103 = arith.constant 3 : index
    %c0_104 = arith.constant 0 : index
    %c0_105 = arith.constant 0 : index
    %328 = vector.load %arg2[%c3_103, %c0_104, %c0_105] : memref<8x2x128xbf16, #tpu.memory_space<vmem>>, vector<1x2x128xbf16>
    %329 = vector.shape_cast %328 : vector<1x2x128xbf16> to vector<2x128xbf16>
    %330 = arith.extf %329 : vector<2x128xbf16> to vector<2x128xf32>
    %331 = arith.truncf %312 : vector<2x32xf32> to vector<2x32xbf16>
    %cst_106 = arith.constant dense<0.000000e+00> : vector<2x128xf32>
    %332 = tpu.matmul %331, %4, %cst_106 {dimension_numbers = #tpu.dot_dimension_numbers<[1], [0], [0], [1], [0, 0, 1, 1], [], []>} : vector<2x32xbf16>, vector<32x128xbf16>, vector<2x128xf32> -> vector<2x128xf32>
    %333 = arith.addf %330, %332 : vector<2x128xf32>
    %334 = vector.extract_strided_slice %327 {offsets = [0, 0], sizes = [2, 32], strides = [1, 1]} : vector<2x128xf32> to vector<2x32xf32>
    %335 = arith.negf %334 : vector<2x32xf32>
    %336 = math.exp %335 : vector<2x32xf32>
    %cst_107 = arith.constant 1.000000e+00 : f32
    %337 = vector.broadcast %cst_107 : f32 to vector<2x32xf32>
    %338 = arith.addf %337, %336 : vector<2x32xf32>
    %339 = arith.divf %337, %338 : vector<2x32xf32>
    %340 = vector.extract_strided_slice %327 {offsets = [0, 32], sizes = [2, 32], strides = [1, 1]} : vector<2x128xf32> to vector<2x32xf32>
    %341 = arith.negf %340 : vector<2x32xf32>
    %342 = math.exp %341 : vector<2x32xf32>
    %cst_108 = arith.constant 1.000000e+00 : f32
    %343 = vector.broadcast %cst_108 : f32 to vector<2x32xf32>
    %344 = arith.addf %343, %342 : vector<2x32xf32>
    %345 = arith.divf %343, %344 : vector<2x32xf32>
    %346 = vector.extract_strided_slice %327 {offsets = [0, 64], sizes = [2, 32], strides = [1, 1]} : vector<2x128xf32> to vector<2x32xf32>
    %347 = math.tanh %346 : vector<2x32xf32>
    %348 = vector.extract_strided_slice %327 {offsets = [0, 96], sizes = [2, 32], strides = [1, 1]} : vector<2x128xf32> to vector<2x32xf32>
    %349 = arith.negf %348 : vector<2x32xf32>
    %350 = math.exp %349 : vector<2x32xf32>
    %cst_109 = arith.constant 1.000000e+00 : f32
    %351 = vector.broadcast %cst_109 : f32 to vector<2x32xf32>
    %352 = arith.addf %351, %350 : vector<2x32xf32>
    %353 = arith.divf %351, %352 : vector<2x32xf32>
    %354 = arith.mulf %345, %307 : vector<2x32xf32>
    %355 = arith.mulf %339, %347 : vector<2x32xf32>
    %356 = arith.addf %354, %355 : vector<2x32xf32>
    %357 = math.tanh %356 : vector<2x32xf32>
    %358 = arith.mulf %353, %357 : vector<2x32xf32>
    %359 = vector.extract_strided_slice %333 {offsets = [0, 0], sizes = [2, 32], strides = [1, 1]} : vector<2x128xf32> to vector<2x32xf32>
    %360 = arith.negf %359 : vector<2x32xf32>
    %361 = math.exp %360 : vector<2x32xf32>
    %cst_110 = arith.constant 1.000000e+00 : f32
    %362 = vector.broadcast %cst_110 : f32 to vector<2x32xf32>
    %363 = arith.addf %362, %361 : vector<2x32xf32>
    %364 = arith.divf %362, %363 : vector<2x32xf32>
    %365 = vector.extract_strided_slice %333 {offsets = [0, 32], sizes = [2, 32], strides = [1, 1]} : vector<2x128xf32> to vector<2x32xf32>
    %366 = arith.negf %365 : vector<2x32xf32>
    %367 = math.exp %366 : vector<2x32xf32>
    %cst_111 = arith.constant 1.000000e+00 : f32
    %368 = vector.broadcast %cst_111 : f32 to vector<2x32xf32>
    %369 = arith.addf %368, %367 : vector<2x32xf32>
    %370 = arith.divf %368, %369 : vector<2x32xf32>
    %371 = vector.extract_strided_slice %333 {offsets = [0, 64], sizes = [2, 32], strides = [1, 1]} : vector<2x128xf32> to vector<2x32xf32>
    %372 = math.tanh %371 : vector<2x32xf32>
    %373 = vector.extract_strided_slice %333 {offsets = [0, 96], sizes = [2, 32], strides = [1, 1]} : vector<2x128xf32> to vector<2x32xf32>
    %374 = arith.negf %373 : vector<2x32xf32>
    %375 = math.exp %374 : vector<2x32xf32>
    %cst_112 = arith.constant 1.000000e+00 : f32
    %376 = vector.broadcast %cst_112 : f32 to vector<2x32xf32>
    %377 = arith.addf %376, %375 : vector<2x32xf32>
    %378 = arith.divf %376, %377 : vector<2x32xf32>
    %379 = arith.mulf %370, %313 : vector<2x32xf32>
    %380 = arith.mulf %364, %372 : vector<2x32xf32>
    %381 = arith.addf %379, %380 : vector<2x32xf32>
    %382 = math.tanh %381 : vector<2x32xf32>
    %383 = arith.mulf %378, %382 : vector<2x32xf32>
    %c8_i32_113 = arith.constant 8 : i32
    %384 = arith.muli %arg0, %c8_i32_113 : i32
    %c4_i32_114 = arith.constant 4 : i32
    %385 = arith.addi %384, %c4_i32_114 : i32
    %c11_i32_115 = arith.constant 11 : i32
    %386 = arith.cmpi slt, %385, %c11_i32_115 : i32
    %387 = arith.select %386, %358, %306 : vector<2x32xf32>
    %388 = arith.select %386, %356, %307 : vector<2x32xf32>
    %c1_i32_116 = arith.constant 1 : i32
    %389 = arith.subi %c1_i32_116, %arg0 : i32
    %c8_i32_117 = arith.constant 8 : i32
    %390 = arith.muli %389, %c8_i32_117 : i32
    %c3_i32_118 = arith.constant 3 : i32
    %391 = arith.addi %390, %c3_i32_118 : i32
    %c11_i32_119 = arith.constant 11 : i32
    %392 = arith.cmpi slt, %391, %c11_i32_119 : i32
    %393 = arith.select %392, %383, %312 : vector<2x32xf32>
    %394 = arith.select %392, %381, %313 : vector<2x32xf32>
    %395 = arith.truncf %387 : vector<2x32xf32> to vector<2x32xbf16>
    %c4_120 = arith.constant 4 : index
    %c0_121 = arith.constant 0 : index
    %c0_122 = arith.constant 0 : index
    %396 = vector.load %arg5[%c4_120, %c0_121, %c0_122] : memref<8x2x32xbf16, #tpu.memory_space<vmem>>, vector<1x2x32xbf16>
    %397 = vector.shape_cast %396 : vector<1x2x32xbf16> to vector<2x32xbf16>
    %398 = vector.shape_cast %395 : vector<2x32xbf16> to vector<1x2x32xbf16>
    tpu.vector_store %arg5[%c4_120, %c0_121, %c0_122], %398 {strides = array<i32>} : memref<8x2x32xbf16, #tpu.memory_space<vmem>>, vector<1x2x32xbf16>,
    %399 = arith.truncf %393 : vector<2x32xf32> to vector<2x32xbf16>
    %c3_123 = arith.constant 3 : index
    %c0_124 = arith.constant 0 : index
    %c0_125 = arith.constant 0 : index
    %400 = vector.load %arg6[%c3_123, %c0_124, %c0_125] : memref<8x2x32xbf16, #tpu.memory_space<vmem>>, vector<1x2x32xbf16>
    %401 = vector.shape_cast %400 : vector<1x2x32xbf16> to vector<2x32xbf16>
    %402 = vector.shape_cast %399 : vector<2x32xbf16> to vector<1x2x32xbf16>
    tpu.vector_store %arg6[%c3_123, %c0_124, %c0_125], %402 {strides = array<i32>} : memref<8x2x32xbf16, #tpu.memory_space<vmem>>, vector<1x2x32xbf16>,
    %c5_126 = arith.constant 5 : index
    %c0_127 = arith.constant 0 : index
    %c0_128 = arith.constant 0 : index
    %403 = vector.load %arg1[%c5_126, %c0_127, %c0_128] : memref<8x2x128xbf16, #tpu.memory_space<vmem>>, vector<1x2x128xbf16>
    %404 = vector.shape_cast %403 : vector<1x2x128xbf16> to vector<2x128xbf16>
    %405 = arith.extf %404 : vector<2x128xbf16> to vector<2x128xf32>
    %406 = arith.truncf %387 : vector<2x32xf32> to vector<2x32xbf16>
    %cst_129 = arith.constant dense<0.000000e+00> : vector<2x128xf32>
    %407 = tpu.matmul %406, %3, %cst_129 {dimension_numbers = #tpu.dot_dimension_numbers<[1], [0], [0], [1], [0, 0, 1, 1], [], []>} : vector<2x32xbf16>, vector<32x128xbf16>, vector<2x128xf32> -> vector<2x128xf32>
    %408 = arith.addf %405, %407 : vector<2x128xf32>
    %c2_130 = arith.constant 2 : index
    %c0_131 = arith.constant 0 : index
    %c0_132 = arith.constant 0 : index
    %409 = vector.load %arg2[%c2_130, %c0_131, %c0_132] : memref<8x2x128xbf16, #tpu.memory_space<vmem>>, vector<1x2x128xbf16>
    %410 = vector.shape_cast %409 : vector<1x2x128xbf16> to vector<2x128xbf16>
    %411 = arith.extf %410 : vector<2x128xbf16> to vector<2x128xf32>
    %412 = arith.truncf %393 : vector<2x32xf32> to vector<2x32xbf16>
    %cst_133 = arith.constant dense<0.000000e+00> : vector<2x128xf32>
    %413 = tpu.matmul %412, %4, %cst_133 {dimension_numbers = #tpu.dot_dimension_numbers<[1], [0], [0], [1], [0, 0, 1, 1], [], []>} : vector<2x32xbf16>, vector<32x128xbf16>, vector<2x128xf32> -> vector<2x128xf32>
    %414 = arith.addf %411, %413 : vector<2x128xf32>
    %415 = vector.extract_strided_slice %408 {offsets = [0, 0], sizes = [2, 32], strides = [1, 1]} : vector<2x128xf32> to vector<2x32xf32>
    %416 = arith.negf %415 : vector<2x32xf32>
    %417 = math.exp %416 : vector<2x32xf32>
    %cst_134 = arith.constant 1.000000e+00 : f32
    %418 = vector.broadcast %cst_134 : f32 to vector<2x32xf32>
    %419 = arith.addf %418, %417 : vector<2x32xf32>
    %420 = arith.divf %418, %419 : vector<2x32xf32>
    %421 = vector.extract_strided_slice %408 {offsets = [0, 32], sizes = [2, 32], strides = [1, 1]} : vector<2x128xf32> to vector<2x32xf32>
    %422 = arith.negf %421 : vector<2x32xf32>
    %423 = math.exp %422 : vector<2x32xf32>
    %cst_135 = arith.constant 1.000000e+00 : f32
    %424 = vector.broadcast %cst_135 : f32 to vector<2x32xf32>
    %425 = arith.addf %424, %423 : vector<2x32xf32>
    %426 = arith.divf %424, %425 : vector<2x32xf32>
    %427 = vector.extract_strided_slice %408 {offsets = [0, 64], sizes = [2, 32], strides = [1, 1]} : vector<2x128xf32> to vector<2x32xf32>
    %428 = math.tanh %427 : vector<2x32xf32>
    %429 = vector.extract_strided_slice %408 {offsets = [0, 96], sizes = [2, 32], strides = [1, 1]} : vector<2x128xf32> to vector<2x32xf32>
    %430 = arith.negf %429 : vector<2x32xf32>
    %431 = math.exp %430 : vector<2x32xf32>
    %cst_136 = arith.constant 1.000000e+00 : f32
    %432 = vector.broadcast %cst_136 : f32 to vector<2x32xf32>
    %433 = arith.addf %432, %431 : vector<2x32xf32>
    %434 = arith.divf %432, %433 : vector<2x32xf32>
    %435 = arith.mulf %426, %388 : vector<2x32xf32>
    %436 = arith.mulf %420, %428 : vector<2x32xf32>
    %437 = arith.addf %435, %436 : vector<2x32xf32>
    %438 = math.tanh %437 : vector<2x32xf32>
    %439 = arith.mulf %434, %438 : vector<2x32xf32>
    %440 = vector.extract_strided_slice %414 {offsets = [0, 0], sizes = [2, 32], strides = [1, 1]} : vector<2x128xf32> to vector<2x32xf32>
    %441 = arith.negf %440 : vector<2x32xf32>
    %442 = math.exp %441 : vector<2x32xf32>
    %cst_137 = arith.constant 1.000000e+00 : f32
    %443 = vector.broadcast %cst_137 : f32 to vector<2x32xf32>
    %444 = arith.addf %443, %442 : vector<2x32xf32>
    %445 = arith.divf %443, %444 : vector<2x32xf32>
    %446 = vector.extract_strided_slice %414 {offsets = [0, 32], sizes = [2, 32], strides = [1, 1]} : vector<2x128xf32> to vector<2x32xf32>
    %447 = arith.negf %446 : vector<2x32xf32>
    %448 = math.exp %447 : vector<2x32xf32>
    %cst_138 = arith.constant 1.000000e+00 : f32
    %449 = vector.broadcast %cst_138 : f32 to vector<2x32xf32>
    %450 = arith.addf %449, %448 : vector<2x32xf32>
    %451 = arith.divf %449, %450 : vector<2x32xf32>
    %452 = vector.extract_strided_slice %414 {offsets = [0, 64], sizes = [2, 32], strides = [1, 1]} : vector<2x128xf32> to vector<2x32xf32>
    %453 = math.tanh %452 : vector<2x32xf32>
    %454 = vector.extract_strided_slice %414 {offsets = [0, 96], sizes = [2, 32], strides = [1, 1]} : vector<2x128xf32> to vector<2x32xf32>
    %455 = arith.negf %454 : vector<2x32xf32>
    %456 = math.exp %455 : vector<2x32xf32>
    %cst_139 = arith.constant 1.000000e+00 : f32
    %457 = vector.broadcast %cst_139 : f32 to vector<2x32xf32>
    %458 = arith.addf %457, %456 : vector<2x32xf32>
    %459 = arith.divf %457, %458 : vector<2x32xf32>
    %460 = arith.mulf %451, %394 : vector<2x32xf32>
    %461 = arith.mulf %445, %453 : vector<2x32xf32>
    %462 = arith.addf %460, %461 : vector<2x32xf32>
    %463 = math.tanh %462 : vector<2x32xf32>
    %464 = arith.mulf %459, %463 : vector<2x32xf32>
    %c8_i32_140 = arith.constant 8 : i32
    %465 = arith.muli %arg0, %c8_i32_140 : i32
    %c5_i32_141 = arith.constant 5 : i32
    %466 = arith.addi %465, %c5_i32_141 : i32
    %c11_i32_142 = arith.constant 11 : i32
    %467 = arith.cmpi slt, %466, %c11_i32_142 : i32
    %468 = arith.select %467, %439, %387 : vector<2x32xf32>
    %469 = arith.select %467, %437, %388 : vector<2x32xf32>
    %470 = arith.truncf %468 : vector<2x32xf32> to vector<2x32xbf16>
    %c5_143 = arith.constant 5 : index
    %c0_144 = arith.constant 0 : index
    %c0_145 = arith.constant 0 : index
    %471 = vector.load %arg5[%c5_143, %c0_144, %c0_145] : memref<8x2x32xbf16, #tpu.memory_space<vmem>>, vector<1x2x32xbf16>
    %472 = vector.shape_cast %471 : vector<1x2x32xbf16> to vector<2x32xbf16>
    %473 = vector.shape_cast %470 : vector<2x32xbf16> to vector<1x2x32xbf16>
    tpu.vector_store %arg5[%c5_143, %c0_144, %c0_145], %473 {strides = array<i32>} : memref<8x2x32xbf16, #tpu.memory_space<vmem>>, vector<1x2x32xbf16>,
    %474 = arith.truncf %464 : vector<2x32xf32> to vector<2x32xbf16>
    %c2_146 = arith.constant 2 : index
    %c0_147 = arith.constant 0 : index
    %c0_148 = arith.constant 0 : index
    %475 = vector.load %arg6[%c2_146, %c0_147, %c0_148] : memref<8x2x32xbf16, #tpu.memory_space<vmem>>, vector<1x2x32xbf16>
    %476 = vector.shape_cast %475 : vector<1x2x32xbf16> to vector<2x32xbf16>
    %477 = vector.shape_cast %474 : vector<2x32xbf16> to vector<1x2x32xbf16>
    tpu.vector_store %arg6[%c2_146, %c0_147, %c0_148], %477 {strides = array<i32>} : memref<8x2x32xbf16, #tpu.memory_space<vmem>>, vector<1x2x32xbf16>,
    %c6_149 = arith.constant 6 : index
    %c0_150 = arith.constant 0 : index
    %c0_151 = arith.constant 0 : index
    %478 = vector.load %arg1[%c6_149, %c0_150, %c0_151] : memref<8x2x128xbf16, #tpu.memory_space<vmem>>, vector<1x2x128xbf16>
    %479 = vector.shape_cast %478 : vector<1x2x128xbf16> to vector<2x128xbf16>
    %480 = arith.extf %479 : vector<2x128xbf16> to vector<2x128xf32>
    %481 = arith.truncf %468 : vector<2x32xf32> to vector<2x32xbf16>
    %cst_152 = arith.constant dense<0.000000e+00> : vector<2x128xf32>
    %482 = tpu.matmul %481, %3, %cst_152 {dimension_numbers = #tpu.dot_dimension_numbers<[1], [0], [0], [1], [0, 0, 1, 1], [], []>} : vector<2x32xbf16>, vector<32x128xbf16>, vector<2x128xf32> -> vector<2x128xf32>
    %483 = arith.addf %480, %482 : vector<2x128xf32>
    %c1_153 = arith.constant 1 : index
    %c0_154 = arith.constant 0 : index
    %c0_155 = arith.constant 0 : index
    %484 = vector.load %arg2[%c1_153, %c0_154, %c0_155] : memref<8x2x128xbf16, #tpu.memory_space<vmem>>, vector<1x2x128xbf16>
    %485 = vector.shape_cast %484 : vector<1x2x128xbf16> to vector<2x128xbf16>
    %486 = arith.extf %485 : vector<2x128xbf16> to vector<2x128xf32>
    %487 = arith.truncf %464 : vector<2x32xf32> to vector<2x32xbf16>
    %cst_156 = arith.constant dense<0.000000e+00> : vector<2x128xf32>
    %488 = tpu.matmul %487, %4, %cst_156 {dimension_numbers = #tpu.dot_dimension_numbers<[1], [0], [0], [1], [0, 0, 1, 1], [], []>} : vector<2x32xbf16>, vector<32x128xbf16>, vector<2x128xf32> -> vector<2x128xf32>
    %489 = arith.addf %486, %488 : vector<2x128xf32>
    %490 = vector.extract_strided_slice %483 {offsets = [0, 0], sizes = [2, 32], strides = [1, 1]} : vector<2x128xf32> to vector<2x32xf32>
    %491 = arith.negf %490 : vector<2x32xf32>
    %492 = math.exp %491 : vector<2x32xf32>
    %cst_157 = arith.constant 1.000000e+00 : f32
    %493 = vector.broadcast %cst_157 : f32 to vector<2x32xf32>
    %494 = arith.addf %493, %492 : vector<2x32xf32>
    %495 = arith.divf %493, %494 : vector<2x32xf32>
    %496 = vector.extract_strided_slice %483 {offsets = [0, 32], sizes = [2, 32], strides = [1, 1]} : vector<2x128xf32> to vector<2x32xf32>
    %497 = arith.negf %496 : vector<2x32xf32>
    %498 = math.exp %497 : vector<2x32xf32>
    %cst_158 = arith.constant 1.000000e+00 : f32
    %499 = vector.broadcast %cst_158 : f32 to vector<2x32xf32>
    %500 = arith.addf %499, %498 : vector<2x32xf32>
    %501 = arith.divf %499, %500 : vector<2x32xf32>
    %502 = vector.extract_strided_slice %483 {offsets = [0, 64], sizes = [2, 32], strides = [1, 1]} : vector<2x128xf32> to vector<2x32xf32>
    %503 = math.tanh %502 : vector<2x32xf32>
    %504 = vector.extract_strided_slice %483 {offsets = [0, 96], sizes = [2, 32], strides = [1, 1]} : vector<2x128xf32> to vector<2x32xf32>
    %505 = arith.negf %504 : vector<2x32xf32>
    %506 = math.exp %505 : vector<2x32xf32>
    %cst_159 = arith.constant 1.000000e+00 : f32
    %507 = vector.broadcast %cst_159 : f32 to vector<2x32xf32>
    %508 = arith.addf %507, %506 : vector<2x32xf32>
    %509 = arith.divf %507, %508 : vector<2x32xf32>
    %510 = arith.mulf %501, %469 : vector<2x32xf32>
    %511 = arith.mulf %495, %503 : vector<2x32xf32>
    %512 = arith.addf %510, %511 : vector<2x32xf32>
    %513 = math.tanh %512 : vector<2x32xf32>
    %514 = arith.mulf %509, %513 : vector<2x32xf32>
    %515 = vector.extract_strided_slice %489 {offsets = [0, 0], sizes = [2, 32], strides = [1, 1]} : vector<2x128xf32> to vector<2x32xf32>
    %516 = arith.negf %515 : vector<2x32xf32>
    %517 = math.exp %516 : vector<2x32xf32>
    %cst_160 = arith.constant 1.000000e+00 : f32
    %518 = vector.broadcast %cst_160 : f32 to vector<2x32xf32>
    %519 = arith.addf %518, %517 : vector<2x32xf32>
    %520 = arith.divf %518, %519 : vector<2x32xf32>
    %521 = vector.extract_strided_slice %489 {offsets = [0, 32], sizes = [2, 32], strides = [1, 1]} : vector<2x128xf32> to vector<2x32xf32>
    %522 = arith.negf %521 : vector<2x32xf32>
    %523 = math.exp %522 : vector<2x32xf32>
    %cst_161 = arith.constant 1.000000e+00 : f32
    %524 = vector.broadcast %cst_161 : f32 to vector<2x32xf32>
    %525 = arith.addf %524, %523 : vector<2x32xf32>
    %526 = arith.divf %524, %525 : vector<2x32xf32>
    %527 = vector.extract_strided_slice %489 {offsets = [0, 64], sizes = [2, 32], strides = [1, 1]} : vector<2x128xf32> to vector<2x32xf32>
    %528 = math.tanh %527 : vector<2x32xf32>
    %529 = vector.extract_strided_slice %489 {offsets = [0, 96], sizes = [2, 32], strides = [1, 1]} : vector<2x128xf32> to vector<2x32xf32>
    %530 = arith.negf %529 : vector<2x32xf32>
    %531 = math.exp %530 : vector<2x32xf32>
    %cst_162 = arith.constant 1.000000e+00 : f32
    %532 = vector.broadcast %cst_162 : f32 to vector<2x32xf32>
    %533 = arith.addf %532, %531 : vector<2x32xf32>
    %534 = arith.divf %532, %533 : vector<2x32xf32>
    %535 = arith.mulf %526, %462 : vector<2x32xf32>
    %536 = arith.mulf %520, %528 : vector<2x32xf32>
    %537 = arith.addf %535, %536 : vector<2x32xf32>
    %538 = math.tanh %537 : vector<2x32xf32>
    %539 = arith.mulf %534, %538 : vector<2x32xf32>
    %c8_i32_163 = arith.constant 8 : i32
    %540 = arith.muli %arg0, %c8_i32_163 : i32
    %c6_i32_164 = arith.constant 6 : i32
    %541 = arith.addi %540, %c6_i32_164 : i32
    %c11_i32_165 = arith.constant 11 : i32
    %542 = arith.cmpi slt, %541, %c11_i32_165 : i32
    %543 = arith.select %542, %514, %468 : vector<2x32xf32>
    %544 = arith.select %542, %512, %469 : vector<2x32xf32>
    %545 = arith.truncf %543 : vector<2x32xf32> to vector<2x32xbf16>
    %c6_166 = arith.constant 6 : index
    %c0_167 = arith.constant 0 : index
    %c0_168 = arith.constant 0 : index
    %546 = vector.load %arg5[%c6_166, %c0_167, %c0_168] : memref<8x2x32xbf16, #tpu.memory_space<vmem>>, vector<1x2x32xbf16>
    %547 = vector.shape_cast %546 : vector<1x2x32xbf16> to vector<2x32xbf16>
    %548 = vector.shape_cast %545 : vector<2x32xbf16> to vector<1x2x32xbf16>
    tpu.vector_store %arg5[%c6_166, %c0_167, %c0_168], %548 {strides = array<i32>} : memref<8x2x32xbf16, #tpu.memory_space<vmem>>, vector<1x2x32xbf16>,
    %549 = arith.truncf %539 : vector<2x32xf32> to vector<2x32xbf16>
    %c1_169 = arith.constant 1 : index
    %c0_170 = arith.constant 0 : index
    %c0_171 = arith.constant 0 : index
    %550 = vector.load %arg6[%c1_169, %c0_170, %c0_171] : memref<8x2x32xbf16, #tpu.memory_space<vmem>>, vector<1x2x32xbf16>
    %551 = vector.shape_cast %550 : vector<1x2x32xbf16> to vector<2x32xbf16>
    %552 = vector.shape_cast %549 : vector<2x32xbf16> to vector<1x2x32xbf16>
    tpu.vector_store %arg6[%c1_169, %c0_170, %c0_171], %552 {strides = array<i32>} : memref<8x2x32xbf16, #tpu.memory_space<vmem>>, vector<1x2x32xbf16>,
    %c7_172 = arith.constant 7 : index
    %c0_173 = arith.constant 0 : index
    %c0_174 = arith.constant 0 : index
    %553 = vector.load %arg1[%c7_172, %c0_173, %c0_174] : memref<8x2x128xbf16, #tpu.memory_space<vmem>>, vector<1x2x128xbf16>
    %554 = vector.shape_cast %553 : vector<1x2x128xbf16> to vector<2x128xbf16>
    %555 = arith.extf %554 : vector<2x128xbf16> to vector<2x128xf32>
    %556 = arith.truncf %543 : vector<2x32xf32> to vector<2x32xbf16>
    %cst_175 = arith.constant dense<0.000000e+00> : vector<2x128xf32>
    %557 = tpu.matmul %556, %3, %cst_175 {dimension_numbers = #tpu.dot_dimension_numbers<[1], [0], [0], [1], [0, 0, 1, 1], [], []>} : vector<2x32xbf16>, vector<32x128xbf16>, vector<2x128xf32> -> vector<2x128xf32>
    %558 = arith.addf %555, %557 : vector<2x128xf32>
    %c0_176 = arith.constant 0 : index
    %c0_177 = arith.constant 0 : index
    %c0_178 = arith.constant 0 : index
    %559 = vector.load %arg2[%c0_176, %c0_177, %c0_178] : memref<8x2x128xbf16, #tpu.memory_space<vmem>>, vector<1x2x128xbf16>
    %560 = vector.shape_cast %559 : vector<1x2x128xbf16> to vector<2x128xbf16>
    %561 = arith.extf %560 : vector<2x128xbf16> to vector<2x128xf32>
    %562 = arith.truncf %539 : vector<2x32xf32> to vector<2x32xbf16>
    %cst_179 = arith.constant dense<0.000000e+00> : vector<2x128xf32>
    %563 = tpu.matmul %562, %4, %cst_179 {dimension_numbers = #tpu.dot_dimension_numbers<[1], [0], [0], [1], [0, 0, 1, 1], [], []>} : vector<2x32xbf16>, vector<32x128xbf16>, vector<2x128xf32> -> vector<2x128xf32>
    %564 = arith.addf %561, %563 : vector<2x128xf32>
    %565 = vector.extract_strided_slice %558 {offsets = [0, 0], sizes = [2, 32], strides = [1, 1]} : vector<2x128xf32> to vector<2x32xf32>
    %566 = arith.negf %565 : vector<2x32xf32>
    %567 = math.exp %566 : vector<2x32xf32>
    %cst_180 = arith.constant 1.000000e+00 : f32
    %568 = vector.broadcast %cst_180 : f32 to vector<2x32xf32>
    %569 = arith.addf %568, %567 : vector<2x32xf32>
    %570 = arith.divf %568, %569 : vector<2x32xf32>
    %571 = vector.extract_strided_slice %558 {offsets = [0, 32], sizes = [2, 32], strides = [1, 1]} : vector<2x128xf32> to vector<2x32xf32>
    %572 = arith.negf %571 : vector<2x32xf32>
    %573 = math.exp %572 : vector<2x32xf32>
    %cst_181 = arith.constant 1.000000e+00 : f32
    %574 = vector.broadcast %cst_181 : f32 to vector<2x32xf32>
    %575 = arith.addf %574, %573 : vector<2x32xf32>
    %576 = arith.divf %574, %575 : vector<2x32xf32>
    %577 = vector.extract_strided_slice %558 {offsets = [0, 64], sizes = [2, 32], strides = [1, 1]} : vector<2x128xf32> to vector<2x32xf32>
    %578 = math.tanh %577 : vector<2x32xf32>
    %579 = vector.extract_strided_slice %558 {offsets = [0, 96], sizes = [2, 32], strides = [1, 1]} : vector<2x128xf32> to vector<2x32xf32>
    %580 = arith.negf %579 : vector<2x32xf32>
    %581 = math.exp %580 : vector<2x32xf32>
    %cst_182 = arith.constant 1.000000e+00 : f32
    %582 = vector.broadcast %cst_182 : f32 to vector<2x32xf32>
    %583 = arith.addf %582, %581 : vector<2x32xf32>
    %584 = arith.divf %582, %583 : vector<2x32xf32>
    %585 = arith.mulf %576, %544 : vector<2x32xf32>
    %586 = arith.mulf %570, %578 : vector<2x32xf32>
    %587 = arith.addf %585, %586 : vector<2x32xf32>
    %588 = math.tanh %587 : vector<2x32xf32>
    %589 = arith.mulf %584, %588 : vector<2x32xf32>
    %590 = vector.extract_strided_slice %564 {offsets = [0, 0], sizes = [2, 32], strides = [1, 1]} : vector<2x128xf32> to vector<2x32xf32>
    %591 = arith.negf %590 : vector<2x32xf32>
    %592 = math.exp %591 : vector<2x32xf32>
    %cst_183 = arith.constant 1.000000e+00 : f32
    %593 = vector.broadcast %cst_183 : f32 to vector<2x32xf32>
    %594 = arith.addf %593, %592 : vector<2x32xf32>
    %595 = arith.divf %593, %594 : vector<2x32xf32>
    %596 = vector.extract_strided_slice %564 {offsets = [0, 32], sizes = [2, 32], strides = [1, 1]} : vector<2x128xf32> to vector<2x32xf32>
    %597 = arith.negf %596 : vector<2x32xf32>
    %598 = math.exp %597 : vector<2x32xf32>
    %cst_184 = arith.constant 1.000000e+00 : f32
    %599 = vector.broadcast %cst_184 : f32 to vector<2x32xf32>
    %600 = arith.addf %599, %598 : vector<2x32xf32>
    %601 = arith.divf %599, %600 : vector<2x32xf32>
    %602 = vector.extract_strided_slice %564 {offsets = [0, 64], sizes = [2, 32], strides = [1, 1]} : vector<2x128xf32> to vector<2x32xf32>
    %603 = math.tanh %602 : vector<2x32xf32>
    %604 = vector.extract_strided_slice %564 {offsets = [0, 96], sizes = [2, 32], strides = [1, 1]} : vector<2x128xf32> to vector<2x32xf32>
    %605 = arith.negf %604 : vector<2x32xf32>
    %606 = math.exp %605 : vector<2x32xf32>
    %cst_185 = arith.constant 1.000000e+00 : f32
    %607 = vector.broadcast %cst_185 : f32 to vector<2x32xf32>
    %608 = arith.addf %607, %606 : vector<2x32xf32>
    %609 = arith.divf %607, %608 : vector<2x32xf32>
    %610 = arith.mulf %601, %537 : vector<2x32xf32>
    %611 = arith.mulf %595, %603 : vector<2x32xf32>
    %612 = arith.addf %610, %611 : vector<2x32xf32>
    %613 = math.tanh %612 : vector<2x32xf32>
    %614 = arith.mulf %609, %613 : vector<2x32xf32>
    %c8_i32_186 = arith.constant 8 : i32
    %615 = arith.muli %arg0, %c8_i32_186 : i32
    %c7_i32_187 = arith.constant 7 : i32
    %616 = arith.addi %615, %c7_i32_187 : i32
    %c11_i32_188 = arith.constant 11 : i32
    %617 = arith.cmpi slt, %616, %c11_i32_188 : i32
    %618 = arith.select %617, %589, %543 : vector<2x32xf32>
    %619 = arith.select %617, %587, %544 : vector<2x32xf32>
    %620 = arith.truncf %618 : vector<2x32xf32> to vector<2x32xbf16>
    %c7_189 = arith.constant 7 : index
    %c0_190 = arith.constant 0 : index
    %c0_191 = arith.constant 0 : index
    %621 = vector.load %arg5[%c7_189, %c0_190, %c0_191] : memref<8x2x32xbf16, #tpu.memory_space<vmem>>, vector<1x2x32xbf16>
    %622 = vector.shape_cast %621 : vector<1x2x32xbf16> to vector<2x32xbf16>
    %623 = vector.shape_cast %620 : vector<2x32xbf16> to vector<1x2x32xbf16>
    tpu.vector_store %arg5[%c7_189, %c0_190, %c0_191], %623 {strides = array<i32>} : memref<8x2x32xbf16, #tpu.memory_space<vmem>>, vector<1x2x32xbf16>,
    %624 = arith.truncf %614 : vector<2x32xf32> to vector<2x32xbf16>
    %c0_192 = arith.constant 0 : index
    %c0_193 = arith.constant 0 : index
    %c0_194 = arith.constant 0 : index
    %625 = vector.load %arg6[%c0_192, %c0_193, %c0_194] : memref<8x2x32xbf16, #tpu.memory_space<vmem>>, vector<1x2x32xbf16>
    %626 = vector.shape_cast %625 : vector<1x2x32xbf16> to vector<2x32xbf16>
    %627 = vector.shape_cast %624 : vector<2x32xbf16> to vector<1x2x32xbf16>
    tpu.vector_store %arg6[%c0_192, %c0_193, %c0_194], %627 {strides = array<i32>} : memref<8x2x32xbf16, #tpu.memory_space<vmem>>, vector<1x2x32xbf16>,
    %c0_195 = arith.constant 0 : index
    %c0_196 = arith.constant 0 : index
    %c0_197 = arith.constant 0 : index
    %628 = vector.load %arg9[%c0_195, %c0_196, %c0_197] : memref<2x2x32xf32, #tpu.memory_space<vmem>>, vector<1x2x32xf32>
    %629 = vector.shape_cast %628 : vector<1x2x32xf32> to vector<2x32xf32>
    %630 = vector.shape_cast %618 : vector<2x32xf32> to vector<1x2x32xf32>
    tpu.vector_store %arg9[%c0_195, %c0_196, %c0_197], %630 {strides = array<i32>} : memref<2x2x32xf32, #tpu.memory_space<vmem>>, vector<1x2x32xf32>,
    %c0_198 = arith.constant 0 : index
    %c0_199 = arith.constant 0 : index
    %c0_200 = arith.constant 0 : index
    %631 = vector.load %arg10[%c0_198, %c0_199, %c0_200] : memref<2x2x32xf32, #tpu.memory_space<vmem>>, vector<1x2x32xf32>
    %632 = vector.shape_cast %631 : vector<1x2x32xf32> to vector<2x32xf32>
    %633 = vector.shape_cast %619 : vector<2x32xf32> to vector<1x2x32xf32>
    tpu.vector_store %arg10[%c0_198, %c0_199, %c0_200], %633 {strides = array<i32>} : memref<2x2x32xf32, #tpu.memory_space<vmem>>, vector<1x2x32xf32>,
    %c1_201 = arith.constant 1 : index
    %c0_202 = arith.constant 0 : index
    %c0_203 = arith.constant 0 : index
    %634 = vector.load %arg9[%c1_201, %c0_202, %c0_203] : memref<2x2x32xf32, #tpu.memory_space<vmem>>, vector<1x2x32xf32>
    %635 = vector.shape_cast %634 : vector<1x2x32xf32> to vector<2x32xf32>
    %636 = vector.shape_cast %614 : vector<2x32xf32> to vector<1x2x32xf32>
    tpu.vector_store %arg9[%c1_201, %c0_202, %c0_203], %636 {strides = array<i32>} : memref<2x2x32xf32, #tpu.memory_space<vmem>>, vector<1x2x32xf32>,
    %c1_204 = arith.constant 1 : index
    %c0_205 = arith.constant 0 : index
    %c0_206 = arith.constant 0 : index
    %637 = vector.load %arg10[%c1_204, %c0_205, %c0_206] : memref<2x2x32xf32, #tpu.memory_space<vmem>>, vector<1x2x32xf32>
    %638 = vector.shape_cast %637 : vector<1x2x32xf32> to vector<2x32xf32>
    %639 = vector.shape_cast %612 : vector<2x32xf32> to vector<1x2x32xf32>
    tpu.vector_store %arg10[%c1_204, %c0_205, %c0_206], %639 {strides = array<i32>} : memref<2x2x32xf32, #tpu.memory_space<vmem>>, vector<1x2x32xf32>,
    %c0_207 = arith.constant 0 : index
    %c0_208 = arith.constant 0 : index
    %c0_209 = arith.constant 0 : index
    %640 = vector.load %arg7[%c0_207, %c0_208, %c0_209] : memref<2x2x32xf32, #tpu.memory_space<vmem>>, vector<1x2x32xf32>
    %641 = vector.shape_cast %640 : vector<1x2x32xf32> to vector<2x32xf32>
    %642 = vector.shape_cast %618 : vector<2x32xf32> to vector<1x2x32xf32>
    tpu.vector_store %arg7[%c0_207, %c0_208, %c0_209], %642 {strides = array<i32>} : memref<2x2x32xf32, #tpu.memory_space<vmem>>, vector<1x2x32xf32>,
    %c1_210 = arith.constant 1 : index
    %c0_211 = arith.constant 0 : index
    %c0_212 = arith.constant 0 : index
    %643 = vector.load %arg7[%c1_210, %c0_211, %c0_212] : memref<2x2x32xf32, #tpu.memory_space<vmem>>, vector<1x2x32xf32>
    %644 = vector.shape_cast %643 : vector<1x2x32xf32> to vector<2x32xf32>
    %645 = vector.shape_cast %614 : vector<2x32xf32> to vector<1x2x32xf32>
    tpu.vector_store %arg7[%c1_210, %c0_211, %c0_212], %645 {strides = array<i32>} : memref<2x2x32xf32, #tpu.memory_space<vmem>>, vector<1x2x32xf32>,
    %c0_213 = arith.constant 0 : index
    %c0_214 = arith.constant 0 : index
    %c0_215 = arith.constant 0 : index
    %646 = vector.load %arg8[%c0_213, %c0_214, %c0_215] : memref<2x2x32xf32, #tpu.memory_space<vmem>>, vector<1x2x32xf32>
    %647 = vector.shape_cast %646 : vector<1x2x32xf32> to vector<2x32xf32>
    %648 = vector.shape_cast %619 : vector<2x32xf32> to vector<1x2x32xf32>
    tpu.vector_store %arg8[%c0_213, %c0_214, %c0_215], %648 {strides = array<i32>} : memref<2x2x32xf32, #tpu.memory_space<vmem>>, vector<1x2x32xf32>,
    %c1_216 = arith.constant 1 : index
    %c0_217 = arith.constant 0 : index
    %c0_218 = arith.constant 0 : index
    %649 = vector.load %arg8[%c1_216, %c0_217, %c0_218] : memref<2x2x32xf32, #tpu.memory_space<vmem>>, vector<1x2x32xf32>
    %650 = vector.shape_cast %649 : vector<1x2x32xf32> to vector<2x32xf32>
    %651 = vector.shape_cast %612 : vector<2x32xf32> to vector<1x2x32xf32>
    tpu.vector_store %arg8[%c1_216, %c0_217, %c0_218], %651 {strides = array<i32>} : memref<2x2x32xf32, #tpu.memory_space<vmem>>, vector<1x2x32xf32>,
    return
  }
  func.func @transform_0(%arg0: i32) -> (i32, i32, i32) {
    %c0_i32 = arith.constant 0 : i32
    %c0_i32_0 = arith.constant 0 : i32
    %c0_i32_1 = arith.constant 0 : i32
    return %arg0, %c0_i32, %c0_i32_0 : i32, i32, i32
  }
  func.func @transform_1(%arg0: i32) -> (i32, i32, i32) {
    %c1_i32 = arith.constant 1 : i32
    %0 = arith.subi %c1_i32, %arg0 : i32
    %c0_i32 = arith.constant 0 : i32
    %c1_i32_0 = arith.constant 1 : i32
    %c0_i32_1 = arith.constant 0 : i32
    return %0, %c0_i32, %c1_i32_0 : i32, i32, i32
  }
  func.func @transform_2(%arg0: i32) -> (i32, i32) {
    %c0_i32 = arith.constant 0 : i32
    %c0_i32_0 = arith.constant 0 : i32
    %c0_i32_1 = arith.constant 0 : i32
    return %c0_i32, %c0_i32_0 : i32, i32
  }
  func.func @transform_3(%arg0: i32) -> (i32, i32) {
    %c0_i32 = arith.constant 0 : i32
    %c0_i32_0 = arith.constant 0 : i32
    %c0_i32_1 = arith.constant 0 : i32
    return %c0_i32, %c0_i32_0 : i32, i32
  }
  func.func @transform_4(%arg0: i32) -> (i32, i32, i32) {
    %c0_i32 = arith.constant 0 : i32
    %c0_i32_0 = arith.constant 0 : i32
    %c0_i32_1 = arith.constant 0 : i32
    return %arg0, %c0_i32, %c0_i32_0 : i32, i32, i32
  }
  func.func @transform_5(%arg0: i32) -> (i32, i32, i32) {
    %c1_i32 = arith.constant 1 : i32
    %0 = arith.subi %c1_i32, %arg0 : i32
    %c0_i32 = arith.constant 0 : i32
    %c0_i32_0 = arith.constant 0 : i32
    %c0_i32_1 = arith.constant 0 : i32
    return %0, %c0_i32, %c0_i32_0 : i32, i32, i32
  }
  func.func @transform_6(%arg0: i32) -> (i32, i32, i32) {
    %c0_i32 = arith.constant 0 : i32
    %c0_i32_0 = arith.constant 0 : i32
    %c0_i32_1 = arith.constant 0 : i32
    %c0_i32_2 = arith.constant 0 : i32
    return %c0_i32, %c0_i32_0, %c0_i32_1 : i32, i32, i32
  }
  func.func @transform_7(%arg0: i32) -> (i32, i32, i32) {
    %c0_i32 = arith.constant 0 : i32
    %c0_i32_0 = arith.constant 0 : i32
    %c0_i32_1 = arith.constant 0 : i32
    %c0_i32_2 = arith.constant 0 : i32
    return %c0_i32, %c0_i32_0, %c0_i32_1 : i32, i32, i32
  }
}

module attributes {stable_mosaic.version = 11 : i64} {
  func.func @_dual_proj_kernel(%arg0: i32, %arg1: memref<32x32xbf16, #tpu.memory_space<vmem>>, %arg2: memref<32x32xbf16, #tpu.memory_space<vmem>>, %arg3: memref<32x256xbf16, #tpu.memory_space<vmem>>, %arg4: memref<32x256xbf16, #tpu.memory_space<vmem>>, %arg5: memref<1x256xf32, #tpu.memory_space<vmem>>, %arg6: memref<32x256xbf16, #tpu.memory_space<vmem>>) attributes {dimension_semantics = [#tpu.dimension_semantics<parallel>], iteration_bounds = array<i64: 1>, scalar_prefetch = 0 : i64, scratch_operands = 0 : i64, tpu.core_type = #tpu.core_type<tc>, window_params = [{transform_indices = @transform_0, window_bounds = array<i64: 32, 32>}, {transform_indices = @transform_1, window_bounds = array<i64: 32, 32>}, {pipeline_mode = #tpu.pipeline_mode<synchronous>, transform_indices = @transform_2, window_bounds = array<i64: 32, 256>}, {pipeline_mode = #tpu.pipeline_mode<synchronous>, transform_indices = @transform_3, window_bounds = array<i64: 32, 256>}, {pipeline_mode = #tpu.pipeline_mode<synchronous>, transform_indices = @transform_4, window_bounds = array<i64: 1, 256>}, {transform_indices = @transform_5, window_bounds = array<i64: 32, 256>}]} {
    %c0 = arith.constant 0 : index
    %c0_0 = arith.constant 0 : index
    %0 = vector.load %arg3[%c0, %c0_0] : memref<32x256xbf16, #tpu.memory_space<vmem>>, vector<32x256xbf16>
    %c0_1 = arith.constant 0 : index
    %c0_2 = arith.constant 0 : index
    %1 = vector.load %arg4[%c0_1, %c0_2] : memref<32x256xbf16, #tpu.memory_space<vmem>>, vector<32x256xbf16>
    %c0_3 = arith.constant 0 : index
    %c0_4 = arith.constant 0 : index
    %2 = vector.load %arg1[%c0_3, %c0_4] : memref<32x32xbf16, #tpu.memory_space<vmem>>, vector<32x32xbf16>
    %cst = arith.constant dense<0.000000e+00> : vector<32x256xf32>
    %3 = tpu.matmul %2, %0, %cst {dimension_numbers = #tpu.dot_dimension_numbers<[1], [0], [0], [1], [0, 0, 1, 1], [], []>} : vector<32x32xbf16>, vector<32x256xbf16>, vector<32x256xf32> -> vector<32x256xf32>
    %c0_5 = arith.constant 0 : index
    %c0_6 = arith.constant 0 : index
    %4 = vector.load %arg2[%c0_5, %c0_6] : memref<32x32xbf16, #tpu.memory_space<vmem>>, vector<32x32xbf16>
    %cst_7 = arith.constant dense<0.000000e+00> : vector<32x256xf32>
    %5 = tpu.matmul %4, %1, %cst_7 {dimension_numbers = #tpu.dot_dimension_numbers<[1], [0], [0], [1], [0, 0, 1, 1], [], []>} : vector<32x32xbf16>, vector<32x256xbf16>, vector<32x256xf32> -> vector<32x256xf32>
    %6 = arith.addf %3, %5 : vector<32x256xf32>
    %c0_8 = arith.constant 0 : index
    %c0_9 = arith.constant 0 : index
    %7 = vector.load %arg5[%c0_8, %c0_9] : memref<1x256xf32, #tpu.memory_space<vmem>>, vector<1x256xf32>
    %8 = vector.broadcast %7 : vector<1x256xf32> to vector<32x256xf32>
    %9 = arith.addf %6, %8 : vector<32x256xf32>
    %10 = arith.truncf %9 : vector<32x256xf32> to vector<32x256xbf16>
    %c0_10 = arith.constant 0 : index
    %c0_11 = arith.constant 0 : index
    %11 = vector.load %arg6[%c0_10, %c0_11] : memref<32x256xbf16, #tpu.memory_space<vmem>>, vector<32x256xbf16>
    tpu.vector_store %arg6[%c0_10, %c0_11], %10 {strides = array<i32>} : memref<32x256xbf16, #tpu.memory_space<vmem>>, vector<32x256xbf16>,
    return
  }
  func.func @transform_0(%arg0: i32) -> (i32, i32) {
    %c0_i32 = arith.constant 0 : i32
    %c0_i32_0 = arith.constant 0 : i32
    return %arg0, %c0_i32 : i32, i32
  }
  func.func @transform_1(%arg0: i32) -> (i32, i32) {
    %c0_i32 = arith.constant 0 : i32
    %c0_i32_0 = arith.constant 0 : i32
    return %arg0, %c0_i32 : i32, i32
  }
  func.func @transform_2(%arg0: i32) -> (i32, i32) {
    %c0_i32 = arith.constant 0 : i32
    %c0_i32_0 = arith.constant 0 : i32
    %c0_i32_1 = arith.constant 0 : i32
    return %c0_i32, %c0_i32_0 : i32, i32
  }
  func.func @transform_3(%arg0: i32) -> (i32, i32) {
    %c0_i32 = arith.constant 0 : i32
    %c0_i32_0 = arith.constant 0 : i32
    %c0_i32_1 = arith.constant 0 : i32
    return %c0_i32, %c0_i32_0 : i32, i32
  }
  func.func @transform_4(%arg0: i32) -> (i32, i32) {
    %c0_i32 = arith.constant 0 : i32
    %c0_i32_0 = arith.constant 0 : i32
    %c0_i32_1 = arith.constant 0 : i32
    return %c0_i32, %c0_i32_0 : i32, i32
  }
  func.func @transform_5(%arg0: i32) -> (i32, i32) {
    %c0_i32 = arith.constant 0 : i32
    %c0_i32_0 = arith.constant 0 : i32
    return %arg0, %c0_i32 : i32, i32
  }
}

module attributes {stable_mosaic.version = 11 : i64} {
  func.func @_dual_proj_kernel(%arg0: i32, %arg1: memref<32x32xbf16, #tpu.memory_space<vmem>>, %arg2: memref<32x32xbf16, #tpu.memory_space<vmem>>, %arg3: memref<32x32xbf16, #tpu.memory_space<vmem>>, %arg4: memref<32x32xbf16, #tpu.memory_space<vmem>>, %arg5: memref<1x32xf32, #tpu.memory_space<vmem>>, %arg6: memref<32x32xf32, #tpu.memory_space<vmem>>) attributes {dimension_semantics = [#tpu.dimension_semantics<parallel>], iteration_bounds = array<i64: 1>, scalar_prefetch = 0 : i64, scratch_operands = 0 : i64, tpu.core_type = #tpu.core_type<tc>, window_params = [{transform_indices = @transform_0, window_bounds = array<i64: 32, 32>}, {transform_indices = @transform_1, window_bounds = array<i64: 32, 32>}, {pipeline_mode = #tpu.pipeline_mode<synchronous>, transform_indices = @transform_2, window_bounds = array<i64: 32, 32>}, {pipeline_mode = #tpu.pipeline_mode<synchronous>, transform_indices = @transform_3, window_bounds = array<i64: 32, 32>}, {pipeline_mode = #tpu.pipeline_mode<synchronous>, transform_indices = @transform_4, window_bounds = array<i64: 1, 32>}, {transform_indices = @transform_5, window_bounds = array<i64: 32, 32>}]} {
    %c0 = arith.constant 0 : index
    %c0_0 = arith.constant 0 : index
    %0 = vector.load %arg3[%c0, %c0_0] : memref<32x32xbf16, #tpu.memory_space<vmem>>, vector<32x32xbf16>
    %c0_1 = arith.constant 0 : index
    %c0_2 = arith.constant 0 : index
    %1 = vector.load %arg4[%c0_1, %c0_2] : memref<32x32xbf16, #tpu.memory_space<vmem>>, vector<32x32xbf16>
    %c0_3 = arith.constant 0 : index
    %c0_4 = arith.constant 0 : index
    %2 = vector.load %arg1[%c0_3, %c0_4] : memref<32x32xbf16, #tpu.memory_space<vmem>>, vector<32x32xbf16>
    %cst = arith.constant dense<0.000000e+00> : vector<32x32xf32>
    %3 = tpu.matmul %2, %0, %cst {dimension_numbers = #tpu.dot_dimension_numbers<[1], [0], [0], [1], [0, 0, 1, 1], [], []>} : vector<32x32xbf16>, vector<32x32xbf16>, vector<32x32xf32> -> vector<32x32xf32>
    %c0_5 = arith.constant 0 : index
    %c0_6 = arith.constant 0 : index
    %4 = vector.load %arg2[%c0_5, %c0_6] : memref<32x32xbf16, #tpu.memory_space<vmem>>, vector<32x32xbf16>
    %cst_7 = arith.constant dense<0.000000e+00> : vector<32x32xf32>
    %5 = tpu.matmul %4, %1, %cst_7 {dimension_numbers = #tpu.dot_dimension_numbers<[1], [0], [0], [1], [0, 0, 1, 1], [], []>} : vector<32x32xbf16>, vector<32x32xbf16>, vector<32x32xf32> -> vector<32x32xf32>
    %6 = arith.addf %3, %5 : vector<32x32xf32>
    %c0_8 = arith.constant 0 : index
    %c0_9 = arith.constant 0 : index
    %7 = vector.load %arg5[%c0_8, %c0_9] : memref<1x32xf32, #tpu.memory_space<vmem>>, vector<1x32xf32>
    %8 = vector.broadcast %7 : vector<1x32xf32> to vector<32x32xf32>
    %9 = arith.addf %6, %8 : vector<32x32xf32>
    %c0_10 = arith.constant 0 : index
    %c0_11 = arith.constant 0 : index
    %10 = vector.load %arg6[%c0_10, %c0_11] : memref<32x32xf32, #tpu.memory_space<vmem>>, vector<32x32xf32>
    tpu.vector_store %arg6[%c0_10, %c0_11], %9 {strides = array<i32>} : memref<32x32xf32, #tpu.memory_space<vmem>>, vector<32x32xf32>,
    return
  }
  func.func @transform_0(%arg0: i32) -> (i32, i32) {
    %c0_i32 = arith.constant 0 : i32
    %c0_i32_0 = arith.constant 0 : i32
    return %arg0, %c0_i32 : i32, i32
  }
  func.func @transform_1(%arg0: i32) -> (i32, i32) {
    %c0_i32 = arith.constant 0 : i32
    %c0_i32_0 = arith.constant 0 : i32
    return %arg0, %c0_i32 : i32, i32
  }
  func.func @transform_2(%arg0: i32) -> (i32, i32) {
    %c0_i32 = arith.constant 0 : i32
    %c0_i32_0 = arith.constant 0 : i32
    %c0_i32_1 = arith.constant 0 : i32
    return %c0_i32, %c0_i32_0 : i32, i32
  }
  func.func @transform_3(%arg0: i32) -> (i32, i32) {
    %c0_i32 = arith.constant 0 : i32
    %c0_i32_0 = arith.constant 0 : i32
    %c0_i32_1 = arith.constant 0 : i32
    return %c0_i32, %c0_i32_0 : i32, i32
  }
  func.func @transform_4(%arg0: i32) -> (i32, i32) {
    %c0_i32 = arith.constant 0 : i32
    %c0_i32_0 = arith.constant 0 : i32
    %c0_i32_1 = arith.constant 0 : i32
    return %c0_i32, %c0_i32_0 : i32, i32
  }
  func.func @transform_5(%arg0: i32) -> (i32, i32) {
    %c0_i32 = arith.constant 0 : i32
    %c0_i32_0 = arith.constant 0 : i32
    return %arg0, %c0_i32 : i32, i32
  }
}

</mosaic_0001>

<bundles_post_ra>
// kernel: blstm_forward.5
= control target key start
LH: loop header
LB: loop body
LE: loop exit
PB: predicated region body
PF: predicated region fallthrough
CT: control target
= control target key end

     0   :  { %v174_v1 = vmov 0   ;;  %vm57_vm0 = vcmask 261120   ;;  %v27_v11 = vlaneseq  ;;  %s234_s1 = inlined_call_operand.vmem [shape: bf16[32,256], index: 1, kind: input, shape index: {}]   ;;  %s235_s0 = inlined_call_operand.vmem [shape: f32[32,32], index: 0, kind: input, shape index: {}]   ;;  %s236_s2 = inlined_call_operand.vmem [shape: f32[1,256], index: 2, kind: input, shape index: {}]   ;;  %s237_s3 = inlined_call_operand.vmem [shape: bf16[32,256], index: 3, kind: output, shape index: {}]  }
   0x1   :  { %v168_v0 = vld [vmem:[%s234_s1 + $0x14] ss:$8 sps:$4 sm:$0xff]   ;;  %96 = vmatprep.mubr.bf16.mxu0 %v174_v1  ;;  %106 = vmatprep.mubr.bf16.mxu1 %v174_v1  ;;  %v170_v2 = vld [vmem:[%s234_s1 + $0x10] ss:$8 sps:$4 sm:$0xff]   ;;  %v171_v3 = vld [vmem:[%s234_s1 + $0x4] ss:$8 sps:$4 sm:$0xff]  }
   0x2   :  { %76 = vmatprep.subr.bf16.mxu0 %v168_v0  ;;  %163 = vmatprep.subr.bf16.mxu1 %v168_v0  ;;  %v173_v4 = vld [vmem:[%s234_s1] ss:$8 sps:$4 sm:$0xff]   ;;  %v21_v7 = vld [vmem:[%s235_s0 + $0x10] sm:$0xff]  ;;  %v22_v8 = vld [vmem:[%s235_s0 + $0x18] sm:$0xff]  ;;  %v28_v12 = vshrl.u32 %v27_v11, 7 }
   0x3   :  { %v19_v5 = vld [vmem:[%s235_s0] sm:$0xff]  ;;  %77 = vmatpush1.bf16.msra.mxu0 %v170_v2  ;;  %165 = vmatpush1.bf16.msra.mxu1 %v170_v2  ;;  %v20_v6 = vld [vmem:[%s235_s0 + $0x8] sm:$0xff]  ;;  %v24_v10 = vpack.c.bf16 %v22_v8, %v21_v7 }
   0x4   :  { %78 = vmatprep.subr.bf16.mxu0 %v171_v3  ;;  %164 = vmatprep.subr.bf16.mxu1 %v171_v3  ;;  %v23_v9 = vpack.c.bf16 %v20_v6, %v19_v5  ;;  %v29_v13 = vsub.s32 0, %v28_v12  ;;  %v33_v14 = vsub.s32 1, %v28_v12  ;;  %v25_v15 = vld [vmem:[%s236_s2] sm:$0x3] }
   0x6   :  { %v30_v16 = vrot.slane %v25_v15, %v29_v13  ;;  %v34_v17 = vrot.slane %v25_v15, %v33_v14 }
   0x7   :  { %79 = vmatpush1.bf16.msra.mxu0 %v173_v4  ;;  %166 = vmatpush1.bf16.msra.mxu1 %v173_v4 }
   0xa   :  { %153 = vmatmul.mubr.msk.bf16.vlgmr.msra.gmra.mxu0 %vm57_vm0, %v23_v9  ;;  %154 = vmatmul.mubr.msk.bf16.vlgmr.msra.gmra.mxu1 %vm57_vm0, %v24_v10 }
  0xca   :  { %v98_v18 = vpop.f32.mrf.mxu0  ;;  %v108_v19 = vpop.f32.mrf.mxu1 }
  0xcb   :  { %v99_v22 = vadd.f32 %v98_v18, %v30_v16  ;;  %v109_v23 = vadd.f32 %v108_v19, %v30_v16 }
  0xcc   :  { %v100_v20 = vpop.f32.mrf.mxu0  ;;  %v110_v21 = vpop.f32.mrf.mxu1 }
  0xcd   :  { %v101_v24 = vadd.f32 %v100_v20, %v34_v17  ;;  %v111_v25 = vadd.f32 %v110_v21, %v34_v17 }
  0xce   :  { %v102_v26 = vpop.f32.mrf.mxu0  ;;  %v112_v27 = vpop.f32.mrf.mxu1 }
  0xcf   :  { %v159_v28 = vpack.c.bf16 %v101_v24, %v99_v22  ;;  %v161_v29 = vpack.c.bf16 %v111_v25, %v109_v23  ;;  %v103_v32 = vadd.f32 %v102_v26, %v30_v16  ;;  %v113_v33 = vadd.f32 %v112_v27, %v30_v16 }
  0xd0   :  { %v104_v30 = vpop.f32.mrf.mxu0  ;;  %v114_v31 = vpop.f32.mrf.mxu1 }
  0xd1   :  { %141 = vst [vmem:[%s237_s3] sm:$0xff] %v159_v28  ;;  %143 = vst [vmem:[%s237_s3 + $0x10] sm:$0xff] %v161_v29  ;;  %v105_v34 = vadd.f32 %v104_v30, %v34_v17  ;;  %v115_v35 = vadd.f32 %v114_v31, %v34_v17 }
  0xd3   :  { %v160_v36 = vpack.c.bf16 %v105_v34, %v103_v32  ;;  %v162_v37 = vpack.c.bf16 %v115_v35, %v113_v33 }
  0xd5   :  { %142 = vst [vmem:[%s237_s3 + $0x8] sm:$0xff] %v160_v36  ;;  %144 = vst [vmem:[%s237_s3 + $0x18] sm:$0xff] %v162_v37 }

// kernel: blstm_forward.9
= control target key start
LH: loop header
LB: loop body
LE: loop exit
PB: predicated region body
PF: predicated region fallthrough
CT: control target
= control target key end

     0   :  { %vm59_vm0 = vcmask 261120   ;;  %s333_s3 = inlined_call_operand.vmem [shape: bf16[32,32], index: 3, kind: input, shape index: {}]   ;;  %s334_s2 = inlined_call_operand.vmem [shape: bf16[32,32], index: 2, kind: input, shape index: {}]   ;;  %s335_s1 = inlined_call_operand.vmem [shape: bf16[32,32], index: 1, kind: input, shape index: {}]   ;;  %s336_s0 = inlined_call_operand.vmem [shape: bf16[32,32], index: 0, kind: input, shape index: {}]   ;;  %s337_s4 = inlined_call_operand.vmem [shape: f32[1,32], index: 4, kind: input, shape index: {}]   ;;  %s338_s5 = inlined_call_operand.vmem [shape: f32[32,32], index: 5, kind: output, shape index: {}]  }
   0x1   :  { %v248_v0 = vld [vmem:[%s333_s3 + $0x8] sm:$0xff]   ;;  %v250_v2 = vld [vmem:[%s333_s3] sm:$0xff]  }
   0x2   :  { %v249_v1 = vld [vmem:[%s334_s2 + $0x8] sm:$0xff]   ;;  %232 = vmatprep.subr.bf16.mxu0 %v248_v0  ;;  %v251_v3 = vld [vmem:[%s334_s2] sm:$0xff]  }
   0x3   :  { %240 = vmatprep.subr.bf16.mxu1 %v249_v1  ;;  %233 = vmatpush3.bf16.msra.mxu0 %v248_v0  ;;  %v252_v4 = vld [vmem:[%s335_s1] sm:$0xff]   ;;  %v254_v6 = vld [vmem:[%s335_s1 + $0x8] sm:$0xff]  }
   0x4   :  { %241 = vmatpush3.bf16.msra.mxu1 %v249_v1  ;;  %234 = vmatprep.subr.bf16.mxu0 %v250_v2  ;;  %v253_v5 = vld [vmem:[%s336_s0] sm:$0xff]   ;;  %v255_v7 = vld [vmem:[%s336_s0 + $0x8] sm:$0xff]  }
   0x5   :  { %242 = vmatprep.subr.bf16.mxu1 %v251_v3  ;;  %236 = vmatprep.mubr.msk.bf16.mxu0 %vm59_vm0, %v252_v4  ;;  %v223_v10 = vld [vmem:[%s337_s4] ss:$0 sm:$0xff] }
   0x6   :  { %244 = vmatprep.mubr.msk.bf16.mxu1 %vm59_vm0, %v253_v5 }
   0x7   :  { %235 = vmatpush3.bf16.msra.mxu0 %v250_v2 }
   0x8   :  { %243 = vmatpush3.bf16.msra.mxu1 %v251_v3 }
   0xa   :  { %237 = vmatmul.mubr.msk.bf16.vlgmr.msra.gmra.mxu0 %vm59_vm0, %v254_v6 }
   0xb   :  { %245 = vmatmul.mubr.msk.bf16.vlgmr.msra.gmra.mxu1 %vm59_vm0, %v255_v7 }
  0xca   :  { %v238_v8 = vpop.f32.mrf.mxu0 }
  0xcb   :  { %v246_v9 = vpop.f32.mrf.mxu1 }
  0xcc   :  { %v186_v11 = vadd.f32 %v246_v9, %v238_v8  ;;  %v100_v12 = vpop.f32.mrf.mxu0 }
  0xcd   :  { %v177_v13 = vpop.f32.mrf.mxu1 }
  0xce   :  { %v201_v14 = vadd.f32 %v223_v10, %v186_v11  ;;  %v178_v15 = vadd.f32 %v177_v13, %v100_v12  ;;  %v239_v16 = vpop.f32.mrf.mxu0 }
  0xcf   :  { %v247_v17 = vpop.f32.mrf.mxu1 }
  0xd0   :  { %205 = vst.msk [vmem:[%s338_s5 + $0x10] sm:$0xff] %vm59_vm0, %v201_v14  ;;  %v199_v18 = vadd.f32 %v223_v10, %v178_v15  ;;  %v189_v19 = vadd.f32 %v247_v17, %v239_v16  ;;  %v103_v20 = vpop.f32.mrf.mxu0 }
  0xd1   :  { %v180_v21 = vpop.f32.mrf.mxu1 }
  0xd2   :  { %203 = vst.msk [vmem:[%s338_s5] sm:$0xff] %vm59_vm0, %v199_v18  ;;  %v202_v22 = vadd.f32 %v223_v10, %v189_v19  ;;  %v181_v23 = vadd.f32 %v180_v21, %v103_v20 }
  0xd4   :  { %206 = vst.msk [vmem:[%s338_s5 + $0x18] sm:$0xff] %vm59_vm0, %v202_v22  ;;  %v200_v24 = vadd.f32 %v223_v10, %v181_v23 }
  0xd6   :  { %204 = vst.msk [vmem:[%s338_s5 + $0x8] sm:$0xff] %vm59_vm0, %v200_v24 }

// kernel: blstm_forward.7
= control target key start
LH: loop header
LB: loop body
LE: loop exit
PB: predicated region body
PF: predicated region fallthrough
CT: control target
= control target key end

     0   :  { %v309_v1 = vmov 0   ;;  %vm67_vm0 = vcmask 261120   ;;  %v218_v13 = vlaneseq  ;;  %s391_s3 = inlined_call_operand.vmem [shape: bf16[32,256], index: 3, kind: input, shape index: {}]   ;;  %s392_s2 = inlined_call_operand.vmem [shape: bf16[32,256], index: 2, kind: input, shape index: {}]   ;;  %s393_s1 = inlined_call_operand.vmem [shape: bf16[32,32], index: 1, kind: input, shape index: {}]   ;;  %s394_s0 = inlined_call_operand.vmem [shape: bf16[32,32], index: 0, kind: input, shape index: {}]   ;;  %s395_s4 = inlined_call_operand.vmem [shape: f32[1,256], index: 4, kind: input, shape index: {}]   ;;  %s396_s5 = inlined_call_operand.vmem [shape: bf16[32,256], index: 5, kind: output, shape index: {}]  }
   0x1   :  { %v293_v0 = vld [vmem:[%s391_s3 + $0x14] ss:$8 sps:$4 sm:$0xff]   ;;  %106 = vmatprep.mubr.bf16.mxu0 %v309_v1  ;;  %195 = vmatprep.mubr.bf16.mxu1 %v309_v1  ;;  %v297_v3 = vld [vmem:[%s391_s3 + $0x10] ss:$8 sps:$4 sm:$0xff]   ;;  %v299_v5 = vld [vmem:[%s391_s3 + $0x4] ss:$8 sps:$4 sm:$0xff]  }
   0x2   :  { %v295_v2 = vld [vmem:[%s392_s2 + $0x14] ss:$8 sps:$4 sm:$0xff]   ;;  %86 = vmatprep.subr.bf16.mxu0 %v293_v0  ;;  %v298_v4 = vld [vmem:[%s392_s2 + $0x10] ss:$8 sps:$4 sm:$0xff]   ;;  %v301_v6 = vld [vmem:[%s392_s2 + $0x4] ss:$8 sps:$4 sm:$0xff]  }
   0x3   :  { %175 = vmatprep.subr.bf16.mxu1 %v295_v2  ;;  %87 = vmatpush1.bf16.msra.mxu0 %v297_v3  ;;  %v303_v7 = vld [vmem:[%s391_s3] ss:$8 sps:$4 sm:$0xff]   ;;  %v219_v14 = vshrl.u32 %v218_v13, 7 }
   0x4   :  { %176 = vmatpush1.bf16.msra.mxu1 %v298_v4  ;;  %88 = vmatprep.subr.bf16.mxu0 %v299_v5  ;;  %v304_v8 = vld [vmem:[%s392_s2] ss:$8 sps:$4 sm:$0xff]  }
   0x5   :  { %177 = vmatprep.subr.bf16.mxu1 %v301_v6  ;;  %v305_v9 = vld [vmem:[%s393_s1] sm:$0xff]   ;;  %v307_v11 = vld [vmem:[%s393_s1 + $0x8] sm:$0xff]   ;;  %v220_v15 = vsub.s32 0, %v219_v14  ;;  %v224_v16 = vsub.s32 1, %v219_v14 }
   0x6   :  { %v306_v10 = vld [vmem:[%s394_s0] sm:$0xff]   ;;  %v308_v12 = vld [vmem:[%s394_s0 + $0x8] sm:$0xff]  }
   0x7   :  { %89 = vmatpush1.bf16.msra.mxu0 %v303_v7  ;;  %v216_v17 = vld [vmem:[%s395_s4] sm:$0x3] }
   0x8   :  { %178 = vmatpush1.bf16.msra.mxu1 %v304_v8  ;;  %v221_v21 = vrot.slane %v216_v17, %v220_v15  ;;  %v225_v22 = vrot.slane %v216_v17, %v224_v16 }
   0xa   :  { %274 = vmatmul.mubr.msk.bf16.vlgmr.msra.gmra.mxu0 %vm67_vm0, %v305_v9 }
   0xb   :  { %282 = vmatmul.mubr.msk.bf16.vlgmr.msra.gmra.mxu1 %vm67_vm0, %v306_v10  ;;  %116 = vmatprep.mubr.bf16.mxu0 %v309_v1 }
   0xc   :  { %205 = vmatprep.mubr.bf16.mxu1 %v309_v1 }
  0x12   :  { %275 = vmatmul.mubr.msk.bf16.gmra.mxu0 %vm67_vm0, %v307_v11 }
  0x13   :  { %283 = vmatmul.mubr.msk.bf16.gmra.mxu1 %vm67_vm0, %v308_v12 }
  0xca   :  { %v108_v18 = vpop.f32.mrf.mxu0 }
  0xcb   :  { %v197_v19 = vpop.f32.mrf.mxu1 }
  0xcc   :  { %v198_v20 = vadd.f32 %v197_v19, %v108_v18  ;;  %v110_v23 = vpop.f32.mrf.mxu0 }
  0xcd   :  { %v199_v24 = vpop.f32.mrf.mxu1 }
  0xce   :  { %v200_v25 = vadd.f32 %v199_v24, %v110_v23  ;;  %v112_v26 = vpop.f32.mrf.mxu0  ;;  %v228_v28 = vadd.f32 %v221_v21, %v198_v20 }
  0xcf   :  { %v201_v27 = vpop.f32.mrf.mxu1 }
  0xd0   :  { %v229_v29 = vadd.f32 %v225_v22, %v200_v25  ;;  %v202_v30 = vadd.f32 %v201_v27, %v112_v26  ;;  %v114_v31 = vpop.f32.mrf.mxu0 }
  0xd1   :  { %v203_v32 = vpop.f32.mrf.mxu1 }
  0xd2   :  { %v288_v33 = vpack.c.bf16 %v229_v29, %v228_v28  ;;  %v204_v34 = vadd.f32 %v203_v32, %v114_v31  ;;  %v118_v35 = vpop.f32.mrf.mxu0  ;;  %v230_v37 = vadd.f32 %v221_v21, %v202_v30 }
  0xd3   :  { %v207_v36 = vpop.f32.mrf.mxu1 }
  0xd4   :  { %260 = vst [vmem:[%s396_s5] sm:$0xff] %v288_v33  ;;  %v231_v38 = vadd.f32 %v225_v22, %v204_v34  ;;  %v208_v39 = vadd.f32 %v207_v36, %v118_v35  ;;  %v120_v40 = vpop.f32.mrf.mxu0 }
  0xd5   :  { %v209_v41 = vpop.f32.mrf.mxu1 }
  0xd6   :  { %v289_v42 = vpack.c.bf16 %v231_v38, %v230_v37  ;;  %v210_v43 = vadd.f32 %v209_v41, %v120_v40  ;;  %v122_v44 = vpop.f32.mrf.mxu0  ;;  %v232_v46 = vadd.f32 %v221_v21, %v208_v39 }
  0xd7   :  { %v211_v45 = vpop.f32.mrf.mxu1 }
  0xd8   :  { %261 = vst [vmem:[%s396_s5 + $0x8] sm:$0xff] %v289_v42  ;;  %v233_v47 = vadd.f32 %v225_v22, %v210_v43  ;;  %v212_v48 = vadd.f32 %v211_v45, %v122_v44  ;;  %v124_v49 = vpop.f32.mrf.mxu0 }
  0xd9   :  { %v213_v50 = vpop.f32.mrf.mxu1 }
  0xda   :  { %v290_v51 = vpack.c.bf16 %v233_v47, %v232_v46  ;;  %v214_v52 = vadd.f32 %v213_v50, %v124_v49  ;;  %v234_v53 = vadd.f32 %v221_v21, %v212_v48 }
  0xdc   :  { %262 = vst [vmem:[%s396_s5 + $0x10] sm:$0xff] %v290_v51  ;;  %v235_v54 = vadd.f32 %v225_v22, %v214_v52 }
  0xde   :  { %v291_v55 = vpack.c.bf16 %v235_v54, %v234_v53 }
  0xe0   :  { %263 = vst [vmem:[%s396_s5 + $0x18] sm:$0xff] %v291_v55 }

// kernel: blstm_forward.6
= control target key start
LH: loop header
LB: loop body
LE: loop exit
PB: predicated region body
PF: predicated region fallthrough
CT: control target
= control target key end

     0   :  { %s2831_s24 = smov 0   ;;  %s2833_s25 = smov 0   ;;  %s3563_s0 = inlined_call_operand.vmem [shape: bf16[16,2,256], index: 0, kind: input, shape index: {}, may-alias: {0,1}]   ;;  %s3564_s1 = inlined_call_operand.vmem [shape: bf16[16,2,256], index: 1, kind: input, shape index: {}, may-alias: {0,1}]   ;;  %s3565_s2 = inlined_call_operand.vmem [shape: bf16[32,128], index: 2, kind: input, shape index: {}]   ;;  %s3566_s3 = inlined_call_operand.vmem [shape: bf16[32,128], index: 3, kind: input, shape index: {}]   ;;  %s3567_s4 = inlined_call_operand.vmem [shape: bf16[16,2,32], index: 4, kind: output, shape index: {0}]   ;;  %s3568_s5 = inlined_call_operand.vmem [shape: bf16[16,2,32], index: 5, kind: output, shape index: {1}]   ;;  %s3569_s6 = inlined_call_operand.vmem [shape: f32[2,2,32], index: 6, kind: output, shape index: {2}]   ;;  %s3570_s7 = inlined_call_operand.vmem [shape: f32[2,2,32], index: 7, kind: output, shape index: {3}]  }
   0x1   :  { %s2835_s26 = smov 0   ;;  %s2837_s27 = smov 0  }
   0x2   :  { %s2839_s28 = smov 0  }
   0x3 LB: > { %s2857_s29 = sadd.s32 4294967295, %s2781_s28   ;;  %s2860_s30 = sadd.s32 1, %s2781_s28   ;;  %s2781_s28 = sphi %s2839_s28, %s3576_s28   ;;  %s2777_s27 = sphi %s2837_s27, %s3575_s27   ;;  %s2773_s26 = sphi %s2835_s26, %s3574_s26   ;;  %s2769_s25 = sphi %s2833_s25, %s3573_s25   ;;  %s2765_s24 = sphi %s2831_s24, %s3572_s24  }
   0x4   : > { %s22_s8 = ssub.s32 %s2781_s28, %s2860_s30  ;;  %s25_s9 = sadd.s32 1, %s2777_s27 }
   0x5   : > { %p23_p0 = scmp.eq.s32.totalorder %s22_s8, 0  ;;  %p32_p1 = scmp.ne.s32.totalorder %s2777_s27, %s2773_s26 }
   0x6   : > { %p33_p2 = scmp.eq.s32.totalorder %s2781_s28, 0  ;;  %s48_s10 = ssub.s32 1, %s2781_s28 }
   0x7   : > { %s2870_s11 = scalar_select %p23_p0, %s2777_s27, %s25_s9  }
   0x8   : > { %p34_p3 = por %p33_p2, %p32_p1  ;;  %s49_s12 = ssub.s32 1, %s2860_s30 }
   0x9   : > { %s50_s13 = ssub.s32 %s48_s10, %s49_s12  ;;  %s53_s14 = sadd.s32 1, %s2769_s25 }
   0xa   : > { %p51_p4 = scmp.eq.s32.totalorder %s50_s13, 0  ;;  %p60_p5 = scmp.ne.s32.totalorder %s2769_s25, %s2765_s24 }
   0xb   : > { %p2290_p7 = scmp.ge.s32.totalorder %s2781_s28, 2 }
   0xc   : > { %s2879_s15 = scalar_select %p51_p4, %s2769_s25, %s53_s14  }
   0xd   : > { %p2881_p6 = por %p60_p5, %p33_p2  ;;  %230 = sbr.rel (%p2290_p7) target bundleno = 36 (0x24), region = 24 }
  0x12   : > { %233 = sbr.rel (!%p34_p3) target bundleno = 27 (0x1b), region = 28  ;;  %s235_s17 = sand.u32 (%p34_p3), 1, %s2777_s27  }
  0x13   : > { %s2382_s18 = sshll.u32 (%p34_p3), %s2781_s28, 4  ;;  %s2291_s19 = sshll.u32 (%p34_p3), %s235_s17, 3 }
  0x14   : > { %s240_s22 = scalar_lea.vmem (%p34_p3), %s3563_s0, %s2382_s18  ;;  %s237_s23 = scalar_lea.vmem (%p34_p3), [#allocation4], %s2291_s19 }
  0x15   : > { %v257_v0 = vld [vmem:[%s240_s22] sm:$0x1] (%p34_p3)  ;;  %v259_v1 = vld [vmem:[%s240_s22 + $0x2] sm:$0x1] (%p34_p3)  ;;  %v261_v2 = vld [vmem:[%s240_s22 + $0x4] sm:$0x1] (%p34_p3) }
  0x16   : > { %258 = vst [vmem:[%s237_s23] sm:$0x1] (%p34_p3), %v257_v0  ;;  %260 = vst [vmem:[%s237_s23 + $0x1] sm:$0x1] (%p34_p3), %v259_v1  ;;  %v263_v3 = vld [vmem:[%s240_s22 + $0x6] sm:$0x1] (%p34_p3) }
  0x17   : > { %v265_v4 = vld [vmem:[%s240_s22 + $0x8] sm:$0x1]  ;;  %262 = vst [vmem:[%s237_s23 + $0x2] sm:$0x1] %v261_v2  ;;  %264 = vst [vmem:[%s237_s23 + $0x3] sm:$0x1] %v263_v3 }
  0x18   : > { %266 = vst [vmem:[%s237_s23 + $0x4] sm:$0x1] %v265_v4  ;;  %v267_v5 = vld [vmem:[%s240_s22 + $0xa] sm:$0x1]  ;;  %v269_v6 = vld [vmem:[%s240_s22 + $0xc] sm:$0x1] }
  0x19   : > { %v271_v7 = vld [vmem:[%s240_s22 + $0xe] sm:$0x1]  ;;  %268 = vst [vmem:[%s237_s23 + $0x5] sm:$0x1] %v267_v5  ;;  %270 = vst [vmem:[%s237_s23 + $0x6] sm:$0x1] %v269_v6 }
  0x1a   : > { %272 = vst [vmem:[%s237_s23 + $0x7] sm:$0x1] %v271_v7 }
  0x1b PF: > { %312 = sbr.rel (!%p2881_p6) target bundleno = 36 (0x24), region = 69  ;;  %s314_s8 = sand.u32 (%p2881_p6), 1, %s2769_s25  }
  0x1c   : > { %s2295_s9 = sshll.u32 (%p2881_p6), %s48_s10, 4  ;;  %s2294_s12 = sshll.u32 (%p2881_p6), %s314_s8, 3 }
  0x1d   : > { %s2226_s17 = scalar_lea.vmem (%p2881_p6), %s3564_s1, %s2295_s9  ;;  %s316_s18 = scalar_lea.vmem (%p2881_p6), [#allocation5], %s2294_s12 }
  0x1e   : > { %v2296_v8 = vld [vmem:[%s2226_s17 + $0x1] sm:$0x1] (%p2881_p6)  ;;  %v2297_v9 = vld [vmem:[%s2226_s17 + $0x3] sm:$0x1] (%p2881_p6)  ;;  %v2298_v10 = vld [vmem:[%s2226_s17 + $0x5] sm:$0x1] (%p2881_p6) }
  0x1f   : > { %339 = vst [vmem:[%s316_s18] sm:$0x1] (%p2881_p6), %v2296_v8  ;;  %341 = vst [vmem:[%s316_s18 + $0x1] sm:$0x1] (%p2881_p6), %v2297_v9  ;;  %v2299_v11 = vld [vmem:[%s2226_s17 + $0x7] sm:$0x1] (%p2881_p6) }
  0x20   : > { %v2300_v12 = vld [vmem:[%s2226_s17 + $0x9] sm:$0x1]  ;;  %343 = vst [vmem:[%s316_s18 + $0x2] sm:$0x1] %v2298_v10  ;;  %345 = vst [vmem:[%s316_s18 + $0x3] sm:$0x1] %v2299_v11 }
  0x21   : > { %347 = vst [vmem:[%s316_s18 + $0x4] sm:$0x1] %v2300_v12  ;;  %v2301_v13 = vld [vmem:[%s2226_s17 + $0xb] sm:$0x1]  ;;  %v2302_v14 = vld [vmem:[%s2226_s17 + $0xd] sm:$0x1] }
  0x22   : > { %v2303_v15 = vld [vmem:[%s2226_s17 + $0xf] sm:$0x1]  ;;  %349 = vst [vmem:[%s316_s18 + $0x5] sm:$0x1] %v2301_v13  ;;  %351 = vst [vmem:[%s316_s18 + $0x6] sm:$0x1] %v2302_v14 }
  0x23   : > { %353 = vst [vmem:[%s316_s18 + $0x7] sm:$0x1] %v2303_v15 }
  0x24 PF: > { %p2304_p8 = scmp.ge.s32.totalorder %s2781_s28, 1  ;;  %p392_p9 = scmp.lt.s32.totalorder %s2781_s28, 3 }
  0x26   : > { %p393_p10 = pnand %p2304_p8, %p392_p9 }
  0x27   : > { %s399_s10 = sand.u32 (!%p393_p10), 1, %s2773_s26   ;;  %s406_s16 = sand.u32 (!%p393_p10), 1, %s2765_s24  }
  0x28   : > { %396 = sbr.rel (%p393_p10) target bundleno = 5612 (0x15ec), region = 110  ;;  %s2305_s19 = sshll.u32 (!%p393_p10), %s399_s10, 3 }
  0x29   : > { %s2306_s20 = sshll.u32 (!%p393_p10), %s406_s16, 3  ;;  %s2904_s21 = sshll.u32 (!%p393_p10), %s2857_s29, 3 }
  0x2a   : > { %s453_s22 = ssub.s32 (!%p393_p10), 1, %s2857_s29  ;;  %p449_p11 = scmp.lt.s32.totalorder (!%p393_p10), %s2904_s21, 15 }
  0x2b   : > { %s2908_s23 = sshll.u32 (!%p393_p10), %s453_s22, 3  ;;  %s2923_s17 = scalar_lea.vmem (!%p393_p10), [#allocation4], %s2305_s19 }
  0x2c   : > { %p455_p12 = scmp.lt.s32.totalorder (!%p393_p10), %s2908_s23, 15  ;;  %s2925_s18 = scalar_lea.vmem (!%p393_p10), [#allocation5], %s2306_s20 }
  0x2d   : > { %s450_s28 = scalar_select %p449_p11, %s2904_s21, 15 }
  0x2e   : > { %s456_s8 = scalar_select %p455_p12, %s2908_s23, 15 }
  0x2f   : > { %s2916_s26 = scalar_lea.vmem %s3567_s4, %s450_s28  ;;  %p2309_p13 = scmp.ne.s32.totalorder %s2857_s29, 0 }
  0x30   : > { %s2921_s14 = scalar_lea.vmem %s3568_s5, %s456_s8 }
  0x31   : > { %464 = sbr.rel (%p2309_p13) target bundleno = 57 (0x39), region = 122 }
  0x36   : > { %vm465_vm0 = vcmask 254976   ;;  %v2783_v16 = vmov 0.0  }
  0x37   : > { %466 = vst.msk [vmem:[#allocation2] sm:$0x3] %vm465_vm0, %v2783_v16  ;;  %467 = vst.msk [vmem:[#allocation2 + $0x2] sm:$0x3] %vm465_vm0, %v2783_v16 }
  0x38   : > { %468 = vst.msk [vmem:[#allocation3] sm:$0x3] %vm465_vm0, %v2783_v16  ;;  %469 = vst.msk [vmem:[#allocation3 + $0x2] sm:$0x3] %vm465_vm0, %v2783_v16 }
  0x39 PF: > { %v2931_v17 = vld [vmem:[%s3565_s2 + $0x8] sm:$0xff]   ;;  %v2784_v18 = vmov 0.0   ;;  %v2944_v20 = vld [vmem:[%s3565_s2] sm:$0xff]   ;;  %vm2785_vm1 = vmmov 0   ;;  %vm499_vm2 = vcmask 261120   ;;  %s2786_s9 = smov 32   ;;  %v685_v2 = vlaneseq }
  0x3a   : > { %2431 = vmatprep.subr.bf16.mxu0 %v2784_v18  ;;  %2439 = vmatprep.subr.bf16.mxu1 %v2784_v18  ;;  %v2938_v19 = vld [vmem:[%s3566_s3 + $0x8] sm:$0xff]   ;;  %v2953_v21 = vld [vmem:[%s3566_s3] sm:$0xff]   ;;  %s2787_s12 = smov 64   ;;  %v2788_v0 = vmov 1983009808   ;;  %s2789_s24 = smov 96  }
  0x3b   : > { %2432 = vmatpush3.bf16.msra.mxu0 %v2931_v17  ;;  %2435 = vmatprep.mubr.msk.bf16.mxu0 %vm2785_vm1, %v2784_v18  ;;  %v484_v28 = vld [vmem:[%s2923_s17] sm:$0x1]  ;;  %v2313_v29 = vld [vmem:[%s2925_s18 + $0x7] sm:$0x1]  ;;  %v683_v1 = vunpack.c.l.s4 %v2788_v0  ;;  %v2997_v4 = vshrl.u32 %v685_v2, 7  ;;  %s676_s13 = sadd.s32 7, %s2908_s23 }
  0x3c   : > { %2440 = vmatpush3.bf16.msra.mxu1 %v2938_v19  ;;  %2433 = vmatprep.subr.bf16.mxu0 %v2784_v18  ;;  %v485_v30 = vunpack.c.l.bf16 %v484_v28  ;;  %v546_v31 = vunpack.c.l.bf16 %v2313_v29  ;;  %p677_p0 = scmp.lt.s32.totalorder %s676_s13, 11  ;;  %s882_s16 = sadd.s32 6, %s2908_s23  ;;  %vm713_vm13 = vcmask 253952   ;;  %vm2125_vm14 = vcmask 254976  }
  0x3d   : > { %2441 = vmatprep.subr.bf16.mxu1 %v2784_v18  ;;  %2443 = vmatprep.mubr.msk.bf16.mxu1 %vm2785_vm1, %v2784_v18  ;;  %v684_v3 = vunpack.c.0.s8 %v683_v1  ;;  %p883_p1 = scmp.lt.s32.totalorder %s882_s16, 11  ;;  %s1077_s29 = sadd.s32 5, %s2908_s23 }
  0x3e   : > { %v478_v22 = vld [vmem:[#allocation2] sm:$0x3]  ;;  %v2958_v23 = vld [vmem:[#allocation2 + $0x2] sm:$0x3]  ;;  %s678_s10 = scalar_select %p677_p0, 1, 0 }
  0x3f   : > { %v486_v24 = vpack.c.bf16 %v478_v22, %v478_v22  ;;  %v2318_v25 = vld.sshfl [vmem:[#allocation3] sm:$0x3 pattern:$0x76325410]  ;;  %2434 = vmatpush3.bf16.msra.mxu0 %v2944_v20  ;;  %v547_v26 = vpack.c.bf16 %v2958_v23, %v2958_v23  ;;  %v3000_v5 = vsub.s32 %v684_v3, %v2997_v4  ;;  %s884_s19 = scalar_select %p883_p1, 1, 0 }
  0x40   : > { %619 = vrot.lane.b32.xlu1 %v2318_v25, %s2786_s9  ;;  %2442 = vmatpush3.bf16.msra.mxu1 %v2953_v21  ;;  %v2320_v27 = vld.sshfl [vmem:[#allocation3 + $0x2] sm:$0x3 pattern:$0x76325410]  ;;  %v3010_v12 = vstv %s678_s10  ;;  %v2323_v25 = vld [vmem:[%s2923_s17 + $0x1] sm:$0x1] }
  0x41   : > { %2447 = vmatprep.subr.bf16.mxu0 %v2784_v18  ;;  %2455 = vmatprep.subr.bf16.mxu1 %v2784_v18  ;;  %v688_v7 = vrot.slane %v2958_v23, %v3000_v5  ;;  %vm680_vm3 = vcmp.eq.s32.totalorder %v3010_v12, 1  ;;  %p1078_p2 = scmp.lt.s32.totalorder %s1077_s29, 11  ;;  %s1273_s22 = sadd.s32 3, %s2904_s21 }
  0x42   : > { %2436 = vmatmul.mubr.msk.bf16.vlgmr.msra.gmra.mxu0 %vm499_vm2, %v486_v24  ;;  %p1274_p3 = scmp.lt.s32.totalorder %s1273_s22, 11  ;;  %s1280_s8 = sadd.s32 4, %s2908_s23 }
  0x43   : > { %2444 = vmatmul.mubr.msk.bf16.vlgmr.msra.gmra.mxu1 %vm499_vm2, %v547_v26  ;;  %2448 = vmatpush3.bf16.msra.mxu0 %v2931_v17  ;;  %v738_v26 = vunpack.c.l.bf16 %v2323_v25  ;;  %s1079_s20 = scalar_select %p1078_p2, 1, 0 }
  0x44   : > { %654 = vrot.lane.b32.xlu1 %v2320_v27, %s2786_s9  ;;  %2456 = vmatpush3.bf16.msra.mxu1 %v2938_v19  ;;  %v2325_v27 = vld [vmem:[%s2925_s18 + $0x6] sm:$0x1]  ;;  %s1275_s28 = scalar_select %p1274_p3, 1, 0 }
  0x45   : > { %2449 = vmatprep.subr.bf16.mxu0 %v2784_v18  ;;  %2451 = vmatprep.mubr.msk.bf16.mxu0 %vm2785_vm1, %v2784_v18  ;;  %p1281_p4 = scmp.lt.s32.totalorder %s1280_s8, 11  ;;  %s1475_s10 = sadd.s32 4, %s2904_s21 }
  0x46   : > { %2457 = vmatprep.subr.bf16.mxu1 %v2784_v18  ;;  %2459 = vmatprep.mubr.msk.bf16.mxu1 %vm2785_vm1, %v2784_v18  ;;  %p1476_p5 = scmp.lt.s32.totalorder %s1475_s10, 11 }
  0x47   : > { %2450 = vmatpush3.bf16.msra.mxu0 %v2944_v20  ;;  %s1282_s13 = scalar_select %p1281_p4, 1, 0 }
  0x48   : > { %2458 = vmatpush3.bf16.msra.mxu1 %v2953_v21  ;;  %2463 = vmatprep.subr.bf16.mxu0 %v2784_v18  ;;  %s1477_s16 = scalar_select %p1476_p5, 1, 0 }
  0x49   : > { %2471 = vmatprep.subr.bf16.mxu1 %v2784_v18 }
  0xb2   : > { %v620_v56 = vpop.permute.xlu1 %619 }
  0xb6   : > { %v2988_v58 = vpop.permute.xlu1 %654 }
 0x102   : > { %v537_v32 = vpop.f32.mrf.mxu0 }
 0x103   : > { %v543_v33 = vadd.f32 %v537_v32, %v485_v30  ;;  %v597_v34 = vpop.f32.mrf.mxu1 }
 0x104   : > { %v603_v35 = vadd.f32 %v597_v34, %v546_v31  ;;  %v2437_v36 = vpop.f32.mrf.mxu0  ;;  %v787_v31 = vunpack.c.l.bf16 %v2325_v27 }
 0x105   : > { %2611 = vtanh.f32 %v543_v33  ;;  %v2445_v37 = vpop.f32.mrf.mxu1  ;;  %v2317_v44 = vmul.f32 -1.442695, %v543_v33 }
 0x106   : > { %v540_v38 = vpop.f32.mrf.mxu0  ;;  %2613 = vtanh.f32 %v603_v35  ;;  %v2319_v45 = vmul.f32 -1.442695, %v603_v35 }
 0x107   : > { %v600_v39 = vpop.f32.mrf.mxu1  ;;  %2615 = vpow2.f32 %v2317_v44 }
 0x108   : > { %v2438_v40 = vpop.f32.mrf.mxu0  ;;  %2617 = vpow2.f32 %v2319_v45 }
 0x109   : > { %v2446_v41 = vpop.f32.mrf.mxu1 }
 0x112   : > { %v2612_v42 = vpop.eup %2611 }
 0x113   : > { %624 = vrot.lane.b32.xlu0 %v2612_v42, %s2787_s12  ;;  %v2614_v43 = vpop.eup %2613 }
 0x114   : > { %v2616_v46 = vpop.eup %2615 }
 0x115   : > { %v607_v47 = vadd.f32 1.0, %v2616_v46  ;;  %v2618_v48 = vpop.eup %2617 }
 0x116   : > { %v642_v49 = vadd.f32 1.0, %v2618_v48 }
 0x117   : > { %659 = vrot.lane.b32.xlu0 %v2614_v43, %s2787_s12  ;;  %2619 = vrcp.f32 %v607_v47 }
 0x118   : > { %2621 = vrcp.f32 %v642_v49 }
 0x124   : > { %v2620_v50 = vpop.eup %2619 }
 0x125   : > { %v2622_v53 = vpop.eup %2621  ;;  %v622_v57 = vmul.f32 %v2620_v50, %v620_v56 }
 0x126   : > { %v657_v61 = vmul.f32 %v2622_v53, %v2988_v58 }
 0x185   : > { %v625_v51 = vpop.permute.xlu0 %624 }
 0x186   : > { %v627_v52 = vmul.f32 %v2620_v50, %v625_v51 }
 0x188   : > { %629 = vrot.lane.b32.xlu0 %v627_v52, %s2786_s9 }
 0x189   : > { %v660_v54 = vpop.permute.xlu0 %659 }
 0x18a   : > { %v662_v55 = vmul.f32 %v2622_v53, %v660_v54 }
 0x18c   : > { %664 = vrot.lane.b32.xlu1 %v662_v55, %s2786_s9 }
 0x1fa   : > { %v630_v59 = vpop.permute.xlu0 %629 }
 0x1fb   : > { %v2990_v60 = vadd.f32 %v630_v59, %v622_v57 }
 0x1fd   : > { %2623 = vtanh.f32 %v2990_v60 }
 0x1fe   : > { %v665_v62 = vpop.permute.xlu1 %664 }
 0x1ff   : > { %v2994_v63 = vadd.f32 %v665_v62, %v657_v61 }
 0x201   : > { %2625 = vtanh.f32 %v2994_v63  ;;  %v3053_v56 = vsel %vm680_vm3, %v2994_v63, %v2988_v58  ;;  %v3064_v63 = vstv %s884_s19  ;;  %s1482_s19 = sadd.s32 3, %s2908_s23  ;;  %s1677_s23 = sadd.s32 5, %s2904_s21 }
 0x202   : > { %vm886_vm4 = vcmp.eq.s32.totalorder %v3064_v63, 1  ;;  %v2339_v63 = vld [vmem:[%s2923_s17 + $0x3] sm:$0x1]  ;;  %p1483_p6 = scmp.lt.s32.totalorder %s1482_s19, 11  ;;  %p1678_p7 = scmp.lt.s32.totalorder %s1677_s23, 11 }
 0x203   : > { %s1872_s23 = sadd.s32 6, %s2904_s21 }
 0x204   : > { %s1484_s29 = scalar_select %p1483_p6, 1, 0 }
 0x205   : > { %p1873_p8 = scmp.lt.s32.totalorder %s1872_s23, 11 }
 0x20a   : > { %v2624_v6 = vpop.eup %2623 }
 0x20b   : > { %635 = vrot.lane.b32.xlu0 %v2624_v6, %s2787_s12 }
 0x20e   : > { %v2626_v8 = vpop.eup %2625 }
 0x20f   : > { %670 = vrot.lane.b32.xlu1 %v2626_v8, %s2787_s12  ;;  %689 = vrot.lane.b32.xlu0 %v688_v7, %s2789_s24 }
 0x27d   : > { %v636_v9 = vpop.permute.xlu0 %635 }
 0x27e   : > { %v638_v10 = vmul.f32 %v2620_v50, %v636_v9 }
 0x280   : > { %v3008_v11 = vpack.c.bf16 %v638_v10, %v638_v10  ;;  %v2331_v10 = vld [vmem:[%s2923_s17 + $0x2] sm:$0x1] }
 0x281   : > { %v671_v13 = vpop.permute.xlu1 %670  ;;  %v690_v14 = vpop.permute.xlu0 %689  ;;  %v933_v12 = vunpack.c.l.bf16 %v2331_v10 }
 0x282   : > { %v673_v15 = vmul.f32 %v2622_v53, %v671_v13  ;;  %739 = vrot.lane.b32.xlu1 %v3008_v11, %s2786_s9 }
 0x284   : > { %v3017_v16 = vsel %vm680_vm3, %v673_v15, %v690_v14  ;;  %v2333_v14 = vld [vmem:[%s2925_s18 + $0x5] sm:$0x1] }
 0x285   : > { %v3021_v22 = vpack.c.bf16 %v3017_v16, %v3017_v16 }
 0x287   : > { %788 = vrot.lane.b32.xlu0 %v3021_v22, %s2786_s9 }
 0x2f4   : > { %v740_v23 = vpop.permute.xlu1 %739 }
 0x2f5   : > { %2452 = vmatmul.mubr.msk.bf16.vlgmr.msra.gmra.mxu0 %vm499_vm2, %v740_v23  ;;  %v982_v23 = vunpack.c.l.bf16 %v2333_v14 }
 0x2f6   : > { %2464 = vmatpush3.bf16.msra.mxu0 %v2931_v17  ;;  %2467 = vmatprep.mubr.msk.bf16.mxu0 %vm2785_vm1, %v2784_v18 }
 0x2f7   : > { %2465 = vmatprep.subr.bf16.mxu0 %v2784_v18 }
 0x2f9   : > { %v789_v24 = vpop.permute.xlu0 %788 }
 0x2fa   : > { %2460 = vmatmul.mubr.msk.bf16.vlgmr.msra.gmra.mxu1 %vm499_vm2, %v789_v24  ;;  %2466 = vmatpush3.bf16.msra.mxu0 %v2944_v20 }
 0x2fb   : > { %2472 = vmatpush3.bf16.msra.mxu1 %v2938_v19  ;;  %2475 = vmatprep.mubr.msk.bf16.mxu1 %vm2785_vm1, %v2784_v18 }
 0x2fc   : > { %2473 = vmatprep.subr.bf16.mxu1 %v2784_v18  ;;  %2479 = vmatprep.subr.bf16.mxu0 %v2784_v18 }
 0x2ff   : > { %2474 = vmatpush3.bf16.msra.mxu1 %v2953_v21 }
 0x300   : > { %2487 = vmatprep.subr.bf16.mxu1 %v2784_v18 }
 0x3b5   : > { %v778_v28 = vpop.f32.mrf.mxu0 }
 0x3b6   : > { %v784_v29 = vadd.f32 %v778_v28, %v738_v26 }
 0x3b7   : > { %v2453_v30 = vpop.f32.mrf.mxu0 }
 0x3b8   : > { %2627 = vtanh.f32 %v784_v29  ;;  %v2327_v41 = vmul.f32 -1.442695, %v784_v29 }
 0x3b9   : > { %v781_v32 = vpop.f32.mrf.mxu0 }
 0x3ba   : > { %v827_v33 = vpop.f32.mrf.mxu1 }
 0x3bb   : > { %v833_v34 = vadd.f32 %v827_v33, %v787_v31  ;;  %v2454_v35 = vpop.f32.mrf.mxu0 }
 0x3bc   : > { %v2461_v36 = vpop.f32.mrf.mxu1 }
 0x3bd   : > { %2629 = vtanh.f32 %v833_v34  ;;  %v2328_v42 = vmul.f32 -1.442695, %v833_v34 }
 0x3be   : > { %v830_v37 = vpop.f32.mrf.mxu1  ;;  %2631 = vpow2.f32 %v2327_v41 }
 0x3bf   : > { %2633 = vpow2.f32 %v2328_v42 }
 0x3c0   : > { %v2462_v38 = vpop.f32.mrf.mxu1 }
 0x3c5   : > { %v2628_v39 = vpop.eup %2627 }
 0x3c6   : > { %843 = vrot.lane.b32.xlu1 %v2628_v39, %s2787_s12 }
 0x3ca   : > { %v2630_v40 = vpop.eup %2629 }
 0x3cb   : > { %867 = vrot.lane.b32.xlu0 %v2630_v40, %s2787_s12  ;;  %v2632_v43 = vpop.eup %2631 }
 0x3cc   : > { %v837_v44 = vadd.f32 1.0, %v2632_v43  ;;  %v2634_v45 = vpop.eup %2633 }
 0x3cd   : > { %v861_v46 = vadd.f32 1.0, %v2634_v45 }
 0x3ce   : > { %2635 = vrcp.f32 %v837_v44 }
 0x3cf   : > { %2637 = vrcp.f32 %v861_v46 }
 0x3db   : > { %v2636_v47 = vpop.eup %2635 }
 0x3dc   : > { %v2638_v50 = vpop.eup %2637  ;;  %v841_v53 = vmul.f32 %v2636_v47, %v2990_v60 }
 0x3dd   : > { %v865_v57 = vmul.f32 %v2638_v50, %v3053_v56 }
 0x438   : > { %v844_v48 = vpop.permute.xlu1 %843 }
 0x439   : > { %v846_v49 = vmul.f32 %v2636_v47, %v844_v48 }
 0x43b   : > { %848 = vrot.lane.b32.xlu1 %v846_v49, %s2786_s9 }
 0x43d   : > { %v868_v51 = vpop.permute.xlu0 %867 }
 0x43e   : > { %v870_v52 = vmul.f32 %v2638_v50, %v868_v51 }
 0x440   : > { %872 = vrot.lane.b32.xlu0 %v870_v52, %s2786_s9 }
 0x4ad   : > { %v849_v54 = vpop.permute.xlu1 %848 }
 0x4ae   : > { %v3046_v55 = vadd.f32 %v849_v54, %v841_v53 }
 0x4b0   : > { %2639 = vtanh.f32 %v3046_v55 }
 0x4b2   : > { %v873_v59 = vpop.permute.xlu0 %872 }
 0x4b3   : > { %v3056_v61 = vadd.f32 %v873_v59, %v865_v57  ;;  %v3125_v57 = vstv %s1079_s20  ;;  %s1679_s20 = scalar_select %p1678_p7, 1, 0 }
 0x4b4   : > { %vm1081_vm5 = vcmp.eq.s32.totalorder %v3125_v57, 1 }
 0x4b5   : > { %2641 = vtanh.f32 %v3056_v61  ;;  %v3108_v48 = vsel %vm886_vm4, %v3056_v61, %v3053_v56 }
 0x4bd   : > { %v2640_v62 = vpop.eup %2639 }
 0x4be   : > { %854 = vrot.lane.b32.xlu1 %v2640_v62, %s2787_s12 }
 0x4c2   : > { %v2642_v60 = vpop.eup %2641 }
 0x4c3   : > { %878 = vrot.lane.b32.xlu0 %v2642_v60, %s2787_s12 }
 0x530   : > { %v855_v0 = vpop.permute.xlu1 %854 }
 0x531   : > { %v857_v1 = vmul.f32 %v2636_v47, %v855_v0 }
 0x533   : > { %v3062_v58 = vpack.c.bf16 %v857_v1, %v857_v1 }
 0x535   : > { %v879_v2 = vpop.permute.xlu0 %878  ;;  %934 = vrot.lane.b32.xlu1 %v3062_v58, %s2786_s9 }
 0x536   : > { %v881_v3 = vmul.f32 %v2638_v50, %v879_v2  ;;  %v1128_v2 = vunpack.c.l.bf16 %v2339_v63 }
 0x538   : > { %v3072_v6 = vsel %vm886_vm4, %v881_v3, %v3017_v16 }
 0x539   : > { %v3076_v7 = vpack.c.bf16 %v3072_v6, %v3072_v6 }
 0x53b   : > { %983 = vrot.lane.b32.xlu0 %v3076_v7, %s2786_s9 }
 0x5a7   : > { %v935_v8 = vpop.permute.xlu1 %934 }
 0x5a8   : > { %2468 = vmatmul.mubr.msk.bf16.vlgmr.msra.gmra.mxu0 %vm499_vm2, %v935_v8  ;;  %v2341_v8 = vld [vmem:[%s2925_s18 + $0x4] sm:$0x1] }
 0x5a9   : > { %2480 = vmatpush3.bf16.msra.mxu0 %v2931_v17  ;;  %2483 = vmatprep.mubr.msk.bf16.mxu0 %vm2785_vm1, %v2784_v18 }
 0x5aa   : > { %2481 = vmatprep.subr.bf16.mxu0 %v2784_v18 }
 0x5ad   : > { %v984_v9 = vpop.permute.xlu0 %983  ;;  %2482 = vmatpush3.bf16.msra.mxu0 %v2944_v20 }
 0x5ae   : > { %2476 = vmatmul.mubr.msk.bf16.vlgmr.msra.gmra.mxu1 %vm499_vm2, %v984_v9  ;;  %2495 = vmatprep.subr.bf16.mxu0 %v2784_v18 }
 0x5af   : > { %2488 = vmatpush3.bf16.msra.mxu1 %v2938_v19  ;;  %2491 = vmatprep.mubr.msk.bf16.mxu1 %vm2785_vm1, %v2784_v18 }
 0x5b0   : > { %2489 = vmatprep.subr.bf16.mxu1 %v2784_v18 }
 0x5b3   : > { %2490 = vmatpush3.bf16.msra.mxu1 %v2953_v21 }
 0x5b4   : > { %2503 = vmatprep.subr.bf16.mxu1 %v2784_v18 }
 0x668   : > { %v973_v13 = vpop.f32.mrf.mxu0 }
 0x669   : > { %v979_v15 = vadd.f32 %v973_v13, %v933_v12  ;;  %v1177_v12 = vunpack.c.l.bf16 %v2341_v8 }
 0x66a   : > { %v2469_v16 = vpop.f32.mrf.mxu0 }
 0x66b   : > { %2643 = vtanh.f32 %v979_v15  ;;  %v2335_v33 = vmul.f32 -1.442695, %v979_v15 }
 0x66c   : > { %v976_v24 = vpop.f32.mrf.mxu0 }
 0x66e   : > { %v2470_v25 = vpop.f32.mrf.mxu0  ;;  %v1022_v26 = vpop.f32.mrf.mxu1 }
 0x66f   : > { %v1028_v27 = vadd.f32 %v1022_v26, %v982_v23 }
 0x670   : > { %v2477_v28 = vpop.f32.mrf.mxu1 }
 0x671   : > { %2645 = vtanh.f32 %v1028_v27  ;;  %v2336_v34 = vmul.f32 -1.442695, %v1028_v27 }
 0x672   : > { %v1025_v29 = vpop.f32.mrf.mxu1  ;;  %2647 = vpow2.f32 %v2335_v33 }
 0x673   : > { %2649 = vpow2.f32 %v2336_v34 }
 0x674   : > { %v2478_v30 = vpop.f32.mrf.mxu1 }
 0x678   : > { %v2644_v31 = vpop.eup %2643 }
 0x679   : > { %1038 = vrot.lane.b32.xlu1 %v2644_v31, %s2787_s12 }
 0x67e   : > { %v2646_v32 = vpop.eup %2645 }
 0x67f   : > { %1062 = vrot.lane.b32.xlu0 %v2646_v32, %s2787_s12  ;;  %v2648_v35 = vpop.eup %2647 }
 0x680   : > { %v1032_v36 = vadd.f32 1.0, %v2648_v35  ;;  %v2650_v37 = vpop.eup %2649 }
 0x681   : > { %v1056_v38 = vadd.f32 1.0, %v2650_v37 }
 0x682   : > { %2651 = vrcp.f32 %v1032_v36 }
 0x683   : > { %2653 = vrcp.f32 %v1056_v38 }
 0x68f   : > { %v2652_v39 = vpop.eup %2651 }
 0x690   : > { %v2654_v42 = vpop.eup %2653  ;;  %v1036_v45 = vmul.f32 %v2652_v39, %v3046_v55 }
 0x691   : > { %v1060_v49 = vmul.f32 %v2654_v42, %v3108_v48 }
 0x6eb   : > { %v1039_v40 = vpop.permute.xlu1 %1038 }
 0x6ec   : > { %v1041_v41 = vmul.f32 %v2652_v39, %v1039_v40 }
 0x6ee   : > { %1043 = vrot.lane.b32.xlu1 %v1041_v41, %s2786_s9 }
 0x6f1   : > { %v1063_v43 = vpop.permute.xlu0 %1062 }
 0x6f2   : > { %v1065_v44 = vmul.f32 %v2654_v42, %v1063_v43 }
 0x6f4   : > { %1067 = vrot.lane.b32.xlu0 %v1065_v44, %s2786_s9 }
 0x760   : > { %v1044_v46 = vpop.permute.xlu1 %1043 }
 0x761   : > { %v3101_v47 = vadd.f32 %v1044_v46, %v1036_v45 }
 0x763   : > { %2655 = vtanh.f32 %v3101_v47 }
 0x766   : > { %v1068_v50 = vpop.permute.xlu0 %1067 }
 0x767   : > { %v3111_v51 = vadd.f32 %v1068_v50, %v1060_v49 }
 0x769   : > { %2657 = vtanh.f32 %v3111_v51 }
 0x770   : > { %v2656_v52 = vpop.eup %2655 }
 0x771   : > { %1049 = vrot.lane.b32.xlu1 %v2656_v52, %s2787_s12 }
 0x776   : > { %v2658_v53 = vpop.eup %2657 }
 0x777   : > { %1073 = vrot.lane.b32.xlu0 %v2658_v53, %s2787_s12 }
 0x7e3   : > { %v1050_v54 = vpop.permute.xlu1 %1049 }
 0x7e4   : > { %v3117_v55 = vmul.f32 %v2652_v39, %v1050_v54  ;;  %v3191_v54 = vstv %s1282_s13 }
 0x7e5   : > { %vm1284_vm7 = vcmp.eq.s32.totalorder %v3191_v54, 1 }
 0x7e6   : > { %v3121_v56 = vpack.c.bf16 %v3117_v55, %v3117_v55 }
 0x7e8   : > { %1129 = vrot.lane.b32.xlu1 %v3121_v56, %s2786_s9 }
 0x7e9   : > { %v1074_v59 = vpop.permute.xlu0 %1073 }
 0x7ea   : > { %v1076_v61 = vmul.f32 %v2654_v42, %v1074_v59  ;;  %v3167_v42 = vsel %vm1081_vm5, %v3111_v51, %v3108_v48  ;;  %v3177_v48 = vstv %s1275_s28 }
 0x7eb   : > { %vm1277_vm6 = vcmp.eq.s32.totalorder %v3177_v48, 1 }
 0x7ec   : > { %v3131_v62 = vsel %vm1081_vm5, %v1076_v61, %v3072_v6 }
 0x7ed   : > { %v3135_v60 = vpack.c.bf16 %v3131_v62, %v3131_v62 }
 0x7ef   : > { %1178 = vrot.lane.b32.xlu0 %v3135_v60, %s2786_s9 }
 0x85a   : > { %v1130_v0 = vpop.permute.xlu1 %1129 }
 0x85b   : > { %2484 = vmatmul.mubr.msk.bf16.vlgmr.msra.gmra.mxu0 %vm499_vm2, %v1130_v0 }
 0x85c   : > { %2496 = vmatpush3.bf16.msra.mxu0 %v2931_v17  ;;  %2499 = vmatprep.mubr.msk.bf16.mxu0 %vm2785_vm1, %v2784_v18 }
 0x85d   : > { %2497 = vmatprep.subr.bf16.mxu0 %v2784_v18 }
 0x860   : > { %2498 = vmatpush3.bf16.msra.mxu0 %v2944_v20 }
 0x861   : > { %v1179_v1 = vpop.permute.xlu0 %1178  ;;  %2511 = vmatprep.subr.bf16.mxu0 %v2784_v18 }
 0x862   : > { %2492 = vmatmul.mubr.msk.bf16.vlgmr.msra.gmra.mxu1 %vm499_vm2, %v1179_v1  ;;  %v2348_v1 = vld [vmem:[%s2923_s17 + $0x4] sm:$0x1] }
 0x863   : > { %2504 = vmatpush3.bf16.msra.mxu1 %v2938_v19  ;;  %2507 = vmatprep.mubr.msk.bf16.mxu1 %vm2785_vm1, %v2784_v18  ;;  %v1331_v63 = vunpack.c.l.bf16 %v2348_v1 }
 0x864   : > { %2505 = vmatprep.subr.bf16.mxu1 %v2784_v18 }
 0x867   : > { %2506 = vmatpush3.bf16.msra.mxu1 %v2953_v21 }
 0x868   : > { %2519 = vmatprep.subr.bf16.mxu1 %v2784_v18 }
 0x91b   : > { %v1168_v3 = vpop.f32.mrf.mxu0 }
 0x91c   : > { %v1174_v6 = vadd.f32 %v1168_v3, %v1128_v2 }
 0x91d   : > { %v2485_v9 = vpop.f32.mrf.mxu0 }
 0x91e   : > { %2659 = vtanh.f32 %v1174_v6  ;;  %v2343_v27 = vmul.f32 -1.442695, %v1174_v6  ;;  %v2350_v6 = vld [vmem:[%s2925_s18 + $0x3] sm:$0x1] }
 0x91f   : > { %v1171_v10 = vpop.f32.mrf.mxu0 }
 0x920   : > { %v1380_v10 = vunpack.c.l.bf16 %v2350_v6 }
 0x921   : > { %v2486_v13 = vpop.f32.mrf.mxu0 }
 0x922   : > { %v1217_v14 = vpop.f32.mrf.mxu1 }
 0x923   : > { %v1223_v15 = vadd.f32 %v1217_v14, %v1177_v12 }
 0x924   : > { %v2493_v16 = vpop.f32.mrf.mxu1 }
 0x925   : > { %2661 = vtanh.f32 %v1223_v15  ;;  %v2344_v28 = vmul.f32 -1.442695, %v1223_v15 }
 0x926   : > { %v1220_v23 = vpop.f32.mrf.mxu1  ;;  %2663 = vpow2.f32 %v2343_v27 }
 0x927   : > { %2665 = vpow2.f32 %v2344_v28 }
 0x928   : > { %v2494_v24 = vpop.f32.mrf.mxu1 }
 0x92b   : > { %v2660_v25 = vpop.eup %2659 }
 0x92c   : > { %1233 = vrot.lane.b32.xlu1 %v2660_v25, %s2787_s12 }
 0x932   : > { %v2662_v26 = vpop.eup %2661 }
 0x933   : > { %1257 = vrot.lane.b32.xlu0 %v2662_v26, %s2787_s12  ;;  %v2664_v29 = vpop.eup %2663 }
 0x934   : > { %v1227_v30 = vadd.f32 1.0, %v2664_v29  ;;  %v2666_v31 = vpop.eup %2665 }
 0x935   : > { %v1251_v32 = vadd.f32 1.0, %v2666_v31 }
 0x936   : > { %2667 = vrcp.f32 %v1227_v30 }
 0x937   : > { %2669 = vrcp.f32 %v1251_v32 }
 0x943   : > { %v2668_v33 = vpop.eup %2667 }
 0x944   : > { %v2670_v36 = vpop.eup %2669  ;;  %v1231_v39 = vmul.f32 %v2668_v33, %v3101_v47 }
 0x945   : > { %v1255_v43 = vmul.f32 %v2670_v36, %v3167_v42 }
 0x99e   : > { %v1234_v34 = vpop.permute.xlu1 %1233 }
 0x99f   : > { %v1236_v35 = vmul.f32 %v2668_v33, %v1234_v34 }
 0x9a1   : > { %1238 = vrot.lane.b32.xlu1 %v1236_v35, %s2786_s9 }
 0x9a5   : > { %v1258_v37 = vpop.permute.xlu0 %1257 }
 0x9a6   : > { %v1260_v38 = vmul.f32 %v2670_v36, %v1258_v37 }
 0x9a8   : > { %1262 = vrot.lane.b32.xlu0 %v1260_v38, %s2786_s9 }
 0xa13   : > { %v1239_v40 = vpop.permute.xlu1 %1238 }
 0xa14   : > { %v3160_v41 = vadd.f32 %v1239_v40, %v1231_v39 }
 0xa16   : > { %2671 = vtanh.f32 %v3160_v41  ;;  %v3229_v38 = vsel %vm1277_vm6, %v3160_v41, %v3101_v47 }
 0xa1a   : > { %v1263_v44 = vpop.permute.xlu0 %1262 }
 0xa1b   : > { %v3170_v45 = vadd.f32 %v1263_v44, %v1255_v43 }
 0xa1d   : > { %2673 = vtanh.f32 %v3170_v45  ;;  %v3239_v44 = vsel %vm1284_vm7, %v3170_v45, %v3167_v42  ;;  %v3249_v42 = vstv %s1477_s16 }
 0xa1e   : > { %vm1479_vm8 = vcmp.eq.s32.totalorder %v3249_v42, 1 }
 0xa23   : > { %v2672_v46 = vpop.eup %2671 }
 0xa24   : > { %1244 = vrot.lane.b32.xlu1 %v2672_v46, %s2787_s12 }
 0xa2a   : > { %v2674_v49 = vpop.eup %2673 }
 0xa2b   : > { %1268 = vrot.lane.b32.xlu0 %v2674_v49, %s2787_s12 }
 0xa96   : > { %v1245_v50 = vpop.permute.xlu1 %1244 }
 0xa97   : > { %v1247_v51 = vmul.f32 %v2668_v33, %v1245_v50 }
 0xa99   : > { %v3183_v52 = vsel %vm1277_vm6, %v1247_v51, %v3117_v55 }
 0xa9a   : > { %v3187_v53 = vpack.c.bf16 %v3183_v52, %v3183_v52 }
 0xa9c   : > { %1332 = vrot.lane.b32.xlu1 %v3187_v53, %s2786_s9 }
 0xa9d   : > { %v1269_v57 = vpop.permute.xlu0 %1268 }
 0xa9e   : > { %v1271_v59 = vmul.f32 %v2670_v36, %v1269_v57  ;;  %v3263_v57 = vstv %s1484_s29 }
 0xa9f   : > { %vm1486_vm9 = vcmp.eq.s32.totalorder %v3263_v57, 1 }
 0xaa0   : > { %v3197_v61 = vsel %vm1284_vm7, %v1271_v59, %v3131_v62 }
 0xaa1   : > { %v3201_v55 = vpack.c.bf16 %v3197_v61, %v3197_v61 }
 0xaa3   : > { %1381 = vrot.lane.b32.xlu0 %v3201_v55, %s2786_s9 }
 0xb0e   : > { %v1333_v0 = vpop.permute.xlu1 %1332 }
 0xb0f   : > { %2500 = vmatmul.mubr.msk.bf16.vlgmr.msra.gmra.mxu0 %vm499_vm2, %v1333_v0 }
 0xb10   : > { %2512 = vmatpush3.bf16.msra.mxu0 %v2931_v17  ;;  %2515 = vmatprep.mubr.msk.bf16.mxu0 %vm2785_vm1, %v2784_v18 }
 0xb11   : > { %2513 = vmatprep.subr.bf16.mxu0 %v2784_v18 }
 0xb14   : > { %2514 = vmatpush3.bf16.msra.mxu0 %v2944_v20 }
 0xb15   : > { %v1382_v62 = vpop.permute.xlu0 %1381  ;;  %2527 = vmatprep.subr.bf16.mxu0 %v2784_v18 }
 0xb16   : > { %2508 = vmatmul.mubr.msk.bf16.vlgmr.msra.gmra.mxu1 %vm499_vm2, %v1382_v62 }
 0xb17   : > { %2520 = vmatpush3.bf16.msra.mxu1 %v2938_v19  ;;  %2523 = vmatprep.mubr.msk.bf16.mxu1 %vm2785_vm1, %v2784_v18 }
 0xb18   : > { %2521 = vmatprep.subr.bf16.mxu1 %v2784_v18 }
 0xb1b   : > { %2522 = vmatpush3.bf16.msra.mxu1 %v2953_v21 }
 0xb1c   : > { %2535 = vmatprep.subr.bf16.mxu1 %v2784_v18 }
 0xbcf   : > { %v1371_v2 = vpop.f32.mrf.mxu0 }
 0xbd0   : > { %v1377_v3 = vadd.f32 %v1371_v2, %v1331_v63 }
 0xbd1   : > { %v2501_v8 = vpop.f32.mrf.mxu0 }
 0xbd2   : > { %2675 = vtanh.f32 %v1377_v3  ;;  %v2352_v26 = vmul.f32 -1.442695, %v1377_v3  ;;  %v2358_v3 = vld [vmem:[%s2925_s18 + $0x2] sm:$0x1] }
 0xbd3   : > { %v1374_v9 = vpop.f32.mrf.mxu0 }
 0xbd4   : > { %v1582_v9 = vunpack.c.l.bf16 %v2358_v3  ;;  %v2366_v3 = vld [vmem:[%s2925_s18 + $0x1] sm:$0x1] }
 0xbd5   : > { %v2502_v12 = vpop.f32.mrf.mxu0 }
 0xbd6   : > { %v1420_v13 = vpop.f32.mrf.mxu1 }
 0xbd7   : > { %v1426_v14 = vadd.f32 %v1420_v13, %v1380_v10 }
 0xbd8   : > { %v2509_v15 = vpop.f32.mrf.mxu1 }
 0xbd9   : > { %2677 = vtanh.f32 %v1426_v14  ;;  %v2353_v27 = vmul.f32 -1.442695, %v1426_v14 }
 0xbda   : > { %v1423_v16 = vpop.f32.mrf.mxu1  ;;  %2679 = vpow2.f32 %v2352_v26 }
 0xbdb   : > { %2681 = vpow2.f32 %v2353_v27 }
 0xbdc   : > { %v2510_v23 = vpop.f32.mrf.mxu1 }
 0xbdf   : > { %v2676_v24 = vpop.eup %2675 }
 0xbe0   : > { %1436 = vrot.lane.b32.xlu1 %v2676_v24, %s2787_s12 }
 0xbe6   : > { %v2678_v25 = vpop.eup %2677 }
 0xbe7   : > { %1460 = vrot.lane.b32.xlu0 %v2678_v25, %s2787_s12  ;;  %v2680_v28 = vpop.eup %2679 }
 0xbe8   : > { %v1430_v29 = vadd.f32 1.0, %v2680_v28  ;;  %v2682_v30 = vpop.eup %2681 }
 0xbe9   : > { %v1454_v31 = vadd.f32 1.0, %v2682_v30 }
 0xbea   : > { %2683 = vrcp.f32 %v1430_v29 }
 0xbeb   : > { %2685 = vrcp.f32 %v1454_v31 }
 0xbf7   : > { %v2684_v32 = vpop.eup %2683 }
 0xbf8   : > { %v2686_v35 = vpop.eup %2685  ;;  %v1434_v39 = vmul.f32 %v2684_v32, %v3229_v38 }
 0xbf9   : > { %v1458_v46 = vmul.f32 %v2686_v35, %v3239_v44 }
 0xc52   : > { %v1437_v33 = vpop.permute.xlu1 %1436 }
 0xc53   : > { %v1439_v34 = vmul.f32 %v2684_v32, %v1437_v33 }
 0xc55   : > { %1441 = vrot.lane.b32.xlu1 %v1439_v34, %s2786_s9 }
 0xc59   : > { %v1461_v36 = vpop.permute.xlu0 %1460 }
 0xc5a   : > { %v1463_v37 = vmul.f32 %v2686_v35, %v1461_v36 }
 0xc5c   : > { %1465 = vrot.lane.b32.xlu0 %v1463_v37, %s2786_s9 }
 0xcc7   : > { %v1442_v40 = vpop.permute.xlu1 %1441 }
 0xcc8   : > { %v3232_v43 = vadd.f32 %v1442_v40, %v1434_v39 }
 0xcca   : > { %2687 = vtanh.f32 %v3232_v43 }
 0xcce   : > { %v1466_v49 = vpop.permute.xlu0 %1465 }
 0xccf   : > { %v3242_v48 = vadd.f32 %v1466_v49, %v1458_v46 }
 0xcd1   : > { %2689 = vtanh.f32 %v3242_v48  ;;  %v1488_v40 = vsel %vm1486_vm9, %v3242_v48, %v3239_v44 }
 0xcd7   : > { %v2688_v47 = vpop.eup %2687 }
 0xcd8   : > { %1447 = vrot.lane.b32.xlu1 %v2688_v47, %s2787_s12 }
 0xcde   : > { %v2690_v41 = vpop.eup %2689 }
 0xcdf   : > { %1471 = vrot.lane.b32.xlu0 %v2690_v41, %s2787_s12  ;;  %v3313_v41 = vstv %s1679_s20  ;;  %s1874_s20 = scalar_select %p1873_p8, 1, 0 }
 0xce0   : > { %vm1681_vm10 = vcmp.eq.s32.totalorder %v3313_v41, 1 }
 0xd4a   : > { %v1448_v45 = vpop.permute.xlu1 %1447 }
 0xd4b   : > { %v1450_v50 = vmul.f32 %v2684_v32, %v1448_v45 }
 0xd4d   : > { %v3255_v51 = vsel %vm1479_vm8, %v1450_v50, %v3183_v52 }
 0xd4e   : > { %v3259_v54 = vpack.c.bf16 %v3255_v51, %v3255_v51 }
 0xd50   : > { %1534 = vrot.lane.b32.xlu1 %v3259_v54, %s2786_s9 }
 0xd51   : > { %v1472_v59 = vpop.permute.xlu0 %1471 }
 0xd52   : > { %v1474_v0 = vmul.f32 %v2686_v35, %v1472_v59  ;;  %v3297_v35 = vsel %vm1479_vm8, %v3232_v43, %v3229_v38 }
 0xd54   : > { %v1487_v62 = vsel %vm1486_vm9, %v1474_v0, %v3197_v61 }
 0xd55   : > { %v3269_v1 = vpack.c.bf16 %v1487_v62, %v1487_v62 }
 0xd57   : > { %1583 = vrot.lane.b32.xlu0 %v3269_v1, %s2786_s9 }
 0xdc2   : > { %v1535_v52 = vpop.permute.xlu1 %1534 }
 0xdc3   : > { %2516 = vmatmul.mubr.msk.bf16.vlgmr.msra.gmra.mxu0 %vm499_vm2, %v1535_v52  ;;  %v2740_v52 = vld [vmem:[%s3565_s2] sm:$0xff]  }
 0xdc4   : > { %2528 = vmatpush3.bf16.msra.mxu0 %v2931_v17  ;;  %2531 = vmatprep.mubr.msk.bf16.mxu0 %vm2785_vm1, %v2784_v18  ;;  %v2356_v17 = vld [vmem:[%s2923_s17 + $0x5] sm:$0x1] }
 0xdc5   : > { %2529 = vmatprep.subr.bf16.mxu0 %v2784_v18  ;;  %v1533_v63 = vunpack.c.l.bf16 %v2356_v17  ;;  %v2742_v17 = vld [vmem:[%s3566_s3] sm:$0xff]  }
 0xdc8   : > { %2530 = vmatpush3.bf16.msra.mxu0 %v2944_v20 }
 0xdc9   : > { %v1584_v61 = vpop.permute.xlu0 %1583  ;;  %2543 = vmatprep.subr.bf16.mxu0 %v2784_v18 }
 0xdca   : > { %2524 = vmatmul.mubr.msk.bf16.vlgmr.msra.gmra.mxu1 %vm499_vm2, %v1584_v61  ;;  %v2741_v61 = vld [vmem:[%s3566_s3 + $0x8] sm:$0xff]  }
 0xdcb   : > { %2536 = vmatpush3.bf16.msra.mxu1 %v2938_v19  ;;  %2539 = vmatprep.mubr.msk.bf16.mxu1 %vm2785_vm1, %v2784_v18 }
 0xdcc   : > { %2537 = vmatprep.subr.bf16.mxu1 %v2784_v18 }
 0xdcf   : > { %2538 = vmatpush3.bf16.msra.mxu1 %v2953_v21 }
 0xdd0   : > { %2551 = vmatprep.subr.bf16.mxu1 %v2784_v18 }
 0xe83   : > { %v1573_v2 = vpop.f32.mrf.mxu0 }
 0xe84   : > { %v1579_v20 = vadd.f32 %v1573_v2, %v1533_v63  ;;  %v2364_v63 = vld [vmem:[%s2923_s17 + $0x6] sm:$0x1] }
 0xe85   : > { %v2517_v6 = vpop.f32.mrf.mxu0  ;;  %v1728_v2 = vunpack.c.l.bf16 %v2364_v63 }
 0xe86   : > { %2691 = vtanh.f32 %v1579_v20  ;;  %v2360_v23 = vmul.f32 -1.442695, %v1579_v20 }
 0xe87   : > { %v1576_v8 = vpop.f32.mrf.mxu0 }
 0xe89   : > { %v2518_v10 = vpop.f32.mrf.mxu0 }
 0xe8a   : > { %v1622_v19 = vpop.f32.mrf.mxu1 }
 0xe8b   : > { %v1628_v12 = vadd.f32 %v1622_v19, %v1582_v9  ;;  %v1777_v9 = vunpack.c.l.bf16 %v2366_v3 }
 0xe8c   : > { %v2525_v13 = vpop.f32.mrf.mxu1 }
 0xe8d   : > { %2693 = vtanh.f32 %v1628_v12  ;;  %v2361_v24 = vmul.f32 -1.442695, %v1628_v12 }
 0xe8e   : > { %v1625_v14 = vpop.f32.mrf.mxu1  ;;  %2695 = vpow2.f32 %v2360_v23 }
 0xe8f   : > { %2697 = vpow2.f32 %v2361_v24 }
 0xe90   : > { %v2526_v15 = vpop.f32.mrf.mxu1 }
 0xe93   : > { %v2692_v16 = vpop.eup %2691 }
 0xe94   : > { %1638 = vrot.lane.b32.xlu1 %v2692_v16, %s2787_s12 }
 0xe9a   : > { %v2694_v21 = vpop.eup %2693 }
 0xe9b   : > { %1662 = vrot.lane.b32.xlu0 %v2694_v21, %s2787_s12  ;;  %v2696_v25 = vpop.eup %2695 }
 0xe9c   : > { %v1632_v26 = vadd.f32 1.0, %v2696_v25  ;;  %v2698_v27 = vpop.eup %2697 }
 0xe9d   : > { %v1656_v28 = vadd.f32 1.0, %v2698_v27 }
 0xe9e   : > { %2699 = vrcp.f32 %v1632_v26 }
 0xe9f   : > { %2701 = vrcp.f32 %v1656_v28 }
 0xeab   : > { %v2700_v29 = vpop.eup %2699 }
 0xeac   : > { %v2702_v32 = vpop.eup %2701  ;;  %v1636_v36 = vmul.f32 %v2700_v29, %v3297_v35 }
 0xead   : > { %v1660_v46 = vmul.f32 %v2702_v32, %v1488_v40 }
 0xf06   : > { %v1639_v30 = vpop.permute.xlu1 %1638 }
 0xf07   : > { %v1641_v31 = vmul.f32 %v2700_v29, %v1639_v30 }
 0xf09   : > { %1643 = vrot.lane.b32.xlu1 %v1641_v31, %s2786_s9 }
 0xf0d   : > { %v1663_v33 = vpop.permute.xlu0 %1662 }
 0xf0e   : > { %v1665_v34 = vmul.f32 %v2702_v32, %v1663_v33 }
 0xf10   : > { %1667 = vrot.lane.b32.xlu0 %v1665_v34, %s2786_s9 }
 0xf7b   : > { %v1644_v37 = vpop.permute.xlu1 %1643 }
 0xf7c   : > { %v3300_v39 = vadd.f32 %v1644_v37, %v1636_v36 }
 0xf7e   : > { %2703 = vtanh.f32 %v3300_v39  ;;  %v3361_v36 = vsel %vm1681_vm10, %v3300_v39, %v3297_v35  ;;  %v1875_v35 = vstv %s1874_s20 }
 0xf7f   : > { %vm1876_vm11 = vcmp.eq.s32.totalorder %v1875_v35, 1 }
 0xf82   : > { %v1668_v49 = vpop.permute.xlu0 %1667 }
 0xf83   : > { %v3307_v47 = vadd.f32 %v1668_v49, %v1660_v46 }
 0xf85   : > { %2705 = vtanh.f32 %v3307_v47 }
 0xf8b   : > { %v2704_v38 = vpop.eup %2703 }
 0xf8c   : > { %1649 = vrot.lane.b32.xlu1 %v2704_v38, %s2787_s12 }
 0xf92   : > { %v2706_v43 = vpop.eup %2705 }
 0xf93   : > { %1673 = vrot.lane.b32.xlu0 %v2706_v43, %s2787_s12 }
 0xffe   : > { %v1650_v42 = vpop.permute.xlu1 %1649 }
 0xfff   : > { %v1652_v45 = vmul.f32 %v2700_v29, %v1650_v42 }
0x1001   : > { %v3319_v44 = vsel %vm1681_vm10, %v1652_v45, %v3255_v51  ;;  %v2739_v51 = vld [vmem:[%s3565_s2 + $0x8] sm:$0xff]  }
0x1002   : > { %v3323_v48 = vpack.c.bf16 %v3319_v44, %v3319_v44 }
0x1004   : > { %1729 = vrot.lane.b32.xlu1 %v3323_v48, %s2786_s9 }
0x1005   : > { %v1674_v50 = vpop.permute.xlu0 %1673 }
0x1006   : > { %v1676_v57 = vmul.f32 %v2702_v32, %v1674_v50 }
0x1008   : > { %v3327_v59 = vpack.c.bf16 %v1676_v57, %v1676_v57 }
0x100a   : > { %1778 = vrot.lane.b32.xlu0 %v3327_v59, %s2786_s9 }
0x1076   : > { %v1730_v0 = vpop.permute.xlu1 %1729 }
0x1077   : > { %2532 = vmatmul.mubr.msk.bf16.vlgmr.msra.gmra.mxu0 %vm499_vm2, %v1730_v0 }
0x1078   : > { %2544 = vmatpush3.bf16.msra.mxu0 %v2739_v51  ;;  %2547 = vmatprep.mubr.msk.bf16.mxu0 %vm2785_vm1, %v2784_v18 }
0x1079   : > { %2545 = vmatprep.subr.bf16.mxu0 %v2784_v18 }
0x107c   : > { %v1779_v62 = vpop.permute.xlu0 %1778  ;;  %2546 = vmatpush3.bf16.msra.mxu0 %v2740_v52 }
0x107d   : > { %2540 = vmatmul.mubr.msk.bf16.vlgmr.msra.gmra.mxu1 %vm499_vm2, %v1779_v62 }
0x107e   : > { %2552 = vmatpush3.bf16.msra.mxu1 %v2741_v61  ;;  %2555 = vmatprep.mubr.msk.bf16.mxu1 %vm2785_vm1, %v2784_v18 }
0x107f   : > { %2553 = vmatprep.subr.bf16.mxu1 %v2784_v18 }
0x1082   : > { %2554 = vmatpush3.bf16.msra.mxu1 %v2742_v17  ;;  %v1970_v17 = vld [vmem:[%s2925_s18] sm:$0x1] }
0x1083   : > { %v1971_v3 = vunpack.c.l.bf16 %v1970_v17 }
0x1137   : > { %v1768_v20 = vpop.f32.mrf.mxu0 }
0x1138   : > { %v1774_v6 = vadd.f32 %v1768_v20, %v1728_v2 }
0x1139   : > { %v2533_v8 = vpop.f32.mrf.mxu0 }
0x113a   : > { %2707 = vtanh.f32 %v1774_v6  ;;  %v2368_v23 = vmul.f32 -1.442695, %v1774_v6 }
0x113b   : > { %v1771_v10 = vpop.f32.mrf.mxu0 }
0x113d   : > { %v2534_v19 = vpop.f32.mrf.mxu0  ;;  %v1817_v12 = vpop.f32.mrf.mxu1 }
0x113e   : > { %v1823_v13 = vadd.f32 %v1817_v12, %v1777_v9 }
0x113f   : > { %v2541_v14 = vpop.f32.mrf.mxu1 }
0x1140   : > { %2709 = vtanh.f32 %v1823_v13  ;;  %v2369_v24 = vmul.f32 -1.442695, %v1823_v13 }
0x1141   : > { %v1820_v18 = vpop.f32.mrf.mxu1  ;;  %2711 = vpow2.f32 %v2368_v23 }
0x1142   : > { %2713 = vpow2.f32 %v2369_v24 }
0x1143   : > { %v2542_v15 = vpop.f32.mrf.mxu1 }
0x1147   : > { %v2708_v16 = vpop.eup %2707 }
0x1148   : > { %1833 = vrot.lane.b32.xlu1 %v2708_v16, %s2787_s12 }
0x114d   : > { %v2710_v21 = vpop.eup %2709 }
0x114e   : > { %1857 = vrot.lane.b32.xlu0 %v2710_v21, %s2787_s12  ;;  %v2712_v25 = vpop.eup %2711 }
0x114f   : > { %v1827_v26 = vadd.f32 1.0, %v2712_v25  ;;  %v2714_v27 = vpop.eup %2713 }
0x1150   : > { %v1851_v28 = vadd.f32 1.0, %v2714_v27 }
0x1151   : > { %2715 = vrcp.f32 %v1827_v26 }
0x1152   : > { %2717 = vrcp.f32 %v1851_v28 }
0x115e   : > { %v2716_v29 = vpop.eup %2715 }
0x115f   : > { %v2718_v32 = vpop.eup %2717  ;;  %v1831_v37 = vmul.f32 %v2716_v29, %v3361_v36 }
0x1160   : > { %v1855_v49 = vmul.f32 %v2718_v32, %v3307_v47 }
0x11ba   : > { %v1834_v30 = vpop.permute.xlu1 %1833 }
0x11bb   : > { %v1836_v31 = vmul.f32 %v2716_v29, %v1834_v30 }
0x11bd   : > { %1838 = vrot.lane.b32.xlu1 %v1836_v31, %s2786_s9 }
0x11c0   : > { %v1858_v33 = vpop.permute.xlu0 %1857 }
0x11c1   : > { %v1860_v34 = vmul.f32 %v2718_v32, %v1858_v33 }
0x11c3   : > { %1862 = vrot.lane.b32.xlu0 %v1860_v34, %s2786_s9 }
0x122f   : > { %v1839_v40 = vpop.permute.xlu1 %1838 }
0x1230   : > { %v3364_v46 = vadd.f32 %v1839_v40, %v1831_v37  ;;  %v2790_v40 = vmov 1966171168  }
0x1232   : > { %2719 = vtanh.f32 %v3364_v46 }
0x1235   : > { %v1863_v38 = vpop.permute.xlu0 %1862 }
0x1236   : > { %v3368_v43 = vadd.f32 %v1863_v38, %v1855_v49  ;;  %v697_v49 = vunpack.c.l.s4 %v2790_v40 }
0x1238   : > { %2721 = vtanh.f32 %v3368_v43 }
0x123f   : > { %v2720_v42 = vpop.eup %2719 }
0x1240   : > { %1844 = vrot.lane.b32.xlu1 %v2720_v42, %s2787_s12 }
0x1245   : > { %v2722_v41 = vpop.eup %2721 }
0x1246   : > { %1868 = vrot.lane.b32.xlu0 %v2722_v41, %s2787_s12 }
0x12b2   : > { %v1845_v39 = vpop.permute.xlu1 %1844 }
0x12b3   : > { %v1847_v45 = vmul.f32 %v2716_v29, %v1845_v39  ;;  %v698_v39 = vunpack.c.0.s8 %v697_v49 }
0x12b5   : > { %v3376_v47 = vsel %vm1876_vm11, %v1847_v45, %v3319_v44  ;;  %v2372_v44 = vld [vmem:[%s2923_s17 + $0x7] sm:$0x1]  ;;  %s2066_s17 = sadd.s32 7, %s2904_s21 }
0x12b6   : > { %v3380_v50 = vpack.c.bf16 %v3376_v47, %v3376_v47  ;;  %v1923_v61 = vunpack.c.l.bf16 %v2372_v44  ;;  %p2067_p9 = scmp.lt.s32.totalorder %s2066_s17, 11 }
0x12b8   : > { %v1869_v57 = vpop.permute.xlu0 %1868  ;;  %1924 = vrot.lane.b32.xlu1 %v3380_v50, %s2786_s9  ;;  %s2068_s21 = scalar_select %p2067_p9, 1, 0 }
0x12b9   : > { %v1871_v0 = vmul.f32 %v2718_v32, %v1869_v57  ;;  %v3405_v32 = vsel %vm1876_vm11, %v3364_v46, %v3361_v36  ;;  %v3415_v36 = vsub.s32 %v698_v39, %v2997_v4 }
0x12bb   : > { %v3384_v51 = vpack.c.bf16 %v1871_v0, %v1871_v0  ;;  %v702_v46 = vrot.slane %v3008_v11, %v3415_v36  ;;  %v897_v45 = vrot.slane %v3062_v58, %v3415_v36  ;;  %v723_v57 = vrot.slane %v3021_v22, %v3415_v36 }
0x12bc   : > { %v1092_v4 = vrot.slane %v3121_v56, %v3415_v36  ;;  %v918_v58 = vrot.slane %v3076_v7, %v3415_v36  ;;  %v1113_v56 = vrot.slane %v3135_v60, %v3415_v36 }
0x12bd   : > { %1972 = vrot.lane.b32.xlu0 %v3384_v51, %s2786_s9  ;;  %v904_v11 = vrot.slane %v897_v45, %v3415_v36 }
0x12be   : > { %v1099_v22 = vrot.slane %v1092_v4, %v3415_v36  ;;  %v925_v44 = vrot.slane %v918_v58, %v3415_v36  ;;  %v1120_v17 = vrot.slane %v1113_v56, %v3415_v36 }
0x132a   : > { %v1925_v62 = vpop.permute.xlu1 %1924 }
0x132b   : > { %2548 = vmatmul.mubr.msk.bf16.vlgmr.msra.gmra.mxu0 %vm499_vm2, %v1925_v62  ;;  %v730_v62 = vrot.slane %v723_v57, %v3415_v36 }
0x132f   : > { %v1973_v52 = vpop.permute.xlu0 %1972 }
0x1330   : > { %2556 = vmatmul.mubr.msk.bf16.vlgmr.msra.gmra.mxu1 %vm499_vm2, %v1973_v52  ;;  %v1295_v52 = vrot.slane %v3187_v53, %v3415_v36  ;;  %v1692_v53 = vrot.slane %v3323_v48, %v3415_v36 }
0x1332   : > { %v1302_v7 = vrot.slane %v1295_v52, %v3415_v36 }
0x13eb   : > { %v1963_v63 = vpop.f32.mrf.mxu0 }
0x13ec   : > { %v1969_v2 = vadd.f32 %v1963_v63, %v1923_v61  ;;  %v1497_v61 = vrot.slane %v3259_v54, %v3415_v36  ;;  %v1316_v63 = vrot.slane %v3201_v55, %v3415_v36  ;;  %v1518_v54 = vrot.slane %v3269_v1, %v3415_v36 }
0x13ed   : > { %v2549_v20 = vpop.f32.mrf.mxu0  ;;  %v1699_v55 = vrot.slane %v1692_v53, %v3415_v36 }
0x13ee   : > { %2723 = vtanh.f32 %v1969_v2  ;;  %v2375_v15 = vmul.f32 -1.442695, %v1969_v2  ;;  %v1504_v60 = vrot.slane %v1497_v61, %v3415_v36  ;;  %v1323_v2 = vrot.slane %v1316_v63, %v3415_v36 }
0x13ef   : > { %v1966_v6 = vpop.f32.mrf.mxu0  ;;  %v1887_v20 = vrot.slane %v3380_v50, %v3415_v36  ;;  %v1525_v48 = vrot.slane %v1518_v54, %v3415_v36 }
0x13f0   : > { %v2011_v8 = vpop.f32.mrf.mxu1  ;;  %v2069_v6 = vstv %s2068_s21 }
0x13f1   : > { %v2017_v9 = vadd.f32 %v2011_v8, %v1971_v3  ;;  %v2550_v10 = vpop.f32.mrf.mxu0  ;;  %v1713_v3 = vrot.slane %v3327_v59, %v3415_v36  ;;  %v1894_v1 = vrot.slane %v1887_v20, %v3415_v36  ;;  %v1908_v8 = vrot.slane %v3384_v51, %v3415_v36 }
0x13f2   : > { %v2557_v19 = vpop.f32.mrf.mxu1  ;;  %vm2070_vm12 = vcmp.eq.s32.totalorder %v2069_v6, 1 }
0x13f3   : > { %2725 = vtanh.f32 %v2017_v9  ;;  %v2376_v16 = vmul.f32 -1.442695, %v2017_v9  ;;  %v1720_v9 = vrot.slane %v1713_v3, %v3415_v36  ;;  %v1915_v59 = vrot.slane %v1908_v8, %v3415_v36 }
0x13f4   : > { %v2014_v12 = vpop.f32.mrf.mxu1  ;;  %2727 = vpow2.f32 %v2375_v15 }
0x13f5   : > { %2729 = vpow2.f32 %v2376_v16 }
0x13f6   : > { %v2558_v13 = vpop.f32.mrf.mxu1 }
0x13fb   : > { %v2724_v14 = vpop.eup %2723 }
0x13fc   : > { %2027 = vrot.lane.b32.xlu1 %v2724_v14, %s2787_s12 }
0x1400   : > { %v2726_v18 = vpop.eup %2725 }
0x1401   : > { %2051 = vrot.lane.b32.xlu0 %v2726_v18, %s2787_s12  ;;  %v2728_v21 = vpop.eup %2727 }
0x1402   : > { %v2021_v23 = vadd.f32 1.0, %v2728_v21  ;;  %v2730_v24 = vpop.eup %2729 }
0x1403   : > { %v2045_v25 = vadd.f32 1.0, %v2730_v24 }
0x1404   : > { %2731 = vrcp.f32 %v2021_v23 }
0x1405   : > { %2733 = vrcp.f32 %v2045_v25 }
0x1411   : > { %v3394_v26 = vpop.eup %2731 }
0x1412   : > { %v3398_v29 = vpop.eup %2733  ;;  %v2025_v33 = vmul.f32 %v3394_v26, %v3405_v32 }
0x1413   : > { %v2049_v38 = vmul.f32 %v3398_v29, %v3368_v43  ;;  %v709_v43 = vrot.slane %v702_v46, %v3415_v36 }
0x146e   : > { %v2028_v27 = vpop.permute.xlu1 %2027 }
0x146f   : > { %v2030_v28 = vmul.f32 %v3394_v26, %v2028_v27 }
0x1471   : > { %2032 = vrot.lane.b32.xlu1 %v2030_v28, %s2786_s9 }
0x1473   : > { %v2052_v30 = vpop.permute.xlu0 %2051 }
0x1474   : > { %v2054_v31 = vmul.f32 %v3398_v29, %v2052_v30 }
0x1476   : > { %2056 = vrot.lane.b32.xlu0 %v2054_v31, %s2786_s9 }
0x14e3   : > { %v2033_v34 = vpop.permute.xlu1 %2032 }
0x14e4   : > { %v2035_v37 = vadd.f32 %v2033_v34, %v2025_v33 }
0x14e6   : > { %2735 = vtanh.f32 %v2035_v37  ;;  %v2072_v50 = vsel %vm2070_vm12, %v2035_v37, %v3405_v32 }
0x14e7   : > { %v2134_v10 = vrot.slane %v2072_v50, %v3000_v5 }
0x14e8   : > { %v2057_v42 = vpop.permute.xlu0 %2056 }
0x14e9   : > { %v3411_v41 = vadd.f32 %v2057_v42, %v2049_v38 }
0x14eb   : > { %2737 = vtanh.f32 %v3411_v41  ;;  %v2158_v31 = vrot.slane %v3411_v41, %v3000_v5 }
0x14f3   : > { %v2736_v35 = vpop.eup %2735 }
0x14f4   : > { %2038 = vrot.lane.b32.xlu1 %v2736_v35, %s2787_s12 }
0x14f8   : > { %v2738_v0 = vpop.eup %2737  ;;  %710 = vrot.lane.b32.xlu1 %v709_v43, %s2786_s9 }
0x14f9   : > { %2062 = vrot.lane.b32.xlu0 %v2738_v0, %s2787_s12 }
0x14fc   : > { %905 = vrot.lane.b32.xlu1 %v904_v11, %s2786_s9 }
0x14fd   : > { %731 = vrot.lane.b32.xlu0 %v730_v62, %s2786_s9 }
0x1500   : > { %1100 = vrot.lane.b32.xlu1 %v1099_v22, %s2786_s9 }
0x1501   : > { %926 = vrot.lane.b32.xlu0 %v925_v44, %s2786_s9 }
0x1504   : > { %1303 = vrot.lane.b32.xlu1 %v1302_v7, %s2786_s9 }
0x1505   : > { %1121 = vrot.lane.b32.xlu0 %v1120_v17, %s2786_s9 }
0x1508   : > { %1505 = vrot.lane.b32.xlu1 %v1504_v60, %s2786_s9 }
0x1509   : > { %1324 = vrot.lane.b32.xlu0 %v1323_v2, %s2786_s9 }
0x150c   : > { %1700 = vrot.lane.b32.xlu1 %v1699_v55, %s2786_s9 }
0x150d   : > { %1526 = vrot.lane.b32.xlu0 %v1525_v48, %s2786_s9 }
0x1510   : > { %1895 = vrot.lane.b32.xlu1 %v1894_v1, %s2786_s9 }
0x1511   : > { %1721 = vrot.lane.b32.xlu0 %v1720_v9, %s2786_s9 }
0x1515   : > { %1916 = vrot.lane.b32.xlu0 %v1915_v59, %s2786_s9 }
0x1519   : > { %2135 = vrot.lane.b32.xlu0 %v2134_v10, %s2789_s24 }
0x1566   : > { %v2039_v51 = vpop.permute.xlu1 %2038 }
0x1567   : > { %v2041_v19 = vmul.f32 %v3394_v26, %v2039_v51 }
0x1569   : > { %v2071_v12 = vsel %vm2070_vm12, %v2041_v19, %v3376_v47 }
0x156a   : > { %v711_v13 = vpop.permute.xlu1 %710  ;;  %v2121_v14 = vrot.slane %v2071_v12, %v3000_v5  ;;  %v2073_v18 = vpack.c.bf16 %v2071_v12, %v2071_v12 }
0x156b   : > { %714 = vst.msk [vmem:[%s2916_s26] sm:$0x1] %vm713_vm13, %v711_v13  ;;  %v2063_v15 = vpop.permute.xlu0 %2062 }
0x156c   : > { %v2065_v16 = vmul.f32 %v3398_v29, %v2063_v15  ;;  %2122 = vrot.lane.b32.xlu1 %v2121_v14, %s2786_s9  ;;  %v2081_v21 = vrot.slane %v2073_v18, %v3415_v36 }
0x156e   : > { %v2094_v23 = vpack.c.bf16 %v2065_v16, %v2065_v16  ;;  %v906_v24 = vpop.permute.xlu1 %905  ;;  %v2088_v25 = vrot.slane %v2081_v21, %v3415_v36  ;;  %v2146_v27 = vrot.slane %v2065_v16, %v3000_v5 }
0x156f   : > { %2329 = vst.msk [vmem:[%s2916_s26 + $0x1] sm:$0x1] %vm713_vm13, %v906_v24  ;;  %v732_v47 = vpop.permute.xlu0 %731 }
0x1570   : > { %v2102_v26 = vrot.slane %v2094_v23, %v3415_v36  ;;  %2322 = vst.msk [vmem:[%s2921_s14 + $0x7] sm:$0x1] %vm713_vm13, %v732_v47  ;;  %2089 = vrot.lane.b32.xlu1 %v2088_v25, %s2786_s9 }
0x1572   : > { %v1101_v28 = vpop.permute.xlu1 %1100  ;;  %v2109_v29 = vrot.slane %v2102_v26, %v3415_v36 }
0x1573   : > { %2337 = vst.msk [vmem:[%s2916_s26 + $0x2] sm:$0x1] %vm713_vm13, %v1101_v28  ;;  %v927_v30 = vpop.permute.xlu0 %926 }
0x1574   : > { %2330 = vst.msk [vmem:[%s2921_s14 + $0x6] sm:$0x1] %vm713_vm13, %v927_v30  ;;  %2110 = vrot.lane.b32.xlu0 %v2109_v29, %s2786_s9  ;;  %2147 = vrot.lane.b32.xlu1 %v2146_v27, %s2786_s9 }
0x1576   : > { %v1304_v32 = vpop.permute.xlu1 %1303 }
0x1577   : > { %2346 = vst.msk [vmem:[%s2916_s26 + $0x3] sm:$0x1] %vm713_vm13, %v1304_v32  ;;  %v1122_v33 = vpop.permute.xlu0 %1121 }
0x1578   : > { %2338 = vst.msk [vmem:[%s2921_s14 + $0x5] sm:$0x1] %vm713_vm13, %v1122_v33  ;;  %2159 = vrot.lane.b32.xlu0 %v2158_v31, %s2789_s24 }
0x157a   : > { %v1506_v34 = vpop.permute.xlu1 %1505 }
0x157b   : > { %2354 = vst.msk [vmem:[%s2916_s26 + $0x4] sm:$0x1] %vm713_vm13, %v1506_v34  ;;  %v1325_v37 = vpop.permute.xlu0 %1324 }
0x157c   : > { %2347 = vst.msk [vmem:[%s2921_s14 + $0x4] sm:$0x1] %vm713_vm13, %v1325_v37 }
0x157e   : > { %v1701_v40 = vpop.permute.xlu1 %1700 }
0x157f   : > { %2362 = vst.msk [vmem:[%s2916_s26 + $0x5] sm:$0x1] %vm713_vm13, %v1701_v40  ;;  %v1527_v5 = vpop.permute.xlu0 %1526 }
0x1580   : > { %2355 = vst.msk [vmem:[%s2921_s14 + $0x3] sm:$0x1] %vm713_vm13, %v1527_v5 }
0x1582   : > { %v1896_v49 = vpop.permute.xlu1 %1895 }
0x1583   : > { %2370 = vst.msk [vmem:[%s2916_s26 + $0x6] sm:$0x1] %vm713_vm13, %v1896_v49  ;;  %v1722_v38 = vpop.permute.xlu0 %1721 }
0x1584   : > { %2363 = vst.msk [vmem:[%s2921_s14 + $0x2] sm:$0x1] %vm713_vm13, %v1722_v38 }
0x1587   : > { %v1917_v42 = vpop.permute.xlu0 %1916 }
0x1588   : > { %2371 = vst.msk [vmem:[%s2921_s14 + $0x1] sm:$0x1] %vm713_vm13, %v1917_v42 }
0x158b   : > { %v2136_v41 = vpop.permute.xlu0 %2135 }
0x158c   : > { %2138 = vst.msk [vmem:[#allocation3] sm:$0x3] %vm2125_vm14, %v2136_v41  ;;  %2166 = vst.msk [vmem:[%s3570_s7] sm:$0x3] %vm2125_vm14, %v2136_v41 }
0x15de   : > { %v2123_v39 = vpop.permute.xlu1 %2122 }
0x15df   : > { %2126 = vst.msk [vmem:[#allocation2] sm:$0x3] %vm2125_vm14, %v2123_v39  ;;  %2163 = vst.msk [vmem:[%s3569_s6] sm:$0x3] %vm2125_vm14, %v2123_v39 }
0x15e2   : > { %v2090_v36 = vpop.permute.xlu1 %2089 }
0x15e3   : > { %2377 = vst.msk [vmem:[%s2916_s26 + $0x7] sm:$0x1] %vm713_vm13, %v2090_v36 }
0x15e6   : > { %v2111_v46 = vpop.permute.xlu0 %2110  ;;  %v2148_v35 = vpop.permute.xlu1 %2147 }
0x15e7   : > { %2113 = vst.msk [vmem:[%s2921_s14] sm:$0x1] %vm713_vm13, %v2111_v46 }
0x15e8   : > { %2150 = vst.msk [vmem:[#allocation2 + $0x2] sm:$0x3] %vm2125_vm14, %v2148_v35  ;;  %2378 = vst.msk [vmem:[%s3569_s6 + $0x2] sm:$0x3] %vm2125_vm14, %v2148_v35 }
0x15ea   : > { %v2160_v45 = vpop.permute.xlu0 %2159 }
0x15eb   : > { %2162 = vst.msk [vmem:[#allocation3 + $0x2] sm:$0x3] %vm2125_vm14, %v2160_v45  ;;  %2379 = vst.msk [vmem:[%s3570_s7 + $0x2] sm:$0x3] %vm2125_vm14, %v2160_v45 }
0x15ec PF: > { %p15_p10 = scmp.ge.s32.totalorder %s2860_s30, 4   ;;  %s3572_s24 = smov %s2769_s25 }
0x15ed   : > { %s3573_s25 = smov %s2879_s15  ;;  %s3574_s26 = smov %s2777_s27 }
0x15ee   : > { %s3575_s27 = smov %s2870_s11  ;;  %s3576_s28 = smov %s2860_s30 }
0x15ef   :  { %17 = sbr.rel (!%p15_p10) target bundleno = 3 (0x3), region = 225 }

</bundles_post_ra>
